<compile_context>
chip_gen: v5e
topology: v5e:2x2
jax: 0.10.0
libtpu: 0.0.40
codegen_flags: <defaults>
</compile_context>

<pallas_src>
import functools

import jax
import jax.numpy as jnp
from jax import lax
from jax.experimental import pallas as pl
from jax.experimental.pallas import tpu as pltpu


DILATION = 12


# ----------------------------------------------------------------------------
# In-kernel helpers
# ----------------------------------------------------------------------------
def _dilated_taps(x_ref, w_ref, *, d):
    """Dilated 3x3 'same' conv (padding == dilation) as 3 stacked-K matmuls.

    x_ref : (1, H, W, Cin) activation tile (bf16)
    w_ref : (3, 3*Cin, Cout) weights, pre-reshaped in the wrapper so that
            w_ref[tx, ty*Cin + c, o] == w_hwio[ty, tx, c, o]
    Returns an f32 (H*W, Cout) accumulator.
    """
    _, H, W, Cin = x_ref.shape
    Cout = w_ref.shape[-1]
    R = d + (d + W - 1) // W            # zero rows added above & below
    Hw = (H + 2 * d) * W                # flat window length per column tap
    HW = H * W

    # Halo staged in the activation dtype (bf16): half the staging VMEM / traffic
    # of the old f32 path.  Only the MXU input is cast to the weight dtype; the
    # accumulation is f32 via preferred_element_type.
    x = x_ref[0]                                                   # (H, W, Cin)
    zrows = jnp.zeros((R, W, Cin), x.dtype)
    # Zero-extend along H only (untiled major axis -> cheap concat), flatten once.
    xe2 = jnp.concatenate([zrows, x, zrows], axis=0).reshape((H + 2 * R) * W, Cin)

    # Column-validity masks generated in-kernel (no HBM mask inputs / DMA).
    col = lax.broadcasted_iota(jnp.int32, (Hw, 1), 0) % W          # (Hw, 1) int32

    acc = None
    for tx in range(3):                                            # column taps
        dx = (tx - 1) * d
        if dx != 0 and d >= W:
            continue                                               # fully out of range
        base = (R - d) * W + dx
        # One flat shifted window per column tap, shared by all 3 row taps.
        win = xe2[base:base + Hw, :]                               # (Hw, Cin)
        if dx < 0:
            win = jnp.where(col >= d, win, jnp.zeros((), win.dtype))
        elif dx > 0:
            win = jnp.where(col < W - d, win, jnp.zeros((), win.dtype))
        # Stack the 3 aligned row taps along channels -> one K=3*Cin matmul
        # instead of 3 K=Cin matmuls + 3 f32 accumulator passes.
        rows = jnp.concatenate(
            [win[(ty * d) * W:(ty * d) * W + HW, :] for ty in range(3)], axis=-1)
        part = jnp.dot(rows.astype(w_ref.dtype), w_ref[tx],
                       preferred_element_type=jnp.float32)         # (HW, Cout) f32
        acc = part if acc is None else acc + part
    if acc is None:                                                # d >= W corner case
        acc = jnp.zeros((HW, Cout), jnp.float32)
    return acc


def _conv3x3_relu_kernel(x_ref, w_ref, o_ref, *, d):
    """Dilated 3x3 conv + ReLU. (1,H,W,Cin) -> (1,H,W,Cout)."""
    _, H, W, _ = x_ref.shape
    Cout = o_ref.shape[-1]
    acc = _dilated_taps(x_ref, w_ref, d=d)
    o_ref[...] = jnp.maximum(acc, 0.0).reshape(1, H, W, Cout).astype(o_ref.dtype)


def _conv3x3_relu_conv1x1_kernel(x_ref, w3_ref, w1t_ref, o_ref, *, d):
    """Fused dilated 3x3 conv + ReLU + 1x1 conv.

    x_ref  : (1, H, W, Cin)
    w3_ref : (3, 3*Cin, Cmid)  (column-tap-stacked 3x3 weight)
    w1t_ref: (Cout, Cmid)      (1x1 weight, pre-transposed in the wrapper)
    o_ref  : (1, Cout, H*W)    lane-dense; already NCHW up to a free reshape.
    """
    acc = _dilated_taps(x_ref, w3_ref, d=d)                        # (H*W, Cmid) f32
    h = jnp.maximum(acc, 0.0).astype(w1t_ref.dtype)                # ReLU -> bf16
    # (Cout, Cmid) . (H*W, Cmid)^T -> (Cout, H*W): contraction over last dims,
    # keeps the store lane-dense.
    y = lax.dot_general(w1t_ref[...], h, (((1,), (1,)), ((), ())),
                        preferred_element_type=jnp.float32)
    o_ref[...] = y[None].astype(o_ref.dtype)


# ----------------------------------------------------------------------------
# pallas_call wrappers
# ----------------------------------------------------------------------------
def _vmem_limit_bytes():
    # ~3/4 of physical VMEM: ~48 MiB on v7x (64 MiB/TC), ~96 MiB on v5e/v6e.
    try:
        cap = int(pltpu.get_tpu_info().vmem_capacity_bytes)
    except Exception:
        cap = 128 * 1024 * 1024
    return max(32 * 1024 * 1024, (cap * 3) // 4)


def _compiler_params():
    return pltpu.CompilerParams(
        dimension_semantics=("parallel",),       # batch axis -> megacore / 2 TCs
        vmem_limit_bytes=_vmem_limit_bytes(),
    )


def _weight_spec(block_shape, index_map, single_buffer):
    if single_buffer:
        # Grid-invariant weights: don't waste VMEM double-buffering them.
        return pl.BlockSpec(block_shape, index_map, pipeline_mode=pl.Buffered(1))
    return pl.BlockSpec(block_shape, index_map)


def _stack_col_taps(w_hwio):
    """(3, 3, Cin, Cout) HWIO -> (3, 3*Cin, Cout) with column tap (kx) major."""
    kh, kw, cin, cout = w_hwio.shape
    return jnp.transpose(w_hwio, (1, 0, 2, 3)).reshape(kw, kh * cin, cout)


def conv3x3_relu(x_nhwc, w_col, *, dilation):
    """x: (N,H,W,Cin) -> (N,H,W,Cout); padding == dilation, then ReLU."""
    N, H, W, Cin = x_nhwc.shape
    Cout = w_col.shape[-1]
    dt = x_nhwc.dtype
    flops = 2 * N * H * W * 9 * Cin * Cout
    bytes_acc = int((x_nhwc.size + w_col.size + N * H * W * Cout) * dt.itemsize)

    def build(single_buffer_weights):
        return pl.pallas_call(
            functools.partial(_conv3x3_relu_kernel, d=dilation),
            out_shape=jax.ShapeDtypeStruct((N, H, W, Cout), dt),
            grid_spec=pltpu.PrefetchScalarGridSpec(
                num_scalar_prefetch=0,
                grid=(N,),
                in_specs=[
                    pl.BlockSpec((1, H, W, Cin), lambda n: (n, 0, 0, 0)),
                    _weight_spec((3, 3 * Cin, Cout), lambda n: (0, 0, 0),
                                 single_buffer_weights),
                ],
                out_specs=pl.BlockSpec((1, H, W, Cout), lambda n: (n, 0, 0, 0)),
            ),
            compiler_params=_compiler_params(),
            cost_estimate=pl.CostEstimate(flops=flops, transcendentals=0,
                                          bytes_accessed=bytes_acc),
        )

    try:
        return build(True)(x_nhwc, w_col)
    except Exception:
        return build(False)(x_nhwc, w_col)


def conv3x3_relu_conv1x1(x_nhwc, w3_col, w1t, *, dilation, out_dtype):
    """Fused conv7 + ReLU + conv8(1x1). Returns (N, Cout, H*W) (NCHW order)."""
    N, H, W, Cin = x_nhwc.shape
    Cmid = w3_col.shape[-1]
    Cout = w1t.shape[0]
    flops = 2 * N * H * W * (9 * Cin * Cmid + Cmid * Cout)
    bytes_acc = int((x_nhwc.size + w3_col.size + w1t.size) * x_nhwc.dtype.itemsize
                    + N * Cout * H * W * jnp.dtype(out_dtype).itemsize)

    def build(single_buffer_weights):
        return pl.pallas_call(
            functools.partial(_conv3x3_relu_conv1x1_kernel, d=dilation),
            out_shape=jax.ShapeDtypeStruct((N, Cout, H * W), out_dtype),
            grid_spec=pltpu.PrefetchScalarGridSpec(
                num_scalar_prefetch=0,
                grid=(N,),
                in_specs=[
                    pl.BlockSpec((1, H, W, Cin), lambda n: (n, 0, 0, 0)),
                    _weight_spec((3, 3 * Cin, Cmid), lambda n: (0, 0, 0),
                                 single_buffer_weights),
                    _weight_spec((Cout, Cmid), lambda n: (0, 0),
                                 single_buffer_weights),
                ],
                out_specs=pl.BlockSpec((1, Cout, H * W), lambda n: (n, 0, 0)),
            ),
            compiler_params=_compiler_params(),
            cost_estimate=pl.CostEstimate(flops=flops, transcendentals=0,
                                          bytes_accessed=bytes_acc),
        )

    try:
        return build(True)(x_nhwc, w3_col, w1t)
    except Exception:
        return build(False)(x_nhwc, w3_col, w1t)


def large_fov_forward(x_nchw, params, *, dilation=DILATION,
                      compute_dtype=jnp.bfloat16):
    """LargeFOV.forward: conv6(3x3,d=12) -> relu -> conv7 -> relu -> conv8(1x1).

    x_nchw: (N, Cin, H, W) (PyTorch layout). Returns (N, Cout, H, W). bias=False.
    """
    N, Cin, H, W = x_nchw.shape
    Cout = params["w8"].shape[-1]
    # NCHW -> NHWC (channels on lanes) + cast MXU operands to bf16 (plain-JAX glue).
    # TODO(synk): when Cin < 128 a H*W-on-lanes intermediate layout would avoid
    #             masked partial stores; kept channels-last for production Cin>=128.
    x = jnp.transpose(x_nchw, (0, 2, 3, 1)).astype(compute_dtype)
    w6c = _stack_col_taps(params["w6"]).astype(compute_dtype)      # (3, 3*Cin, Cin)
    w7c = _stack_col_taps(params["w7"]).astype(compute_dtype)      # (3, 3*Cin, Cin)
    w8t = params["w8"].T.astype(compute_dtype)                     # (Cout, Cin)

    h = conv3x3_relu(x, w6c, dilation=dilation)                    # (N,H,W,Cin) bf16
    out = conv3x3_relu_conv1x1(h, w7c, w8t, dilation=dilation,
                               out_dtype=x_nchw.dtype)             # (N,Cout,H*W)
    # (N, Cout, H*W) is already NCHW memory order -> free reshape, no transpose.
    return out.reshape(N, Cout, H, W)


# ----------------------------------------------------------------------------
# Deterministic parameter init (kaiming-normal-ish, fan_out, relu gain; no bias,
# matching the module's conv helpers which use bias=False).
# ----------------------------------------------------------------------------
def init_params(key, in_planes, out_planes):
    k6, k7, k8 = jax.random.split(key, 3)

    def kaiming_hwio(k, kh, kw, cin, cout):
        fan_out = kh * kw * cout
        std = (2.0 / fan_out) ** 0.5
        return std * jax.random.normal(k, (kh, kw, cin, cout), jnp.float32)

    return {
        "w6": kaiming_hwio(k6, 3, 3, in_planes, in_planes),
        "w7": kaiming_hwio(k7, 3, 3, in_planes, in_planes),
        "w8": kaiming_hwio(k8, 1, 1, in_planes, out_planes)[0, 0],   # (Cin, Cout)
    }


# ----------------------------------------------------------------------------
# Plain-JAX reference with the same precision policy (bf16 MXU, f32 accumulate)
# ----------------------------------------------------------------------------
def large_fov_reference(x_nchw, params, *, dilation=DILATION,
                        compute_dtype=jnp.bfloat16):
    x = jnp.transpose(x_nchw, (0, 2, 3, 1)).astype(compute_dtype)
    dn = ("NHWC", "HWIO", "NHWC")

    def conv(h, w, pad, dil):
        return lax.conv_general_dilated(
            h, w.astype(compute_dtype), window_strides=(1, 1),
            padding=[(pad, pad), (pad, pad)], rhs_dilation=(dil, dil),
            dimension_numbers=dn, preferred_element_type=jnp.float32)

    h = jax.nn.relu(conv(x, params["w6"], dilation, dilation)).astype(compute_dtype)
    h = jax.nn.relu(conv(h, params["w7"], dilation, dilation)).astype(compute_dtype)
    out = conv(h, params["w8"][None, None], 0, 1)
    return jnp.transpose(out, (0, 3, 1, 2)).astype(x_nchw.dtype)


if __name__ == "__main__":
    key = jax.random.PRNGKey(0)
    kx, kp = jax.random.split(key)

    N, C_IN, H, W = 2, 8, 16, 16
    C_OUT = 4

    x = jax.random.normal(kx, (N, C_IN, H, W), jnp.float32)   # NCHW like PyTorch
    params = init_params(kp, C_IN, C_OUT)

    out = jax.block_until_ready(large_fov_forward(x, params))
    ref = jax.block_until_ready(large_fov_reference(x, params))

    assert out.shape == (N, C_OUT, H, W), out.shape
    max_err = float(jnp.max(jnp.abs(out - ref)))
    assert jnp.allclose(out, ref, atol=1e-2, rtol=1e-2), max_err
    print("KERNEL_OK")
</pallas_src>

<mosaic_0001>
module attributes {stable_mosaic.version = 11 : i64} {
  func.func @_conv3x3_relu_kernel(%arg0: i32, %arg1: memref<1x16x16x8xbf16, #tpu.memory_space<vmem>>, %arg2: memref<3x24x8xbf16, #tpu.memory_space<vmem>>, %arg3: memref<1x16x16x8xbf16, #tpu.memory_space<vmem>>) attributes {dimension_semantics = [#tpu.dimension_semantics<parallel>], iteration_bounds = array<i64: 2>, scalar_prefetch = 0 : i64, scratch_operands = 0 : i64, tpu.core_type = #tpu.core_type<tc>, window_params = [{transform_indices = @transform_0, window_bounds = array<i64: 1, 16, 16, 8>}, {pipeline_mode = #tpu.pipeline_mode<synchronous>, transform_indices = @transform_1, window_bounds = array<i64: 3, 24, 8>}, {transform_indices = @transform_2, window_bounds = array<i64: 1, 16, 16, 8>}]} {
    %c0 = arith.constant 0 : index
    %c0_0 = arith.constant 0 : index
    %c0_1 = arith.constant 0 : index
    %c0_2 = arith.constant 0 : index
    %0 = vector.load %arg1[%c0, %c0_0, %c0_1, %c0_2] : memref<1x16x16x8xbf16, #tpu.memory_space<vmem>>, vector<1x16x16x8xbf16>
    %1 = vector.shape_cast %0 : vector<1x16x16x8xbf16> to vector<16x16x8xbf16>
    %cst = arith.constant 0.000000e+00 : bf16
    %2 = vector.broadcast %cst : bf16 to vector<13x16x8xbf16>
    %3 = tpu.concatenate %2, %1, %2 in 0 : vector<13x16x8xbf16>, vector<16x16x8xbf16>, vector<13x16x8xbf16> -> vector<42x16x8xbf16>
    %4 = vector.shape_cast %3 : vector<42x16x8xbf16> to vector<672x8xbf16>
    %5 = tpu.iota {dimensions = array<i32: 0>} : vector<640x1xi32>
    %c16_i32 = arith.constant 16 : i32
    %c0_i32 = arith.constant 0 : i32
    %6 = arith.cmpi eq, %c16_i32, %c0_i32 : i32
    %c1_i32 = arith.constant 1 : i32
    %7 = arith.select %6, %c1_i32, %c16_i32 : i32
    %8 = vector.broadcast %7 : i32 to vector<640x1xi32>
    %9 = arith.remsi %5, %8 : vector<640x1xi32>
    %c0_i32_3 = arith.constant 0 : i32
    %10 = vector.broadcast %c0_i32_3 : i32 to vector<640x1xi32>
    %11 = arith.cmpi ne, %9, %10 : vector<640x1xi32>
    %c0_i32_4 = arith.constant 0 : i32
    %12 = vector.broadcast %c0_i32_4 : i32 to vector<640x1xi32>
    %13 = arith.cmpi slt, %9, %12 : vector<640x1xi32>
    %c0_i32_5 = arith.constant 0 : i32
    %14 = arith.cmpi slt, %7, %c0_i32_5 : i32
    %15 = vector.broadcast %14 : i1 to vector<640x1xi1>
    %16 = vector.broadcast %15 : vector<640x1xi1> to vector<640x1xi1>
    %17 = arith.xori %13, %16 : vector<640x1xi1>
    %18 = arith.andi %17, %11 : vector<640x1xi1>
    %19 = vector.broadcast %7 : i32 to vector<640x1xi32>
    %20 = arith.addi %9, %19 : vector<640x1xi32>
    %21 = arith.select %18, %20, %9 : vector<640x1xi1>, vector<640x1xi32>
    %22 = vector.extract_strided_slice %4 {offsets = [4, 0], sizes = [640, 8], strides = [1, 1]} : vector<672x8xbf16> to vector<640x8xbf16>
    %c12_i32 = arith.constant 12 : i32
    %23 = vector.broadcast %c12_i32 : i32 to vector<640x1xi32>
    %24 = arith.cmpi sge, %21, %23 : vector<640x1xi32>
    %cst_6 = arith.constant 0.000000e+00 : bf16
    %25 = vector.shape_cast %24 : vector<640x1xi1> to vector<640x1xi1>
    %26 = vector.broadcast %25 : vector<640x1xi1> to vector<640x8xi1>
    %27 = vector.broadcast %cst_6 : bf16 to vector<640x8xbf16>
    %28 = arith.select %26, %22, %27 : vector<640x8xi1>, vector<640x8xbf16>
    %29 = vector.extract_strided_slice %28 {offsets = [0, 0], sizes = [256, 8], strides = [1, 1]} : vector<640x8xbf16> to vector<256x8xbf16>
    %30 = vector.extract_strided_slice %28 {offsets = [192, 0], sizes = [256, 8], strides = [1, 1]} : vector<640x8xbf16> to vector<256x8xbf16>
    %31 = vector.extract_strided_slice %28 {offsets = [384, 0], sizes = [256, 8], strides = [1, 1]} : vector<640x8xbf16> to vector<256x8xbf16>
    %32 = tpu.concatenate %29, %30, %31 in 1 : vector<256x8xbf16>, vector<256x8xbf16>, vector<256x8xbf16> -> vector<256x24xbf16>
    %c0_7 = arith.constant 0 : index
    %c0_8 = arith.constant 0 : index
    %c0_9 = arith.constant 0 : index
    %33 = vector.load %arg2[%c0_7, %c0_8, %c0_9] : memref<3x24x8xbf16, #tpu.memory_space<vmem>>, vector<1x24x8xbf16>
    %34 = vector.shape_cast %33 : vector<1x24x8xbf16> to vector<24x8xbf16>
    %cst_10 = arith.constant dense<0.000000e+00> : vector<256x8xf32>
    %35 = tpu.matmul %32, %34, %cst_10 {dimension_numbers = #tpu.dot_dimension_numbers<[1], [0], [0], [1], [0, 0, 1, 1], [], []>} : vector<256x24xbf16>, vector<24x8xbf16>, vector<256x8xf32> -> vector<256x8xf32>
    %36 = vector.extract_strided_slice %4 {offsets = [16, 0], sizes = [640, 8], strides = [1, 1]} : vector<672x8xbf16> to vector<640x8xbf16>
    %37 = vector.extract_strided_slice %36 {offsets = [0, 0], sizes = [256, 8], strides = [1, 1]} : vector<640x8xbf16> to vector<256x8xbf16>
    %38 = vector.extract_strided_slice %36 {offsets = [192, 0], sizes = [256, 8], strides = [1, 1]} : vector<640x8xbf16> to vector<256x8xbf16>
    %39 = vector.extract_strided_slice %36 {offsets = [384, 0], sizes = [256, 8], strides = [1, 1]} : vector<640x8xbf16> to vector<256x8xbf16>
    %40 = tpu.concatenate %37, %38, %39 in 1 : vector<256x8xbf16>, vector<256x8xbf16>, vector<256x8xbf16> -> vector<256x24xbf16>
    %c1 = arith.constant 1 : index
    %c0_11 = arith.constant 0 : index
    %c0_12 = arith.constant 0 : index
    %41 = vector.load %arg2[%c1, %c0_11, %c0_12] : memref<3x24x8xbf16, #tpu.memory_space<vmem>>, vector<1x24x8xbf16>
    %42 = vector.shape_cast %41 : vector<1x24x8xbf16> to vector<24x8xbf16>
    %cst_13 = arith.constant dense<0.000000e+00> : vector<256x8xf32>
    %43 = tpu.matmul %40, %42, %cst_13 {dimension_numbers = #tpu.dot_dimension_numbers<[1], [0], [0], [1], [0, 0, 1, 1], [], []>} : vector<256x24xbf16>, vector<24x8xbf16>, vector<256x8xf32> -> vector<256x8xf32>
    %44 = arith.addf %35, %43 : vector<256x8xf32>
    %45 = vector.extract_strided_slice %4 {offsets = [28, 0], sizes = [640, 8], strides = [1, 1]} : vector<672x8xbf16> to vector<640x8xbf16>
    %c4_i32 = arith.constant 4 : i32
    %46 = vector.broadcast %c4_i32 : i32 to vector<640x1xi32>
    %47 = arith.cmpi slt, %21, %46 : vector<640x1xi32>
    %cst_14 = arith.constant 0.000000e+00 : bf16
    %48 = vector.shape_cast %47 : vector<640x1xi1> to vector<640x1xi1>
    %49 = vector.broadcast %48 : vector<640x1xi1> to vector<640x8xi1>
    %50 = vector.broadcast %cst_14 : bf16 to vector<640x8xbf16>
    %51 = arith.select %49, %45, %50 : vector<640x8xi1>, vector<640x8xbf16>
    %52 = vector.extract_strided_slice %51 {offsets = [0, 0], sizes = [256, 8], strides = [1, 1]} : vector<640x8xbf16> to vector<256x8xbf16>
    %53 = vector.extract_strided_slice %51 {offsets = [192, 0], sizes = [256, 8], strides = [1, 1]} : vector<640x8xbf16> to vector<256x8xbf16>
    %54 = vector.extract_strided_slice %51 {offsets = [384, 0], sizes = [256, 8], strides = [1, 1]} : vector<640x8xbf16> to vector<256x8xbf16>
    %55 = tpu.concatenate %52, %53, %54 in 1 : vector<256x8xbf16>, vector<256x8xbf16>, vector<256x8xbf16> -> vector<256x24xbf16>
    %c2 = arith.constant 2 : index
    %c0_15 = arith.constant 0 : index
    %c0_16 = arith.constant 0 : index
    %56 = vector.load %arg2[%c2, %c0_15, %c0_16] : memref<3x24x8xbf16, #tpu.memory_space<vmem>>, vector<1x24x8xbf16>
    %57 = vector.shape_cast %56 : vector<1x24x8xbf16> to vector<24x8xbf16>
    %cst_17 = arith.constant dense<0.000000e+00> : vector<256x8xf32>
    %58 = tpu.matmul %55, %57, %cst_17 {dimension_numbers = #tpu.dot_dimension_numbers<[1], [0], [0], [1], [0, 0, 1, 1], [], []>} : vector<256x24xbf16>, vector<24x8xbf16>, vector<256x8xf32> -> vector<256x8xf32>
    %59 = arith.addf %44, %58 : vector<256x8xf32>
    %cst_18 = arith.constant 0.000000e+00 : f32
    %60 = vector.broadcast %cst_18 : f32 to vector<256x8xf32>
    %61 = arith.maximumf %59, %60 : vector<256x8xf32>
    %62 = vector.shape_cast %61 : vector<256x8xf32> to vector<1x16x16x8xf32>
    %63 = arith.truncf %62 : vector<1x16x16x8xf32> to vector<1x16x16x8xbf16>
    %c0_19 = arith.constant 0 : index
    %c0_20 = arith.constant 0 : index
    %c0_21 = arith.constant 0 : index
    %c0_22 = arith.constant 0 : index
    %64 = vector.load %arg3[%c0_19, %c0_20, %c0_21, %c0_22] : memref<1x16x16x8xbf16, #tpu.memory_space<vmem>>, vector<1x16x16x8xbf16>
    tpu.vector_store %arg3[%c0_19, %c0_20, %c0_21, %c0_22], %63 {strides = array<i32>} : memref<1x16x16x8xbf16, #tpu.memory_space<vmem>>, vector<1x16x16x8xbf16>,
    return
  }
  func.func @transform_0(%arg0: i32) -> (i32, i32, i32, i32) {
    %c0_i32 = arith.constant 0 : i32
    %c0_i32_0 = arith.constant 0 : i32
    %c0_i32_1 = arith.constant 0 : i32
    %c0_i32_2 = arith.constant 0 : i32
    return %arg0, %c0_i32, %c0_i32_0, %c0_i32_1 : i32, i32, i32, i32
  }
  func.func @transform_1(%arg0: i32) -> (i32, i32, i32) {
    %c0_i32 = arith.constant 0 : i32
    %c0_i32_0 = arith.constant 0 : i32
    %c0_i32_1 = arith.constant 0 : i32
    %c0_i32_2 = arith.constant 0 : i32
    return %c0_i32, %c0_i32_0, %c0_i32_1 : i32, i32, i32
  }
  func.func @transform_2(%arg0: i32) -> (i32, i32, i32, i32) {
    %c0_i32 = arith.constant 0 : i32
    %c0_i32_0 = arith.constant 0 : i32
    %c0_i32_1 = arith.constant 0 : i32
    %c0_i32_2 = arith.constant 0 : i32
    return %arg0, %c0_i32, %c0_i32_0, %c0_i32_1 : i32, i32, i32, i32
  }
}

module attributes {stable_mosaic.version = 11 : i64} {
  func.func @_conv3x3_relu_kernel(%arg0: i32, %arg1: memref<1x16x16x8xbf16, #tpu.memory_space<vmem>>, %arg2: memref<3x24x8xbf16, #tpu.memory_space<vmem>>, %arg3: memref<1x16x16x8xbf16, #tpu.memory_space<vmem>>) attributes {dimension_semantics = [#tpu.dimension_semantics<parallel>], iteration_bounds = array<i64: 2>, scalar_prefetch = 0 : i64, scratch_operands = 0 : i64, tpu.core_type = #tpu.core_type<tc>, window_params = [{transform_indices = @transform_0, window_bounds = array<i64: 1, 16, 16, 8>}, {pipeline_mode = #tpu.pipeline_mode<synchronous>, transform_indices = @transform_1, window_bounds = array<i64: 3, 24, 8>}, {transform_indices = @transform_2, window_bounds = array<i64: 1, 16, 16, 8>}]} {
    %c0 = arith.constant 0 : index
    %c0_0 = arith.constant 0 : index
    %c0_1 = arith.constant 0 : index
    %c0_2 = arith.constant 0 : index
    %0 = vector.load %arg1[%c0, %c0_0, %c0_1, %c0_2] : memref<1x16x16x8xbf16, #tpu.memory_space<vmem>>, vector<1x16x16x8xbf16>
    %1 = vector.shape_cast %0 : vector<1x16x16x8xbf16> to vector<16x16x8xbf16>
    %cst = arith.constant 0.000000e+00 : bf16
    %2 = vector.broadcast %cst : bf16 to vector<13x16x8xbf16>
    %3 = tpu.concatenate %2, %1, %2 in 0 : vector<13x16x8xbf16>, vector<16x16x8xbf16>, vector<13x16x8xbf16> -> vector<42x16x8xbf16>
    %4 = vector.shape_cast %3 : vector<42x16x8xbf16> to vector<672x8xbf16>
    %5 = tpu.iota {dimensions = array<i32: 0>} : vector<640x1xi32>
    %c16_i32 = arith.constant 16 : i32
    %c0_i32 = arith.constant 0 : i32
    %6 = arith.cmpi eq, %c16_i32, %c0_i32 : i32
    %c1_i32 = arith.constant 1 : i32
    %7 = arith.select %6, %c1_i32, %c16_i32 : i32
    %8 = vector.broadcast %7 : i32 to vector<640x1xi32>
    %9 = arith.remsi %5, %8 : vector<640x1xi32>
    %c0_i32_3 = arith.constant 0 : i32
    %10 = vector.broadcast %c0_i32_3 : i32 to vector<640x1xi32>
    %11 = arith.cmpi ne, %9, %10 : vector<640x1xi32>
    %c0_i32_4 = arith.constant 0 : i32
    %12 = vector.broadcast %c0_i32_4 : i32 to vector<640x1xi32>
    %13 = arith.cmpi slt, %9, %12 : vector<640x1xi32>
    %c0_i32_5 = arith.constant 0 : i32
    %14 = arith.cmpi slt, %7, %c0_i32_5 : i32
    %15 = vector.broadcast %14 : i1 to vector<640x1xi1>
    %16 = vector.broadcast %15 : vector<640x1xi1> to vector<640x1xi1>
    %17 = arith.xori %13, %16 : vector<640x1xi1>
    %18 = arith.andi %17, %11 : vector<640x1xi1>
    %19 = vector.broadcast %7 : i32 to vector<640x1xi32>
    %20 = arith.addi %9, %19 : vector<640x1xi32>
    %21 = arith.select %18, %20, %9 : vector<640x1xi1>, vector<640x1xi32>
    %22 = vector.extract_strided_slice %4 {offsets = [4, 0], sizes = [640, 8], strides = [1, 1]} : vector<672x8xbf16> to vector<640x8xbf16>
    %c12_i32 = arith.constant 12 : i32
    %23 = vector.broadcast %c12_i32 : i32 to vector<640x1xi32>
    %24 = arith.cmpi sge, %21, %23 : vector<640x1xi32>
    %cst_6 = arith.constant 0.000000e+00 : bf16
    %25 = vector.shape_cast %24 : vector<640x1xi1> to vector<640x1xi1>
    %26 = vector.broadcast %25 : vector<640x1xi1> to vector<640x8xi1>
    %27 = vector.broadcast %cst_6 : bf16 to vector<640x8xbf16>
    %28 = arith.select %26, %22, %27 : vector<640x8xi1>, vector<640x8xbf16>
    %29 = vector.extract_strided_slice %28 {offsets = [0, 0], sizes = [256, 8], strides = [1, 1]} : vector<640x8xbf16> to vector<256x8xbf16>
    %30 = vector.extract_strided_slice %28 {offsets = [192, 0], sizes = [256, 8], strides = [1, 1]} : vector<640x8xbf16> to vector<256x8xbf16>
    %31 = vector.extract_strided_slice %28 {offsets = [384, 0], sizes = [256, 8], strides = [1, 1]} : vector<640x8xbf16> to vector<256x8xbf16>
    %32 = tpu.concatenate %29, %30, %31 in 1 : vector<256x8xbf16>, vector<256x8xbf16>, vector<256x8xbf16> -> vector<256x24xbf16>
    %c0_7 = arith.constant 0 : index
    %c0_8 = arith.constant 0 : index
    %c0_9 = arith.constant 0 : index
    %33 = vector.load %arg2[%c0_7, %c0_8, %c0_9] : memref<3x24x8xbf16, #tpu.memory_space<vmem>>, vector<1x24x8xbf16>
    %34 = vector.shape_cast %33 : vector<1x24x8xbf16> to vector<24x8xbf16>
    %cst_10 = arith.constant dense<0.000000e+00> : vector<256x8xf32>
    %35 = tpu.matmul %32, %34, %cst_10 {dimension_numbers = #tpu.dot_dimension_numbers<[1], [0], [0], [1], [0, 0, 1, 1], [], []>} : vector<256x24xbf16>, vector<24x8xbf16>, vector<256x8xf32> -> vector<256x8xf32>
    %36 = vector.extract_strided_slice %4 {offsets = [16, 0], sizes = [640, 8], strides = [1, 1]} : vector<672x8xbf16> to vector<640x8xbf16>
    %37 = vector.extract_strided_slice %36 {offsets = [0, 0], sizes = [256, 8], strides = [1, 1]} : vector<640x8xbf16> to vector<256x8xbf16>
    %38 = vector.extract_strided_slice %36 {offsets = [192, 0], sizes = [256, 8], strides = [1, 1]} : vector<640x8xbf16> to vector<256x8xbf16>
    %39 = vector.extract_strided_slice %36 {offsets = [384, 0], sizes = [256, 8], strides = [1, 1]} : vector<640x8xbf16> to vector<256x8xbf16>
    %40 = tpu.concatenate %37, %38, %39 in 1 : vector<256x8xbf16>, vector<256x8xbf16>, vector<256x8xbf16> -> vector<256x24xbf16>
    %c1 = arith.constant 1 : index
    %c0_11 = arith.constant 0 : index
    %c0_12 = arith.constant 0 : index
    %41 = vector.load %arg2[%c1, %c0_11, %c0_12] : memref<3x24x8xbf16, #tpu.memory_space<vmem>>, vector<1x24x8xbf16>
    %42 = vector.shape_cast %41 : vector<1x24x8xbf16> to vector<24x8xbf16>
    %cst_13 = arith.constant dense<0.000000e+00> : vector<256x8xf32>
    %43 = tpu.matmul %40, %42, %cst_13 {dimension_numbers = #tpu.dot_dimension_numbers<[1], [0], [0], [1], [0, 0, 1, 1], [], []>} : vector<256x24xbf16>, vector<24x8xbf16>, vector<256x8xf32> -> vector<256x8xf32>
    %44 = arith.addf %35, %43 : vector<256x8xf32>
    %45 = vector.extract_strided_slice %4 {offsets = [28, 0], sizes = [640, 8], strides = [1, 1]} : vector<672x8xbf16> to vector<640x8xbf16>
    %c4_i32 = arith.constant 4 : i32
    %46 = vector.broadcast %c4_i32 : i32 to vector<640x1xi32>
    %47 = arith.cmpi slt, %21, %46 : vector<640x1xi32>
    %cst_14 = arith.constant 0.000000e+00 : bf16
    %48 = vector.shape_cast %47 : vector<640x1xi1> to vector<640x1xi1>
    %49 = vector.broadcast %48 : vector<640x1xi1> to vector<640x8xi1>
    %50 = vector.broadcast %cst_14 : bf16 to vector<640x8xbf16>
    %51 = arith.select %49, %45, %50 : vector<640x8xi1>, vector<640x8xbf16>
    %52 = vector.extract_strided_slice %51 {offsets = [0, 0], sizes = [256, 8], strides = [1, 1]} : vector<640x8xbf16> to vector<256x8xbf16>
    %53 = vector.extract_strided_slice %51 {offsets = [192, 0], sizes = [256, 8], strides = [1, 1]} : vector<640x8xbf16> to vector<256x8xbf16>
    %54 = vector.extract_strided_slice %51 {offsets = [384, 0], sizes = [256, 8], strides = [1, 1]} : vector<640x8xbf16> to vector<256x8xbf16>
    %55 = tpu.concatenate %52, %53, %54 in 1 : vector<256x8xbf16>, vector<256x8xbf16>, vector<256x8xbf16> -> vector<256x24xbf16>
    %c2 = arith.constant 2 : index
    %c0_15 = arith.constant 0 : index
    %c0_16 = arith.constant 0 : index
    %56 = vector.load %arg2[%c2, %c0_15, %c0_16] : memref<3x24x8xbf16, #tpu.memory_space<vmem>>, vector<1x24x8xbf16>
    %57 = vector.shape_cast %56 : vector<1x24x8xbf16> to vector<24x8xbf16>
    %cst_17 = arith.constant dense<0.000000e+00> : vector<256x8xf32>
    %58 = tpu.matmul %55, %57, %cst_17 {dimension_numbers = #tpu.dot_dimension_numbers<[1], [0], [0], [1], [0, 0, 1, 1], [], []>} : vector<256x24xbf16>, vector<24x8xbf16>, vector<256x8xf32> -> vector<256x8xf32>
    %59 = arith.addf %44, %58 : vector<256x8xf32>
    %cst_18 = arith.constant 0.000000e+00 : f32
    %60 = vector.broadcast %cst_18 : f32 to vector<256x8xf32>
    %61 = arith.maximumf %59, %60 : vector<256x8xf32>
    %62 = vector.shape_cast %61 : vector<256x8xf32> to vector<1x16x16x8xf32>
    %63 = arith.truncf %62 : vector<1x16x16x8xf32> to vector<1x16x16x8xbf16>
    %c0_19 = arith.constant 0 : index
    %c0_20 = arith.constant 0 : index
    %c0_21 = arith.constant 0 : index
    %c0_22 = arith.constant 0 : index
    %64 = vector.load %arg3[%c0_19, %c0_20, %c0_21, %c0_22] : memref<1x16x16x8xbf16, #tpu.memory_space<vmem>>, vector<1x16x16x8xbf16>
    tpu.vector_store %arg3[%c0_19, %c0_20, %c0_21, %c0_22], %63 {strides = array<i32>} : memref<1x16x16x8xbf16, #tpu.memory_space<vmem>>, vector<1x16x16x8xbf16>,
    return
  }
  func.func @transform_0(%arg0: i32) -> (i32, i32, i32, i32) {
    %c0_i32 = arith.constant 0 : i32
    %c0_i32_0 = arith.constant 0 : i32
    %c0_i32_1 = arith.constant 0 : i32
    %c0_i32_2 = arith.constant 0 : i32
    return %arg0, %c0_i32, %c0_i32_0, %c0_i32_1 : i32, i32, i32, i32
  }
  func.func @transform_1(%arg0: i32) -> (i32, i32, i32) {
    %c0_i32 = arith.constant 0 : i32
    %c0_i32_0 = arith.constant 0 : i32
    %c0_i32_1 = arith.constant 0 : i32
    %c0_i32_2 = arith.constant 0 : i32
    return %c0_i32, %c0_i32_0, %c0_i32_1 : i32, i32, i32
  }
  func.func @transform_2(%arg0: i32) -> (i32, i32, i32, i32) {
    %c0_i32 = arith.constant 0 : i32
    %c0_i32_0 = arith.constant 0 : i32
    %c0_i32_1 = arith.constant 0 : i32
    %c0_i32_2 = arith.constant 0 : i32
    return %arg0, %c0_i32, %c0_i32_0, %c0_i32_1 : i32, i32, i32, i32
  }
}

</mosaic_0001>

<bundles_post_ra>
// kernel: tpu_custom_call.1
= control target key start
LH: loop header
LB: loop body
LE: loop exit
PB: predicated region body
PF: predicated region fallthrough
CT: control target
= control target key end

     0   :  { %s2785_s9 = smov 0   ;;  %s4153_s0 = inlined_call_operand.vmem [shape: bf16[2,16,16,8], index: 0, kind: input, shape index: {}]   ;;  %s4154_s1 = inlined_call_operand.vmem [shape: bf16[3,24,8], index: 1, kind: input, shape index: {}]   ;;  %s4155_s2 = inlined_call_operand.vmem [shape: bf16[2,16,16,8], index: 2, kind: output, shape index: {}]  }
   0x1 LB: > { %s2577_s10 = sadd.s32 4294967295, %s2764_s9   ;;  %p2581_p0 = scmp.ge.s32.totalorder %s2764_s9, 1  ;;  %s2764_s9 = sphi %s2785_s9, %s12_s9  }
   0x2   : > { %p112_p1 = scmp.lt.s32.totalorder %s2764_s9, 3 }
   0x4   : > { %p113_p2 = pnand %p2581_p0, %p112_p1 }
   0x5   : > { %s2767_s11 = smov (!%p113_p2), 16   ;;  %s2768_s12 = smov (!%p113_p2), 8  }
   0x6   : > { %116 = sbr.rel (%p113_p2) target bundleno = 508 (0x1fc), region = 28  ;;  %p134_p3 = scmp.lt.s32.totalorder (!%p113_p2), %s2577_s10, 1 }
   0xb   : > { %v275_v0 = vlaneseq  ;;  %v2766_v1 = vmov 0   ;;  %vm2769_vm0 = vmmov 0   ;;  %s4281_s10 = smov (!%p134_p3, %s2577_s10), 1  ;;  %vm1510_vm2 = vcmask 1045504  }
   0xc   : > { %1189 = vrot.lane.b32.xlu1 %v2766_v1, %s2767_s11  ;;  %1145 = vrot.lane.b32.xlu2 %v2766_v1, %s2768_s12  ;;  %vm847_vm1 = vmpackc.low %vm2769_vm0, %vm2769_vm0  ;;  %v2803_v4 = vunpack.c.l.b16 %v2766_v1  ;;  %v2806_v5 = vunpack.c.h.b16 %v2766_v1  ;;  %s2718_s13 = sshll.u32 %s4281_s10, 7  ;;  %vm966_vm8 = vcmask 1041408  }
   0xd   : > { %v2797_v2 = vshrl.u32 %v275_v0, 7  ;;  %v881_v3 = vsel %vm847_vm1, 65537, %v2766_v1  ;;  %s2822_s16 = scalar_lea.vmem %s4153_s0, %s2718_s13  ;;  %s3981_s3 = scalar_lea.vmem %s4155_s2, %s2718_s13 }
   0xe   : > { %v2825_v18 = vld [vmem:[%s2822_s16 + $0x60] sm:$0xff]  ;;  %v2827_v19 = vunpack.c.l.b16 %v881_v3  ;;  %v2983_v36 = vld [vmem:[%s2822_s16 + $0x8] sm:$0xff] }
   0xf   : > { %v301_v6 = vadd.s32 368, %v2797_v2  ;;  %v303_v7 = vadd.s32 384, %v2797_v2  ;;  %v302_v8 = vadd.s32 376, %v2797_v2  ;;  %v304_v9 = vadd.s32 392, %v2797_v2  ;;  %v2955_v25 = vld [vmem:[%s2822_s16] sm:$0xff] }
  0x10   : > { %v277_v10 = vadd.s32 176, %v2797_v2  ;;  %v279_v11 = vadd.s32 192, %v2797_v2  ;;  %v305_v12 = vadd.s32 400, %v2797_v2  ;;  %v281_v13 = vadd.s32 208, %v2797_v2 }
  0x11   : > { %v485_v14 = vand.u32 15, %v301_v6  ;;  %v499_v15 = vand.u32 15, %v303_v7  ;;  %v492_v16 = vand.u32 15, %v302_v8  ;;  %v506_v17 = vand.u32 15, %v304_v9 }
  0x12   : > { %v317_v20 = vand.u32 15, %v277_v10  ;;  %v331_v21 = vand.u32 15, %v279_v11  ;;  %v513_v22 = vand.u32 15, %v305_v12  ;;  %v345_v29 = vand.u32 15, %v281_v13 }
  0x13   : > { %vm1717_vm3 = vcmp.lt.s32.totalorder %v485_v14, 4  ;;  %vm2829_vm4 = vcmp.lt.s32.totalorder %v499_v15, 4  ;;  %vm2833_vm5 = vcmp.ge.s32.totalorder %v492_v16, 12  ;;  %vm2837_vm6 = vcmp.ge.s32.totalorder %v506_v17, 12  ;;  %v2731_v14 = vld [vmem:[%s2822_s16 + $0x58] sm:$0xff] }
  0x14   : > { %1282 = vrot.lane.b32.xlu2 %v2825_v18, %s2768_s12  ;;  %vm1819_vm7 = vmpackc.low %vm1717_vm3, %vm1717_vm3  ;;  %vm2843_vm9 = vcmp.lt.s32.totalorder %v317_v20, 4  ;;  %vm2847_vm10 = vcmp.lt.s32.totalorder %v331_v21, 4  ;;  %vm2851_vm11 = vcmp.lt.s32.totalorder %v513_v22, 4  ;;  %v280_v31 = vadd.s32 200, %v2797_v2 }
  0x15   : > { %vm1821_vm12 = vmpackc.low %vm2829_vm4, %vm2829_vm4  ;;  %v1853_v30 = vsel %vm1819_vm7, 65537, %v2766_v1  ;;  %v282_v32 = vadd.s32 216, %v2797_v2  ;;  %v2862_v33 = vadd.s32 416, %v2797_v2  ;;  %vm2868_vm14 = vcmp.lt.s32.totalorder %v345_v29, 4 }
  0x16   : > { %v1855_v34 = vsel %vm1821_vm12, 65537, %v2766_v1  ;;  %v1887_v35 = vunpack.c.l.b16 %v1853_v30  ;;  %vm870_vm13 = vmpackc.low %vm2833_vm5, %vm2833_vm5  ;;  %v2873_v37 = vadd.s32 408, %v2797_v2  ;;  %v338_v40 = vand.u32 15, %v280_v31 }
  0x17   : > { %v1889_v38 = vunpack.c.l.b16 %v1855_v34  ;;  %vm872_vm15 = vmpackc.low %vm2837_vm6, %vm2837_vm6  ;;  %v904_v39 = vsel %vm870_vm13, 65537, %v2766_v1  ;;  %v352_v41 = vand.u32 15, %v282_v32  ;;  %v527_v45 = vand.u32 15, %v2862_v33  ;;  %v2977_v32 = vld [vmem:[%s2822_s16 + $0x68] sm:$0xff] }
  0x18   : > { %v2880_v42 = vpack.c.b16 %v2827_v19, %v1887_v35  ;;  %v906_v43 = vsel %vm872_vm15, 65537, %v2766_v1  ;;  %v938_v44 = vunpack.c.l.b16 %v904_v39  ;;  %vm1795_vm0 = vmpackc.low %vm2843_vm9, %vm2843_vm9  ;;  %vm2892_vm3 = vcmp.ge.s32.totalorder %v338_v40, 12 }
  0x19   : > { %v1910_v46 = vpack.c.b16 %v2827_v19, %v1889_v38  ;;  %v940_v47 = vunpack.c.l.b16 %v906_v43  ;;  %vm1797_vm1 = vmpackc.low %vm2847_vm10, %vm2847_vm10  ;;  %v1829_v48 = vsel %vm1795_vm0, 65537, %v2766_v1  ;;  %vm2933_vm7 = vcmp.ge.s32.totalorder %v352_v41, 12 }
  0x1a   : > { %v1937_v50 = vrot.slane %v2880_v42, 2  ;;  %v2898_v51 = vpack.c.b16 %v938_v44, %v2827_v19  ;;  %v1831_v52 = vsel %vm1797_vm1, 65537, %v2766_v1  ;;  %v1863_v53 = vunpack.c.l.b16 %v1829_v48  ;;  %vm1823_vm4 = vmpackc.low %vm2851_vm11, %vm2851_vm11 }
  0x1b   : > { %v1939_v54 = vrot.slane %v1910_v46, 2  ;;  %v2905_v55 = vpack.c.b16 %v940_v47, %v2827_v19  ;;  %v1865_v56 = vunpack.c.l.b16 %v1831_v52  ;;  %v1857_v57 = vsel %vm1823_vm4, 65537, %v2766_v1  ;;  %vm1799_vm5 = vmpackc.low %vm2868_vm14, %vm2868_vm14 }
  0x1c   : > { %v988_v58 = vrot.slane %v2898_v51, 6  ;;  %v1897_v59 = vpack.c.b16 %v2827_v19, %v1863_v53  ;;  %v1891_v60 = vunpack.c.l.b16 %v1857_v57  ;;  %v1833_v61 = vsel %vm1799_vm5, 65537, %v2766_v1  ;;  %vm848_vm6 = vmpackc.low %vm2892_vm3, %vm2892_vm3 }
  0x1d   : > { %v1940_v62 = vsel %vm1510_vm2, %v1937_v50, %v1939_v54  ;;  %v990_v63 = vrot.slane %v2905_v55, 6  ;;  %v1898_v0 = vpack.c.b16 %v2827_v19, %v1865_v56  ;;  %v1867_v3 = vunpack.c.l.b16 %v1833_v61  ;;  %vm850_vm11 = vmpackc.low %vm2933_vm7, %vm2933_vm7 }
  0x1e   : > { %v2031_v6 = vunpack.c.l.b16 %v1940_v62  ;;  %v2032_v7 = vunpack.c.h.b16 %v1940_v62  ;;  %v1914_v8 = vrot.slane %v1897_v59, 2  ;;  %v2920_v9 = vpack.c.b16 %v2827_v19, %v1891_v60 }
  0x1f   : > { %v991_v10 = vsel %vm966_vm8, %v988_v58, %v990_v63  ;;  %v1915_v11 = vrot.slane %v1898_v0, 2  ;;  %v2931_v12 = vpack.c.b16 %v2827_v19, %v1867_v3  ;;  %v882_v22 = vsel %vm848_vm6, 65537, %v2766_v1 }
  0x20   : > { %vm2035_vm9 = vcmp.ne.s32.totalorder %v2031_v6, %v2803_v4  ;;  %vm2036_vm10 = vcmp.ne.s32.totalorder %v2032_v7, %v2806_v5  ;;  %v1077_v15 = vunpack.c.l.b16 %v991_v10  ;;  %v1078_v16 = vunpack.c.h.b16 %v991_v10 }
  0x21   : > { %vm2037_vm12 = vmpackc.low %vm2036_vm10, %vm2035_vm9  ;;  %v1916_v17 = vsel %vm1510_vm2, %v1914_v8, %v1915_v11  ;;  %v1941_v20 = vrot.slane %v2920_v9, 2  ;;  %v1917_v21 = vrot.slane %v2931_v12, 2  ;;  %v884_v29 = vsel %vm850_vm11, 65537, %v2766_v1 }
  0x22   : > { %v2948_v23 = vsel %vm2037_vm12, %v2825_v18, 0  ;;  %vm1081_vm13 = vcmp.ne.s32.totalorder %v1077_v15, %v2803_v4  ;;  %vm1082_vm14 = vcmp.ne.s32.totalorder %v1078_v16, %v2806_v5  ;;  %v1947_v24 = vunpack.c.l.b16 %v1916_v17 }
  0x23   : > { %2123 = vrot.lane.b32.xlu1 %v2948_v23, %s2767_s11  ;;  %vm1083_vm15 = vmpackc.low %vm1082_vm14, %vm1081_vm13  ;;  %v1948_v26 = vunpack.c.h.b16 %v1916_v17  ;;  %v1942_v27 = vsel %vm1510_vm2, %v1939_v54, %v1941_v20  ;;  %v1918_v28 = vsel %vm1510_vm2, %v1915_v11, %v1917_v21  ;;  %v916_v40 = vunpack.c.l.b16 %v882_v22 }
  0x24   : > { %v2969_v30 = vsel %vm1083_vm15, %v2731_v14, 0  ;;  %vm2972_vm0 = vcmp.ne.s32.totalorder %v1947_v24, %v2803_v4  ;;  %v2038_v34 = vunpack.c.l.b16 %v1942_v27  ;;  %v2039_v35 = vunpack.c.h.b16 %v1942_v27 }
  0x25   : > { %1179 = vrot.lane.b32.xlu2 %v2969_v30, %s2767_s11  ;;  %vm1952_vm1 = vcmp.ne.s32.totalorder %v1948_v26, %v2806_v5  ;;  %v1954_v38 = vunpack.c.l.b16 %v1918_v28  ;;  %v1955_v39 = vunpack.c.h.b16 %v1918_v28  ;;  %v918_v41 = vunpack.c.l.b16 %v884_v29 }
  0x26   : > { %vm1953_vm3 = vmpackc.low %vm1952_vm1, %vm2972_vm0  ;;  %vm2042_vm4 = vcmp.ne.s32.totalorder %v2038_v34, %v2803_v4  ;;  %vm2043_vm5 = vcmp.ne.s32.totalorder %v2039_v35, %v2806_v5  ;;  %vm2991_vm6 = vcmp.lt.s32.totalorder %v527_v45, 4  ;;  %v949_v46 = vpack.c.b16 %v916_v40, %v2827_v19 }
  0x27   : > { %v2996_v44 = vsel %vm1953_vm3, %v2955_v25, 0  ;;  %vm2044_vm7 = vmpackc.low %vm2043_vm5, %vm2042_vm4  ;;  %vm1958_vm9 = vcmp.ne.s32.totalorder %v1954_v38, %v2803_v4  ;;  %vm1959_vm10 = vcmp.ne.s32.totalorder %v1955_v39, %v2806_v5  ;;  %v3007_v33 = vpack.c.b16 %v918_v41, %v2827_v19 }
  0x28   : > { %2091 = vrot.lane.b32.xlu0 %v2996_v44, %s2768_s12  ;;  %v3004_v47 = vsel %vm2044_vm7, %v2977_v32, 0  ;;  %vm1960_vm11 = vmpackc.low %vm1959_vm10, %vm1958_vm9  ;;  %v520_v45 = vand.u32 15, %v2873_v37  ;;  %v309_v48 = vadd.s32 432, %v2797_v2  ;;  %v967_v52 = vrot.slane %v949_v46, 6  ;;  %v3069_v46 = vld [vmem:[%s2822_s16 + $0x70] sm:$0xff] }
  0x29   : > { %v3012_v49 = vsel %vm1960_vm11, %v2983_v36, 0  ;;  %vm1825_vm12 = vmpackc.low %vm2991_vm6, %vm2991_vm6  ;;  %v308_v53 = vadd.s32 424, %v2797_v2  ;;  %v283_v54 = vadd.s32 224, %v2797_v2  ;;  %v968_v56 = vrot.slane %v3007_v33, 6 }
  0x2a   : > { %v1859_v57 = vsel %vm1825_vm12, 65537, %v2766_v1  ;;  %vm772_vm13 = vcmp.ge.s32.totalorder %v520_v45, 12  ;;  %v541_v37 = vand.u32 15, %v309_v48  ;;  %v310_v62 = vadd.s32 440, %v2797_v2 }
  0x2b   : > { %2125 = vrot.lane.b32.xlu1 %v3004_v47, %s2767_s11  ;;  %v1893_v59 = vunpack.c.l.b16 %v1859_v57  ;;  %vm874_vm14 = vmpackc.low %vm772_vm13, %vm772_vm13  ;;  %v534_v60 = vand.u32 15, %v308_v53  ;;  %v359_v61 = vand.u32 15, %v283_v54  ;;  %v969_v0 = vsel %vm966_vm8, %v967_v52, %v968_v56 }
  0x2c   : > { %v908_v3 = vsel %vm874_vm14, 65537, %v2766_v1  ;;  %vm1725_vm15 = vcmp.lt.s32.totalorder %v541_v37, 4  ;;  %v285_v6 = vadd.s32 240, %v2797_v2  ;;  %v1000_v7 = vunpack.c.l.b16 %v969_v0 }
  0x2d   : > { %1290 = vrot.lane.b32.xlu2 %v2825_v18, %s2767_s11  ;;  %v1001_v8 = vunpack.c.h.b16 %v969_v0  ;;  %v1912_v10 = vpack.c.b16 %v2827_v19, %v1893_v59  ;;  %v942_v11 = vunpack.c.l.b16 %v908_v3  ;;  %vm1827_vm0 = vmpackc.low %vm1725_vm15, %vm1725_vm15  ;;  %vm774_vm1 = vcmp.ge.s32.totalorder %v534_v60, 12 }
  0x2e   : > { %v1861_v13 = vsel %vm1827_vm0, 65537, %v2766_v1  ;;  %vm3033_vm3 = vcmp.lt.s32.totalorder %v359_v61, 4  ;;  %v548_v15 = vand.u32 15, %v310_v62  ;;  %vm1004_vm4 = vcmp.ne.s32.totalorder %v1000_v7, %v2803_v4  ;;  %vm876_vm6 = vmpackc.low %vm774_vm1, %vm774_vm1 }
  0x2f   : > { %vm1005_vm5 = vcmp.ne.s32.totalorder %v1001_v8, %v2806_v5  ;;  %v1943_v16 = vrot.slane %v1912_v10, 2  ;;  %v962_v17 = vpack.c.b16 %v942_v11, %v2827_v19  ;;  %v1895_v22 = vunpack.c.l.b16 %v1861_v13  ;;  %vm1801_vm10 = vmpackc.low %vm3033_vm3, %vm3033_vm3  ;;  %v3120_v11 = vld [vmem:[%s2822_s16 + $0x78] sm:$0xff] }
  0x30   : > { %2093 = vrot.lane.b32.xlu0 %v3012_v49, %s2768_s12  ;;  %vm1006_vm7 = vmpackc.low %vm1005_vm5, %vm1004_vm4  ;;  %v910_v24 = vsel %vm876_vm6, 65537, %v2766_v1  ;;  %vm3043_vm9 = vcmp.ge.s32.totalorder %v548_v15, 12  ;;  %v373_v27 = vand.u32 15, %v285_v6  ;;  %v1835_v40 = vsel %vm1801_vm10, 65537, %v2766_v1 }
  0x31   : > { %v3048_v28 = vsel %vm1006_vm7, %v2955_v25, 0  ;;  %v1944_v29 = vsel %vm1510_vm2, %v1941_v20, %v1943_v16  ;;  %v992_v31 = vrot.slane %v962_v17, 6  ;;  %v944_v34 = vunpack.c.l.b16 %v910_v24  ;;  %vm878_vm11 = vmpackc.low %vm3043_vm9, %vm3043_vm9  ;;  %v3296_v17 = vld [vmem:[%s2822_s16 + $0x20] sm:$0xff] }
  0x32   : > { %v2045_v35 = vunpack.c.l.b16 %v1944_v29  ;;  %v2046_v38 = vunpack.c.h.b16 %v1944_v29  ;;  %v1913_v39 = vpack.c.b16 %v2827_v19, %v1895_v22  ;;  %v1869_v41 = vunpack.c.l.b16 %v1835_v40 }
  0x33   : > { %1258 = vrot.lane.b32.xlu1 %v2955_v25, %s2768_s12  ;;  %v993_v9 = vsel %vm966_vm8, %v990_v63, %v992_v31  ;;  %v963_v20 = vpack.c.b16 %v944_v34, %v2827_v19  ;;  %v912_v43 = vsel %vm878_vm11, 65537, %v2766_v1  ;;  %vm3098_vm1 = vcmp.lt.s32.totalorder %v373_v27, 4  ;;  %v3169_v34 = vld [vmem:[%s2822_s16 + $0x10] sm:$0xff] }
  0x34   : > { %vm3072_vm12 = vcmp.ne.s32.totalorder %v2045_v35, %v2803_v4  ;;  %vm3077_vm13 = vcmp.ne.s32.totalorder %v2046_v38, %v2806_v5  ;;  %v1084_v55 = vunpack.c.l.b16 %v993_v9  ;;  %v1085_v52 = vunpack.c.h.b16 %v993_v9  ;;  %vm1803_vm3 = vmpackc.low %vm3098_vm1, %vm3098_vm1 }
  0x35   : > { %1284 = vrot.lane.b32.xlu2 %v2977_v32, %s2768_s12  ;;  %vm2051_vm14 = vmpackc.low %vm3077_vm13, %vm3072_vm12  ;;  %v1945_v63 = vrot.slane %v1913_v39, 2  ;;  %v994_v53 = vrot.slane %v963_v20, 6  ;;  %v1900_v54 = vpack.c.b16 %v2827_v19, %v1869_v41  ;;  %v946_v57 = vunpack.c.l.b16 %v912_v43 }
  0x36   : > { %vm3089_vm15 = vcmp.ne.s32.totalorder %v1084_v55, %v2803_v4  ;;  %vm3094_vm0 = vcmp.ne.s32.totalorder %v1085_v52, %v2806_v5  ;;  %v3110_v6 = vsel %vm2051_vm14, %v3069_v46, 0  ;;  %v284_v9 = vadd.s32 232, %v2797_v2 }
  0x37   : > { %v1946_v61 = vsel %vm1510_vm2, %v1943_v16, %v1945_v63  ;;  %v995_v62 = vsel %vm966_vm8, %v992_v31, %v994_v53  ;;  %v1919_v0 = vrot.slane %v1900_v54, 2  ;;  %v3105_v3 = vpack.c.b16 %v946_v57, %v2827_v19  ;;  %vm1090_vm4 = vmpackc.low %vm3094_vm0, %vm3089_vm15 }
  0x38   : > { %1147 = vrot.lane.b32.xlu0 %v3048_v28, %s2768_s12  ;;  %v2052_v7 = vunpack.c.l.b16 %v1946_v61  ;;  %v2053_v8 = vunpack.c.h.b16 %v1946_v61  ;;  %v1091_v10 = vunpack.c.l.b16 %v995_v62  ;;  %v1092_v13 = vunpack.c.h.b16 %v995_v62 }
  0x39   : > { %v1920_v14 = vsel %vm1510_vm2, %v1917_v21, %v1919_v0  ;;  %v996_v15 = vrot.slane %v3105_v3, 6  ;;  %v1837_v16 = vsel %vm1803_vm3, 65537, %v2766_v1  ;;  %v3162_v31 = vsel %vm1090_vm4, %v2825_v18, 0 }
  0x3a   : > { %vm3128_vm5 = vcmp.ne.s32.totalorder %v2052_v7, %v2803_v4  ;;  %vm3133_vm6 = vcmp.ne.s32.totalorder %v2053_v8, %v2806_v5  ;;  %vm3138_vm7 = vcmp.ne.s32.totalorder %v1091_v10, %v2803_v4  ;;  %v1961_v21 = vunpack.c.l.b16 %v1920_v14  ;;  %v3224_v10 = vld [vmem:[%s2822_s16 + $0x18] sm:$0xff] }
  0x3b   : > { %2127 = vrot.lane.b32.xlu1 %v3110_v6, %s2767_s11  ;;  %vm2058_vm9 = vmpackc.low %vm3133_vm6, %vm3128_vm5  ;;  %vm3149_vm10 = vcmp.ne.s32.totalorder %v1092_v13, %v2806_v5  ;;  %v1962_v26 = vunpack.c.h.b16 %v1920_v14  ;;  %v997_v27 = vsel %vm966_vm8, %v994_v53, %v996_v15  ;;  %v1871_v29 = vunpack.c.l.b16 %v1837_v16 }
  0x3c   : > { %vm1097_vm11 = vmpackc.low %vm3149_vm10, %vm3138_vm7  ;;  %vm3172_vm12 = vcmp.ne.s32.totalorder %v1961_v21, %v2803_v4  ;;  %v1098_v38 = vunpack.c.l.b16 %v997_v27  ;;  %v1099_v39 = vunpack.c.h.b16 %v997_v27  ;;  %v3179_v18 = vsel %vm2058_vm9, %v3120_v11, 0 }
  0x3d   : > { %1260 = vrot.lane.b32.xlu2 %v2983_v36, %s2768_s12  ;;  %vm1966_vm13 = vcmp.ne.s32.totalorder %v1962_v26, %v2806_v5  ;;  %v3183_v40 = vpack.c.b16 %v2827_v19, %v1871_v29  ;;  %v287_v43 = vadd.s32 256, %v2797_v2  ;;  %v286_v45 = vadd.s32 248, %v2797_v2 }
  0x3e   : > { %vm1967_vm14 = vmpackc.low %vm1966_vm13, %vm3172_vm12  ;;  %vm3189_vm15 = vcmp.ne.s32.totalorder %v1098_v38, %v2803_v4  ;;  %vm3194_vm0 = vcmp.ne.s32.totalorder %v1099_v39, %v2806_v5  ;;  %v3201_v48 = vsel %vm1097_vm11, %v2977_v32, 0  ;;  %v366_v52 = vand.u32 15, %v284_v9 }
  0x3f   : > { %v1921_v55 = vrot.slane %v3183_v40, 2  ;;  %v312_v63 = vadd.s32 456, %v2797_v2  ;;  %v3208_v53 = vsel %vm1967_vm14, %v3169_v34, 0  ;;  %v387_v54 = vand.u32 15, %v287_v43  ;;  %vm1104_vm1 = vmpackc.low %vm3194_vm0, %vm3189_vm15 }
  0x40   : > { %1181 = vrot.lane.b32.xlu0 %v3162_v31, %s2767_s11  ;;  %v380_v57 = vand.u32 15, %v286_v45  ;;  %v288_v37 = vadd.s32 264, %v2797_v2  ;;  %vm750_vm3 = vcmp.ge.s32.totalorder %v366_v52, 12  ;;  %v290_v61 = vadd.s32 280, %v2797_v2 }
  0x41   : > { %v1922_v59 = vsel %vm1510_vm2, %v1919_v0, %v1921_v55  ;;  %v562_v60 = vand.u32 15, %v312_v63  ;;  %vm852_vm4 = vmpackc.low %vm750_vm3, %vm750_vm3  ;;  %vm1703_vm5 = vcmp.lt.s32.totalorder %v387_v54, 4  ;;  %v3260_v35 = vsel %vm1104_vm1, %v3069_v46, 0 }
  0x42   : > { %v1968_v62 = vunpack.c.l.b16 %v1922_v59  ;;  %v1969_v7 = vunpack.c.h.b16 %v1922_v59  ;;  %vm3217_vm6 = vcmp.ge.s32.totalorder %v380_v57, 12  ;;  %v886_v13 = vsel %vm852_vm4, 65537, %v2766_v1  ;;  %vm1805_vm7 = vmpackc.low %vm1703_vm5, %vm1703_vm5 }
  0x43   : > { %1183 = vrot.lane.b32.xlu1 %v3201_v48, %s2767_s11  ;;  %vm3227_vm9 = vcmp.ge.s32.totalorder %v562_v60, 12  ;;  %v394_v14 = vand.u32 15, %v288_v37  ;;  %v408_v16 = vand.u32 15, %v290_v61  ;;  %v920_v22 = vunpack.c.l.b16 %v886_v13  ;;  %vm854_vm12 = vmpackc.low %vm3217_vm6, %vm3217_vm6 }
  0x44   : > { %vm3232_vm10 = vcmp.ne.s32.totalorder %v1968_v62, %v2803_v4  ;;  %vm1973_vm11 = vcmp.ne.s32.totalorder %v1969_v7, %v2806_v5  ;;  %v1839_v12 = vsel %vm1805_vm7, 65537, %v2766_v1  ;;  %v888_v24 = vsel %vm854_vm12, 65537, %v2766_v1  ;;  %vm880_vm4 = vmpackc.low %vm3227_vm9, %vm3227_vm9 }
  0x45   : > { %2129 = vrot.lane.b32.xlu2 %v3179_v18, %s2767_s11  ;;  %vm1974_vm13 = vmpackc.low %vm1973_vm11, %vm3232_vm10  ;;  %v1873_v21 = vunpack.c.l.b16 %v1839_v12  ;;  %vm754_vm14 = vcmp.ge.s32.totalorder %v394_v14, 12  ;;  %vm3246_vm3 = vcmp.ge.s32.totalorder %v408_v16, 12  ;;  %v951_v27 = vpack.c.b16 %v920_v22, %v2827_v19 }
  0x46   : > { %v922_v29 = vunpack.c.l.b16 %v888_v24  ;;  %v3263_v38 = vsel %vm1974_vm13, %v3224_v10, 0  ;;  %v914_v40 = vsel %vm880_vm4, 65537, %v2766_v1  ;;  %vm856_vm5 = vmpackc.low %vm754_vm14, %vm754_vm14  ;;  %v289_v63 = vadd.s32 272, %v2797_v2 }
  0x47   : > { %v3266_v39 = vpack.c.b16 %v2827_v19, %v1873_v21  ;;  %v970_v9 = vrot.slane %v951_v27, 6  ;;  %v948_v43 = vunpack.c.l.b16 %v914_v40  ;;  %v890_v20 = vsel %vm856_vm5, 65537, %v2766_v1  ;;  %vm858_vm15 = vmpackc.low %vm3246_vm3, %vm3246_vm3 }
  0x48   : > { %2095 = vrot.lane.b32.xlu0 %v3208_v53, %s2768_s12  ;;  %v952_v41 = vpack.c.b16 %v922_v29, %v2827_v19  ;;  %v924_v52 = vunpack.c.l.b16 %v890_v20  ;;  %v291_v54 = vadd.s32 288, %v2797_v2  ;;  %v892_v60 = vsel %vm858_vm15, 65537, %v2766_v1 }
  0x49   : > { %v1923_v45 = vrot.slane %v3266_v39, 2  ;;  %v971_v57 = vsel %vm966_vm8, %v968_v56, %v970_v9  ;;  %v965_v59 = vpack.c.b16 %v948_v43, %v2827_v19  ;;  %v401_v12 = vand.u32 15, %v289_v63 }
  0x4a   : > { %v972_v37 = vrot.slane %v952_v41, 6  ;;  %v1007_v61 = vunpack.c.l.b16 %v971_v57  ;;  %v1008_v62 = vunpack.c.h.b16 %v971_v57  ;;  %v953_v8 = vpack.c.b16 %v924_v52, %v2827_v19 }
  0x4b   : > { %2097 = vrot.lane.b32.xlu1 %v3263_v38, %s2768_s12  ;;  %v1924_v7 = vsel %vm1510_vm2, %v1921_v55, %v1923_v45  ;;  %v998_v0 = vrot.slane %v965_v59, 6  ;;  %v926_v27 = vunpack.c.l.b16 %v892_v60  ;;  %v415_v40 = vand.u32 15, %v291_v54  ;;  %v2652_v60 = vld [vmem:[%s4154_s1 + $0x14] sm:$0xf] }
  0x4c   : > { %v1975_v33 = vunpack.c.l.b16 %v1924_v7  ;;  %v1976_v13 = vunpack.c.h.b16 %v1924_v7  ;;  %v973_v56 = vsel %vm966_vm8, %v970_v9, %v972_v37  ;;  %vm1011_vm0 = vcmp.ne.s32.totalorder %v1007_v61, %v2803_v4 }
  0x4d   : > { %1185 = vrot.lane.b32.xlu2 %v3260_v35, %s2767_s11  ;;  %vm1012_vm1 = vcmp.ne.s32.totalorder %v1008_v62, %v2806_v5  ;;  %v1014_v14 = vunpack.c.l.b16 %v973_v56  ;;  %v1015_v16 = vunpack.c.h.b16 %v973_v56  ;;  %v999_v22 = vsel %vm966_vm8, %v996_v15, %v998_v0 }
  0x4e   : > { %vm1013_vm6 = vmpackc.low %vm1012_vm1, %vm1011_vm0  ;;  %vm3299_vm7 = vcmp.ne.s32.totalorder %v1975_v33, %v2803_v4  ;;  %vm1980_vm9 = vcmp.ne.s32.totalorder %v1976_v13, %v2806_v5  ;;  %v974_v24 = vrot.slane %v953_v8, 6  ;;  %v1105_v26 = vunpack.c.l.b16 %v999_v22 }
  0x4f   : > { %v3308_v21 = vsel %vm1013_vm6, %v2983_v36, 0  ;;  %vm1981_vm10 = vmpackc.low %vm1980_vm9, %vm3299_vm7  ;;  %vm1018_vm11 = vcmp.ne.s32.totalorder %v1014_v14, %v2803_v4  ;;  %vm1019_vm12 = vcmp.ne.s32.totalorder %v1015_v16, %v2806_v5  ;;  %v1106_v3 = vunpack.c.h.b16 %v999_v22 }
  0x50   : > { %1149 = vrot.lane.b32.xlu0 %v3308_v21, %s2768_s12  ;;  %vm1020_vm13 = vmpackc.low %vm1019_vm12, %vm1018_vm11  ;;  %v3320_v29 = vsel %vm1981_vm10, %v3296_v17, 0  ;;  %v975_v9 = vsel %vm966_vm8, %v972_v37, %v974_v24  ;;  %vm1705_vm14 = vcmp.lt.s32.totalorder %v401_v12, 4  ;;  %vm3326_vm3 = vcmp.ne.s32.totalorder %v1105_v26, %v2803_v4 }
  0x51   : > { %v3317_v15 = vsel %vm1020_vm13, %v3169_v34, 0  ;;  %vm3331_vm4 = vcmp.ne.s32.totalorder %v1106_v3, %v2806_v5  ;;  %v3336_v20 = vpack.c.b16 %v926_v27, %v2827_v19  ;;  %vm1707_vm5 = vcmp.lt.s32.totalorder %v415_v40, 4  ;;  %vm1807_vm15 = vmpackc.low %vm1705_vm14, %vm1705_vm14 }
  0x52   : > { %v1021_v52 = vunpack.c.l.b16 %v975_v9  ;;  %v1022_v63 = vunpack.c.h.b16 %v975_v9  ;;  %vm1809_vm0 = vmpackc.low %vm1707_vm5, %vm1707_vm5  ;;  %v1841_v54 = vsel %vm1807_vm15, 65537, %v2766_v1  ;;  %v1363_v62 = vunpack.c.l.b16 %v2652_v60  ;;  %v2737_v9 = vld [vmem:[%s4154_s1 + $0xc] sm:$0xff] }
  0x53   : > { %1151 = vrot.lane.b32.xlu1 %v3317_v15, %s2768_s12  ;;  %vm1111_vm1 = vmpackc.low %vm3331_vm4, %vm3326_vm3  ;;  %v1843_v57 = vsel %vm1809_vm0, 65537, %v2766_v1  ;;  %v1875_v37 = vunpack.c.l.b16 %v1841_v54  ;;  %v976_v59 = vrot.slane %v3336_v20, 6  ;;  %vm1400_vm9 = vcmask 1043456  }
  0x54   : > { %v1877_v61 = vunpack.c.l.b16 %v1843_v57  ;;  %v3353_v7 = vsel %vm1111_vm1, %v3120_v11, 0  ;;  %vm3356_vm6 = vcmp.ne.s32.totalorder %v1021_v52, %v2803_v4  ;;  %vm3361_vm7 = vcmp.ne.s32.totalorder %v1022_v63, %v2806_v5 }
  0x55   : > { %2099 = vrot.lane.b32.xlu2 %v3320_v29, %s2768_s12  ;;  %v1365_v13 = vpack.c.b16 %v1363_v62, %v1363_v62  ;;  %v977_v56 = vsel %vm966_vm8, %v974_v24, %v976_v59  ;;  %vm1027_vm10 = vmpackc.low %vm3361_vm7, %vm3356_vm6  ;;  %v294_v16 = vadd.s32 312, %v2797_v2  ;;  %v296_v55 = vadd.s32 328, %v2797_v2 }
  0x56   : > { %v3378_v0 = vpack.c.b16 %v2827_v19, %v1877_v61  ;;  %v292_v22 = vadd.s32 296, %v2797_v2  ;;  %v1028_v12 = vunpack.c.l.b16 %v977_v56  ;;  %v1029_v24 = vunpack.c.h.b16 %v977_v56 }
  0x57   : > { %v1402_v14 = vsel %vm1400_vm9, %v1365_v13, 0  ;;  %v3387_v3 = vsel %vm1027_vm10, %v3224_v10, 0  ;;  %v436_v27 = vand.u32 15, %v294_v16  ;;  %v450_v41 = vand.u32 15, %v296_v55 }
  0x58   : > { %1292 = vrot.lane.b32.xlu0 %v2977_v32, %s2767_s11  ;;  %v1903_v32 = vpack.c.b16 %v2827_v19, %v1875_v37  ;;  %2739 = vmatpush.bf16.msra.mxu3 %v1402_v14  ;;  %v1927_v40 = vrot.slane %v3378_v0, 2  ;;  %v422_v43 = vand.u32 15, %v292_v22  ;;  %vm3396_vm11 = vcmp.ne.s32.totalorder %v1028_v12, %v2803_v4  ;;  %v3726_v0 = vld [vmem:[%s2822_s16 + $0x48] sm:$0xff] }
  0x59   : > { %1410 = vmatpush.bf16.msra.mxu0 %v1402_v14  ;;  %vm3401_vm12 = vcmp.ne.s32.totalorder %v1029_v24, %v2806_v5  ;;  %vm3408_vm13 = vcmp.ge.s32.totalorder %v436_v27, 12  ;;  %vm1191_vm14 = vcmask 64512   ;;  %vm3417_vm3 = vcmp.ge.s32.totalorder %v450_v41, 12  ;;  %v3488_v41 = vld [vmem:[%s2822_s16 + $0x30] sm:$0xff] }
  0x5a   : > { %v1925_v26 = vrot.slane %v1903_v32, 2  ;;  %v293_v39 = vadd.s32 304, %v2797_v2  ;;  %vm1034_vm4 = vmpackc.low %vm3401_vm12, %vm3396_vm11  ;;  %vm3428_vm5 = vcmp.ge.s32.totalorder %v422_v43, 12  ;;  %v295_v62 = vadd.s32 320, %v2797_v2 }
  0x5b   : > { %1294 = vrot.lane.b32.xlu1 %v3069_v46, %s2767_s11  ;;  %vm862_vm15 = vmpackc.low %vm3408_vm13, %vm3408_vm13  ;;  %v1116_v13 = vsel %vm1034_vm4, %v3296_v17, 0  ;;  %v298_v56 = vadd.s32 344, %v2797_v2 }
  0x5c   : > { %v1926_v63 = vsel %vm1510_vm2, %v1923_v45, %v1925_v26  ;;  %2740 = vmatpush.bf16.msra.mxu3 %v2737_v9  ;;  %v1928_v57 = vsel %vm1510_vm2, %v1925_v26, %v1927_v40  ;;  %vm864_vm0 = vmpackc.low %vm3417_vm3, %vm3417_vm3  ;;  %v443_v16 = vand.u32 15, %v295_v62  ;;  %v896_v55 = vsel %vm862_vm15, 65537, %v2766_v1  ;;  %v3475_v26 = vld [vmem:[%s2822_s16 + $0x28] sm:$0xff] }
  0x5d   : > { %1187 = vrot.lane.b32.xlu2 %v3353_v7, %s2767_s11  ;;  %1411 = vmatpush.bf16.msra.mxu0 %v2737_v9  ;;  %v1982_v60 = vunpack.c.l.b16 %v1926_v63  ;;  %v1989_v33 = vunpack.c.l.b16 %v1928_v57  ;;  %v1990_v32 = vunpack.c.h.b16 %v1928_v57  ;;  %vm860_vm1 = vmpackc.low %vm3428_vm5, %vm3428_vm5  ;;  %v898_v22 = vsel %vm864_vm0, 65537, %v2766_v1 }
  0x5e   : > { %v894_v27 = vsel %vm860_vm1, 65537, %v2766_v1  ;;  %v930_v43 = vunpack.c.l.b16 %v896_v55  ;;  %v932_v52 = vunpack.c.l.b16 %v898_v22  ;;  %vm3490_vm3 = vcmp.lt.s32.totalorder %v443_v16, 4 }
  0x5f   : > { %vm3451_vm6 = vcmp.ne.s32.totalorder %v1982_v60, %v2803_v4  ;;  %vm3465_vm10 = vcmp.ne.s32.totalorder %v1989_v33, %v2803_v4  ;;  %vm3470_vm11 = vcmp.ne.s32.totalorder %v1990_v32, %v2806_v5  ;;  %vm1813_vm15 = vmpackc.low %vm3490_vm3, %vm3490_vm3  ;;  %v297_v57 = vadd.s32 336, %v2797_v2 }
  0x60   : > { %1286 = vrot.lane.b32.xlu0 %v3069_v46, %s2768_s12  ;;  %vm1995_vm4 = vmpackc.low %vm3470_vm11, %vm3465_vm10  ;;  %v3511_v60 = vpack.c.b16 %v932_v52, %v2827_v19  ;;  %v1847_v62 = vsel %vm1813_vm15, 65537, %v2766_v1  ;;  %v300_v22 = vadd.s32 360, %v2797_v2  ;;  %v464_v24 = vand.u32 15, %v298_v56  ;;  %v2695_v52 = vld [vmem:[%s4154_s1 + $0x20] sm:$0xf] }
  0x61   : > { %v2065_v37 = vsel %vm1995_vm4, %v3488_v41, 0  ;;  %v1881_v55 = vunpack.c.l.b16 %v1847_v62 }
  0x62   : > { %vm3553_vm10 = vcmp.ge.s32.totalorder %v464_v24, 12 }
  0x63   : > { %1153 = vrot.lane.b32.xlu1 %v3387_v3, %s2768_s12 }
  0x65   : > { %1169 = vrot.lane.b32.xlu2 %v2969_v30, %s2768_s12  ;;  %v1983_v30 = vunpack.c.h.b16 %v1926_v63  ;;  %v928_v63 = vunpack.c.l.b16 %v894_v27 }
  0x66   : > { %v3426_v45 = vpop.permute.xlu2 %1145 }
  0x67   : > { %v3436_v8 = vsel %vm1191_vm14, %v3320_v29, %v3426_v45  ;;  %v429_v29 = vand.u32 15, %v293_v39  ;;  %vm3456_vm7 = vcmp.ne.s32.totalorder %v1983_v30, %v2806_v5  ;;  %v956_v39 = vpack.c.b16 %v930_v43, %v2827_v19 }
  0x68   : > { %1262 = vrot.lane.b32.xlu0 %v3169_v34, %s2768_s12  ;;  %vm1988_vm12 = vmpackc.low %vm3456_vm7, %vm3451_vm6  ;;  %v457_v30 = vand.u32 15, %v297_v57  ;;  %vm1231_vm6 = vcmask 130048   ;;  %v3538_v43 = vpack.c.b16 %v2827_v19, %v1881_v55  ;;  %v478_v57 = vand.u32 15, %v300_v22 }
  0x69   : > { %vm3483_vm13 = vcmp.lt.s32.totalorder %v429_v29, 4  ;;  %v2064_v54 = vsel %vm1988_vm12, %v3475_v26, 0  ;;  %v980_v32 = vrot.slane %v956_v39, 6  ;;  %v982_v29 = vrot.slane %v3511_v60, 6  ;;  %vm866_vm12 = vmpackc.low %vm3553_vm10, %vm3553_vm10 }
  0x6a   : > { %vm1811_vm5 = vmpackc.low %vm3483_vm13, %vm3483_vm13  ;;  %vm3519_vm0 = vcmp.lt.s32.totalorder %v457_v30, 4  ;;  %vm1367_vm7 = vcmask 195584   ;;  %vm3568_vm11 = vcmp.ge.s32.totalorder %v478_v57, 12 }
  0x6b   : > { %1296 = vrot.lane.b32.xlu1 %v3120_v11, %s2767_s11  ;;  %v1845_v61 = vsel %vm1811_vm5, 65537, %v2766_v1  ;;  %vm1815_vm1 = vmpackc.low %vm3519_vm0, %vm3519_vm0  ;;  %v983_v12 = vsel %vm966_vm8, %v980_v32, %v982_v29 }
  0x6c   : > { %v1879_v16 = vunpack.c.l.b16 %v1845_v61  ;;  %vm868_vm15 = vmpackc.low %vm3568_vm11, %vm3568_vm11 }
  0x6d   : > { %1155 = vrot.lane.b32.xlu2 %v1116_v13, %s2768_s12  ;;  %v1931_v13 = vrot.slane %v3538_v43, 2  ;;  %v900_v43 = vsel %vm866_vm12, 65537, %v2766_v1  ;;  %v902_v57 = vsel %vm868_vm15, 65537, %v2766_v1 }
  0x6e   : > { %v1283_v33 = vpop.permute.xlu2 %1282  ;;  %v1905_v9 = vpack.c.b16 %v2827_v19, %v1879_v16  ;;  %v2728_v16 = vld [vmem:[%s2822_s16 + $0x40] sm:$0xff] }
  0x6f   : > { %v1324_v46 = vsel %vm1191_vm14, %v2955_v25, %v1283_v33 }
  0x70   : > { %1288 = vrot.lane.b32.xlu0 %v3120_v11, %s2768_s12  ;;  %v955_v11 = vpack.c.b16 %v928_v63, %v2827_v19  ;;  %v1849_v63 = vsel %vm1815_vm1, 65537, %v2766_v1 }
  0x71   : > { %v1883_v20 = vunpack.c.l.b16 %v1849_v63 }
  0x72   : > { %v978_v14 = vrot.slane %v955_v11, 6 }
  0x73   : > { %2101 = vrot.lane.b32.xlu1 %v2064_v54, %s2768_s12  ;;  %v2249_v54 = vunpack.c.l.b16 %v2695_v52  ;;  %v3614_v52 = vld [vmem:[%s2822_s16 + $0x38] sm:$0xff] }
  0x74   : > { %v981_v27 = vsel %vm966_vm8, %v978_v14, %v980_v32  ;;  %v979_v39 = vsel %vm966_vm8, %v976_v59, %v978_v14  ;;  %v1929_v32 = vrot.slane %v1905_v9, 2  ;;  %v3605_v9 = vld [vmem:[%s4154_s1 + $0x18] sm:$0xff] }
  0x75   : > { %2103 = vrot.lane.b32.xlu2 %v2065_v37, %s2768_s12  ;;  %v1050_v37 = vunpack.c.h.b16 %v983_v12  ;;  %v1042_v30 = vunpack.c.l.b16 %v981_v27  ;;  %v1043_v61 = vunpack.c.h.b16 %v981_v27  ;;  %v2251_v62 = vpack.c.b16 %v2249_v54, %v2249_v54 }
  0x76   : > { %v1035_v14 = vunpack.c.l.b16 %v979_v39  ;;  %v1036_v55 = vunpack.c.h.b16 %v979_v39  ;;  %v1932_v24 = vsel %vm1510_vm2, %v1929_v32, %v1931_v13  ;;  %v3600_v27 = vpack.c.b16 %v2827_v19, %v1883_v20 }
  0x77   : > { %v3566_v59 = vsel %vm1400_vm9, %v2251_v62, 0  ;;  %vm3577_vm13 = vcmp.ne.s32.totalorder %v1042_v30, %v2803_v4  ;;  %vm3582_vm3 = vcmp.ne.s32.totalorder %v1043_v61, %v2806_v5  ;;  %vm3594_vm5 = vcmp.ne.s32.totalorder %v1050_v37, %v2806_v5 }
  0x78   : > { %1264 = vrot.lane.b32.xlu0 %v3224_v10, %s2768_s12  ;;  %2310 = vmatpush.bf16.msra.mxu2 %v3566_v59  ;;  %vm1048_vm0 = vmpackc.low %vm3582_vm3, %vm3577_vm13  ;;  %vm3621_vm1 = vcmp.ne.s32.totalorder %v1035_v14, %v2803_v4  ;;  %v2003_v63 = vunpack.c.l.b16 %v1932_v24  ;;  %v2004_v54 = vunpack.c.h.b16 %v1932_v24  ;;  %vm3635_vm11 = vcmp.ne.s32.totalorder %v1036_v55, %v2806_v5 }
  0x79   : > { %v1930_v30 = vsel %vm1510_vm2, %v1927_v40, %v1929_v32  ;;  %v1933_v61 = vrot.slane %v3600_v27, 2  ;;  %v934_v62 = vunpack.c.l.b16 %v900_v43  ;;  %vm1041_vm12 = vmpackc.low %vm3635_vm11, %vm3621_vm1 }
  0x7a   : > { %vm3652_vm13 = vcmp.ne.s32.totalorder %v2003_v63, %v2803_v4  ;;  %vm3657_vm3 = vcmp.ne.s32.totalorder %v2004_v54, %v2806_v5  ;;  %v1997_v20 = vunpack.c.h.b16 %v1930_v30  ;;  %v1117_v55 = vsel %vm1041_vm12, %v3475_v26, 0 }
  0x7b   : > { %1173 = vrot.lane.b32.xlu1 %v3201_v48, %s2768_s12  ;;  %v1049_v48 = vunpack.c.l.b16 %v983_v12  ;;  %v1934_v56 = vsel %vm1510_vm2, %v1931_v13, %v1933_v61  ;;  %v958_v14 = vpack.c.b16 %v934_v62, %v2827_v19 }
  0x7c   : > { %2311 = vmatpush.bf16.msra.mxu2 %v3605_v9  ;;  %v2010_v24 = vunpack.c.l.b16 %v1934_v56  ;;  %v2011_v43 = vunpack.c.h.b16 %v1934_v56 }
  0x7d   : > { %1175 = vrot.lane.b32.xlu2 %v3260_v35, %s2768_s12  ;;  %vm3589_vm4 = vcmp.ne.s32.totalorder %v1049_v48, %v2803_v4  ;;  %v299_v48 = vadd.s32 352, %v2797_v2  ;;  %v1118_v2 = vsel %vm1048_vm0, %v3488_v41, 0  ;;  %vm3689_vm0 = vcmp.ne.s32.totalorder %v1997_v20, %v2806_v5 }
  0x7e   : > { %v3551_v11 = vpop.permute.xlu1 %1189  ;;  %vm1055_vm10 = vmpackc.low %vm3594_vm5, %vm3589_vm4  ;;  %v984_v54 = vrot.slane %v958_v14, 6  ;;  %vm3714_vm11 = vcmp.ne.s32.totalorder %v2011_v43, %v2806_v5 }
  0x7f   : > { %v3557_v33 = vpop.permute.xlu2 %1179  ;;  %v1350_v35 = vsel %vm1231_vm6, %v1324_v46, %v3551_v11  ;;  %v1119_v25 = vsel %vm1055_vm10, %v3614_v52, 0  ;;  %v471_v32 = vand.u32 15, %v299_v48  ;;  %vm2009_vm4 = vmpackc.low %vm3657_vm3, %vm3652_vm13  ;;  %vm3709_vm10 = vcmp.ne.s32.totalorder %v2010_v24, %v2803_v4 }
  0x80   : > { %1171 = vrot.lane.b32.xlu0 %v3162_v31, %s2768_s12  ;;  %2669 = vmatmul.msk.bf16.vlgmr.msra.gmra.mxu3 %vm1367_vm7, %v1350_v35  ;;  %v936_v35 = vunpack.c.l.b16 %v902_v57  ;;  %v2067_v39 = vsel %vm2009_vm4, %v2728_v16, 0  ;;  %vm2016_vm12 = vmpackc.low %vm3714_vm11, %vm3709_vm10 }
  0x81   : > { %vm3679_vm5 = vcmp.lt.s32.totalorder %v471_v32, 4 }
  0x82   : > { %v3677_v22 = vpack.c.b16 %v936_v35, %v2827_v19  ;;  %vm1817_vm1 = vmpackc.low %vm3679_vm5, %vm3679_vm5  ;;  %v985_v35 = vsel %vm966_vm8, %v982_v29, %v984_v54 }
  0x83   : > { %1268 = vrot.lane.b32.xlu1 %v3475_v26, %s2768_s12  ;;  %v1851_v40 = vsel %vm1817_vm1, 65537, %v2766_v1  ;;  %v1056_v29 = vunpack.c.l.b16 %v985_v35  ;;  %v1057_v32 = vunpack.c.h.b16 %v985_v35  ;;  %v2068_v1 = vsel %vm2016_vm12, %v3726_v0, 0  ;;  %v2730_v35 = vld [vmem:[%s2822_s16 + $0x50] sm:$0xff] }
  0x84   : > { %v986_v62 = vrot.slane %v3677_v22, 6  ;;  %v1885_v20 = vunpack.c.l.b16 %v1851_v40 }
  0x85   : > { %1270 = vrot.lane.b32.xlu2 %v3488_v41, %s2768_s12  ;;  %v1257_v41 = vld [vmem:[%s4154_s1 + $0x8] sm:$0xf]  ;;  %vm1060_vm13 = vcmp.ne.s32.totalorder %v1056_v29, %v2803_v4  ;;  %vm1061_vm3 = vcmp.ne.s32.totalorder %v1057_v32, %v2806_v5 }
  0x86   : > { %v1549_v31 = vunpack.c.l.b16 %v1257_v41  ;;  %v987_v60 = vsel %vm966_vm8, %v984_v54, %v986_v62 }
  0x87   : > { %v3632_v37 = vpop.permute.xlu2 %1290  ;;  %v1064_v56 = vunpack.c.h.b16 %v987_v60 }
  0x88   : > { %1266 = vrot.lane.b32.xlu0 %v3296_v17, %s2768_s12  ;;  %v1996_v17 = vunpack.c.l.b16 %v1930_v30  ;;  %v1551_v12 = vpack.c.b16 %v1549_v31, %v1549_v31  ;;  %v1908_v31 = vpack.c.b16 %v2827_v19, %v1885_v20  ;;  %v989_v20 = vsel %vm966_vm8, %v986_v62, %v988_v58 }
  0x89   : > { %vm1068_vm5 = vcmp.ne.s32.totalorder %v1064_v56, %v2806_v5  ;;  %v1070_v56 = vunpack.c.l.b16 %v989_v20 }
  0x8a   : > { %vm3684_vm15 = vcmp.ne.s32.totalorder %v1996_v17, %v2803_v4  ;;  %v1602_v57 = vsel %vm1400_vm9, %v1551_v12, 0  ;;  %v1935_v12 = vrot.slane %v1908_v31, 2 }
  0x8b   : > { %1159 = vrot.lane.b32.xlu1 %v1118_v2, %s2768_s12  ;;  %1610 = vmatpush.bf16.msra.mxu1 %v1602_v57  ;;  %vm2002_vm9 = vmpackc.low %vm3689_vm0, %vm3684_vm15 }
  0x8c   : > { %2741 = vmatpush.bf16.msrb.mxu3 %v1602_v57  ;;  %v2066_v17 = vsel %vm2002_vm9, %v3614_v52, 0  ;;  %vm1062_vm15 = vmpackc.low %vm1061_vm3, %vm1060_vm13  ;;  %v1936_v42 = vsel %vm1510_vm2, %v1933_v61, %v1935_v12  ;;  %vm1074_vm3 = vcmp.ne.s32.totalorder %v1070_v56, %v2803_v4 }
  0x8d   : > { %1161 = vrot.lane.b32.xlu2 %v1119_v25, %s2768_s12  ;;  %v2736_v25 = vld [vmem:[%s4154_s1] sm:$0xff]  ;;  %v1120_v24 = vsel %vm1062_vm15, %v2728_v16, 0  ;;  %vm2489_vm15 = vcmask 60416  }
  0x8f   : > { %v1285_v46 = vpop.permute.xlu2 %1284  ;;  %1611 = vmatpush.bf16.msra.mxu1 %v2736_v25 }
  0x90   : > { %1157 = vrot.lane.b32.xlu0 %v1117_v55, %s2768_s12  ;;  %v1327_v48 = vsel %vm1191_vm14, %v2983_v36, %v1285_v46  ;;  %2742 = vmatpush.bf16.msrb.mxu3 %v2736_v25  ;;  %v1938_v46 = vsel %vm1510_vm2, %v1935_v12, %v1937_v50  ;;  %v2018_v36 = vunpack.c.h.b16 %v1936_v42 }
  0x91   : > { %v1351_v30 = vsel %vm1231_vm6, %v1327_v48, %v3551_v11  ;;  %v2024_v57 = vunpack.c.l.b16 %v1938_v46  ;;  %v2025_v48 = vunpack.c.h.b16 %v1938_v46 }
  0x92   : > { %2670 = vmatmul.msk.bf16.gmra.mxu3 %vm1367_vm7, %v1351_v30  ;;  %vm2022_vm12 = vcmp.ne.s32.totalorder %v2018_v36, %v2806_v5 }
  0x93   : > { %2107 = vrot.lane.b32.xlu1 %v2067_v39, %s2768_s12  ;;  %vm2028_vm1 = vcmp.ne.s32.totalorder %v2024_v57, %v2803_v4  ;;  %vm2029_vm9 = vcmp.ne.s32.totalorder %v2025_v48, %v2806_v5 }
  0x94   : > { %2743 = vmatpush.bf16.msra.mxu3 %v3566_v59  ;;  %vm2030_vm10 = vmpackc.low %vm2029_vm9, %vm2028_vm1 }
  0x95   : > { %2115 = vrot.lane.b32.xlu2 %v2948_v23, %s2768_s12  ;;  %v2124_v41 = vpop.permute.xlu1 %2123  ;;  %v1063_v23 = vunpack.c.l.b16 %v987_v60 }
  0x97   : > { %vm1067_vm4 = vcmp.ne.s32.totalorder %v1063_v23, %v2803_v4  ;;  %v1261_v61 = vpop.permute.xlu2 %1260 }
  0x98   : > { %2105 = vrot.lane.b32.xlu0 %v2066_v17, %s2768_s12  ;;  %2744 = vmatpush.bf16.msra.mxu3 %v3605_v9  ;;  %vm1069_vm0 = vmpackc.low %vm1068_vm5, %vm1067_vm4 }
  0x99   : > { %v1121_v9 = vsel %vm1069_vm0, %v3726_v0, 0 }
  0x9a   : > { %v2092_v14 = vpop.permute.xlu0 %2091 }
  0x9b   : > { %2109 = vrot.lane.b32.xlu1 %v2068_v1, %s2768_s12  ;;  %v2132_v55 = vsel %vm1191_vm14, 0, %v2092_v14  ;;  %v1071_v14 = vunpack.c.h.b16 %v989_v20 }
  0x9c   : > { %v2170_v19 = vsel %vm1231_vm6, %v2132_v55, %v2124_v41 }
  0x9d   : > { %1274 = vrot.lane.b32.xlu2 %v2728_v16, %s2768_s12  ;;  %v2126_v59 = vpop.permute.xlu1 %2125  ;;  %v2211_v26 = vrot.slane %v2170_v19, 6  ;;  %vm1075_vm4 = vcmp.ne.s32.totalorder %v1071_v14, %v2806_v5 }
  0x9e   : > { %vm1076_vm5 = vmpackc.low %vm1075_vm4, %vm1074_vm3 }
  0xa0   : > { %1177 = vrot.lane.b32.xlu0 %v3353_v7, %s2768_s12 }
  0xa2   : > { %v2094_v43 = vpop.permute.xlu0 %2093 }
  0xa3   : > { %v2134_v13 = vsel %vm1191_vm14, 0, %v2094_v43  ;;  %1163 = vrot.lane.b32.xlu1 %v1120_v24, %s2768_s12  ;;  %v1122_v43 = vsel %vm1076_vm5, %v2730_v35, 0 }
  0xa4   : > { %v2172_v63 = vsel %vm1231_vm6, %v2134_v13, %v2126_v59 }
  0xa5   : > { %v2212_v54 = vrot.slane %v2172_v63, 6  ;;  %1165 = vrot.lane.b32.xlu2 %v1121_v9, %s2768_s12  ;;  %v1259_v7 = vpop.permute.xlu1 %1258 }
  0xa6   : > { %v1299_v16 = vsel %vm1191_vm14, 0, %v1259_v7 }
  0xa7   : > { %v2213_v39 = vsel %vm966_vm8, %v2211_v26, %v2212_v54  ;;  %v1335_v30 = vsel %vm1231_vm6, %v1299_v16, %v3632_v37  ;;  %v2017_v37 = vunpack.c.l.b16 %v1936_v42 }
  0xa8   : > { %2700 = vmatmul.msk.bf16.vlgmr.msra.gmra.mxu2 %vm1367_vm7, %v2213_v39  ;;  %1272 = vrot.lane.b32.xlu0 %v3614_v52, %s2768_s12  ;;  %v1194_v52 = vsel %vm1191_vm14, 0, %v3426_v45 }
  0xa9   : > { %2657 = vmatmul.msk.bf16.vlgmr.msra.gmra.mxu0 %vm1367_vm7, %v1335_v30  ;;  %vm3782_vm11 = vcmp.ne.s32.totalorder %v2017_v37, %v2803_v4 }
  0xaa   : > { %v1148_v50 = vpop.permute.xlu0 %1147  ;;  %vm2023_vm13 = vmpackc.low %vm2022_vm12, %vm3782_vm11 }
  0xab   : > { %2119 = vrot.lane.b32.xlu1 %v3110_v6, %s2768_s12  ;;  %v2757_v6 = vld [vmem:[%s2822_s16 + $0x58] sm:$0xff]  ;;  %v1196_v40 = vsel %vm1191_vm14, 0, %v1148_v50 }
  0xac   : > { %v2070_v25 = vsel %vm2030_vm10, %v2757_v6, 0 }
  0xad   : > { %2121 = vrot.lane.b32.xlu2 %v3179_v18, %s2768_s12  ;;  %v2128_v27 = vpop.permute.xlu1 %2127  ;;  %v1233_v18 = vsel %vm1231_vm6, %v1194_v52, %v3557_v33  ;;  %v2130_v33 = vpop.permute.xlu2 %2129 }
  0xae   : > { %v1511_v41 = vrot.slane %v1233_v18, 2 }
  0xb0   : > { %2117 = vrot.lane.b32.xlu0 %v3004_v47, %s2768_s12  ;;  %v2069_v47 = vsel %vm2023_vm13, %v2730_v35, 0 }
  0xb2   : > { %v1182_v45 = vpop.permute.xlu0 %1181 }
  0xb3   : > { %v1235_v17 = vsel %vm1231_vm6, %v1196_v40, %v1182_v45  ;;  %2113 = vrot.lane.b32.xlu1 %v2070_v25, %s2768_s12 }
  0xb4   : > { %v1512_v60 = vrot.slane %v1235_v17, 2 }
  0xb5   : > { %1280 = vrot.lane.b32.xlu2 %v2757_v6, %s2768_s12  ;;  %v1184_v29 = vpop.permute.xlu1 %1183  ;;  %v1186_v51 = vpop.permute.xlu2 %1185 }
  0xb6   : > { %v1513_v32 = vsel %vm1510_vm2, %v1511_v41, %v1512_v60 }
  0xb7   : > { %2677 = vmatmul.msk.bf16.vlgmr.msra.gmra.mxu1 %vm1367_vm7, %v1513_v32 }
  0xb8   : > { %2111 = vrot.lane.b32.xlu0 %v2069_v47, %s2768_s12 }
  0xba   : > { %v2096_v1 = vpop.permute.xlu0 %2095 }
  0xbb   : > { %v2136_v23 = vsel %vm1191_vm14, 0, %v2096_v1  ;;  %1278 = vrot.lane.b32.xlu1 %v2730_v35, %s2768_s12 }
  0xbc   : > { %v2174_v31 = vsel %vm1231_vm6, %v2136_v23, %v2128_v27 }
  0xbd   : > { %v2214_v59 = vrot.slane %v2174_v31, 6  ;;  %v2098_v55 = vpop.permute.xlu1 %2097  ;;  %v2100_v26 = vpop.permute.xlu2 %2099 }
  0xbe   : > { %v2138_v24 = vsel %vm1191_vm14, 0, %v2098_v55  ;;  %v2140_v36 = vsel %vm1191_vm14, 0, %v2100_v26 }
  0xbf   : > { %v2215_v12 = vsel %vm966_vm8, %v2212_v54, %v2214_v59  ;;  %v2176_v5 = vsel %vm1231_vm6, %v2138_v24, %v2130_v33  ;;  %v2177_v52 = vsel %vm1231_vm6, %v2140_v36, %v3551_v11 }
  0xc0   : > { %1276 = vrot.lane.b32.xlu0 %v3726_v0, %s2768_s12  ;;  %2701 = vmatmul.msk.bf16.gmra.mxu2 %vm1367_vm7, %v2215_v12  ;;  %v1301_v0 = vsel %vm1191_vm14, 0, %v1261_v61  ;;  %v2216_v46 = vrot.slane %v2176_v5, 6  ;;  %v2218_v6 = vrot.slane %v2177_v52, 6 }
  0xc2   : > { %v1150_v58 = vpop.permute.xlu0 %1149  ;;  %v2217_v16 = vsel %vm966_vm8, %v2214_v59, %v2216_v46  ;;  %v2219_v35 = vsel %vm966_vm8, %v2216_v46, %v2218_v6 }
  0xc3   : > { %v1198_v22 = vsel %vm1191_vm14, 0, %v1150_v58 }
  0xc4   : > { %v1237_v62 = vsel %vm1231_vm6, %v1198_v22, %v1184_v29 }
  0xc5   : > { %v1514_v19 = vrot.slane %v1237_v62, 2  ;;  %v1152_v9 = vpop.permute.xlu1 %1151  ;;  %v1188_v37 = vpop.permute.xlu2 %1187 }
  0xc6   : > { %v1200_v54 = vsel %vm1191_vm14, 0, %v1152_v9 }
  0xc7   : > { %v1515_v4 = vsel %vm1510_vm2, %v1512_v60, %v1514_v19  ;;  %v1239_v57 = vsel %vm1231_vm6, %v1200_v54, %v1186_v51 }
  0xc8   : > { %1167 = vrot.lane.b32.xlu0 %v1122_v43, %s2768_s12  ;;  %2678 = vmatmul.msk.bf16.gmra.mxu1 %vm1367_vm7, %v1515_v4  ;;  %v1516_v39 = vrot.slane %v1239_v57, 2 }
  0xca   : > { %v1293_v13 = vpop.permute.xlu0 %1292  ;;  %v1517_v27 = vsel %vm1510_vm2, %v1514_v19, %v1516_v39 }
  0xcb   : > { %v1337_v63 = vsel %vm1231_vm6, %v1301_v0, %v1293_v13 }
  0xcc   : > { %2658 = vmatmul.msk.bf16.gmra.mxu0 %vm1367_vm7, %v1337_v63 }
  0xcd   : > { %v1295_v7 = vpop.permute.xlu1 %1294  ;;  %v1170_v40 = vpop.permute.xlu2 %1169 }
  0xce   : > { %v1218_v59 = vsel %vm1191_vm14, 0, %v1170_v40 }
  0xcf   : > { %v3866_v12 = vsel %vm1231_vm6, %v1218_v59, %v3551_v11 }
  0xd0   : > { %2702 = vmatmul.msk.bf16.gmra.mxu2 %vm1367_vm7, %v2217_v16  ;;  %v1534_v43 = vrot.slane %v3866_v12, 2 }
  0xd2   : > { %v1287_v48 = vpop.permute.xlu0 %1286 }
  0xd3   : > { %v1330_v30 = vsel %vm1191_vm14, %v3169_v34, %v1287_v48 }
  0xd4   : > { %v1352_v42 = vsel %vm1231_vm6, %v1330_v30, %v3551_v11 }
  0xd5   : > { %2671 = vmatmul.msk.bf16.gmra.mxu3 %vm1367_vm7, %v1352_v42  ;;  %v1154_v50 = vpop.permute.xlu1 %1153  ;;  %v1156_v23 = vpop.permute.xlu2 %1155 }
  0xd6   : > { %v1202_v25 = vsel %vm1191_vm14, 0, %v1154_v50  ;;  %v1204_v55 = vsel %vm1191_vm14, 0, %v1156_v23 }
  0xd7   : > { %v1241_v45 = vsel %vm1231_vm6, %v1202_v25, %v1188_v37  ;;  %v1243_v51 = vsel %vm1231_vm6, %v1204_v55, %v3551_v11 }
  0xd8   : > { %2679 = vmatmul.msk.bf16.gmra.mxu1 %vm1367_vm7, %v1517_v27  ;;  %v1518_v41 = vrot.slane %v1241_v45, 2  ;;  %v1520_v9 = vrot.slane %v1243_v51, 2 }
  0xda   : > { %v1263_v61 = vpop.permute.xlu0 %1262  ;;  %v1519_v33 = vsel %vm1510_vm2, %v1516_v39, %v1518_v41  ;;  %v1521_v0 = vsel %vm1510_vm2, %v1518_v41, %v1520_v9 }
  0xdb   : > { %v1303_v2 = vsel %vm1191_vm14, 0, %v1263_v61 }
  0xdc   : > { %v1339_v34 = vsel %vm1231_vm6, %v1303_v2, %v1295_v7 }
  0xdd   : > { %2659 = vmatmul.msk.bf16.gmra.mxu0 %vm1367_vm7, %v1339_v34  ;;  %v1297_v18 = vpop.permute.xlu1 %1296  ;;  %v2104_v62 = vpop.permute.xlu2 %2103 }
  0xde   : > { %v2144_v5 = vsel %vm1191_vm14, 0, %v2104_v62 }
  0xe0   : > { %2703 = vmatmul.msk.bf16.gmra.mxu2 %vm1367_vm7, %v2219_v35 }
  0xe2   : > { %v1289_v17 = vpop.permute.xlu0 %1288 }
  0xe3   : > { %v1333_v60 = vsel %vm1191_vm14, %v3224_v10, %v1289_v17 }
  0xe4   : > { %v1353_v47 = vsel %vm1231_vm6, %v1333_v60, %v3551_v11 }
  0xe5   : > { %2672 = vmatmul.msk.bf16.gmra.mxu3 %vm1367_vm7, %v1353_v47  ;;  %v2102_v29 = vpop.permute.xlu1 %2101  ;;  %v1176_v27 = vpop.permute.xlu2 %1175 }
  0xe6   : > { %v2142_v32 = vsel %vm1191_vm14, 0, %v2102_v29  ;;  %v1227_v40 = vsel %vm1191_vm14, %v3317_v15, %v1176_v27 }
  0xe7   : > { %v2178_v20 = vsel %vm1231_vm6, %v2142_v32, %v3551_v11  ;;  %v1253_v41 = vsel %vm1231_vm6, %v1227_v40, %v3551_v11 }
  0xe8   : > { %2680 = vmatmul.msk.bf16.gmra.mxu1 %vm1367_vm7, %v1519_v33  ;;  %v2220_v1 = vrot.slane %v2178_v20, 6  ;;  %v1540_v33 = vrot.slane %v1253_v41, 2 }
  0xea   : > { %v1265_v56 = vpop.permute.xlu0 %1264  ;;  %v2221_v31 = vsel %vm966_vm8, %v2218_v6, %v2220_v1 }
  0xeb   : > { %v1305_v10 = vsel %vm1191_vm14, 0, %v1265_v56 }
  0xec   : > { %v1341_v14 = vsel %vm1231_vm6, %v1305_v10, %v1297_v18 }
  0xed   : > { %2660 = vmatmul.msk.bf16.gmra.mxu0 %vm1367_vm7, %v1341_v14  ;;  %v1174_v24 = vpop.permute.xlu1 %1173  ;;  %v1271_v60 = vpop.permute.xlu2 %1270 }
  0xee   : > { %v1224_v7 = vsel %vm1191_vm14, %v3308_v21, %v1174_v24  ;;  %v1311_v56 = vsel %vm1191_vm14, 0, %v1271_v60 }
  0xef   : > { %v1252_v48 = vsel %vm1231_vm6, %v1224_v7, %v3551_v11 }
  0xf0   : > { %2704 = vmatmul.msk.bf16.gmra.mxu2 %vm1367_vm7, %v2221_v31  ;;  %v1538_v30 = vrot.slane %v1252_v48, 2  ;;  %v1344_v31 = vsel %vm1231_vm6, %v1311_v56, %v3551_v11 }
  0xf2   : > { %v1172_v58 = vpop.permute.xlu0 %1171  ;;  %v1541_v15 = vsel %vm1510_vm2, %v1538_v30, %v1540_v33 }
  0xf3   : > { %v1221_v22 = vsel %vm1191_vm14, %v3048_v28, %v1172_v58  ;;  %v2179_v28 = vsel %vm1231_vm6, %v2144_v5, %v3551_v11 }
  0xf4   : > { %v1251_v19 = vsel %vm1231_vm6, %v1221_v22, %v3551_v11  ;;  %v2222_v54 = vrot.slane %v2179_v28, 6 }
  0xf5   : > { %v1536_v4 = vrot.slane %v1251_v19, 2  ;;  %v1269_v16 = vpop.permute.xlu1 %1268  ;;  %v1162_v14 = vpop.permute.xlu2 %1161 }
  0xf6   : > { %v2223_v57 = vsel %vm966_vm8, %v2220_v1, %v2222_v54  ;;  %v1309_v61 = vsel %vm1191_vm14, 0, %v1269_v16  ;;  %v1210_v51 = vsel %vm1191_vm14, 0, %v1162_v14 }
  0xf7   : > { %v1537_v13 = vsel %vm1510_vm2, %v1534_v43, %v1536_v4  ;;  %v1539_v36 = vsel %vm1510_vm2, %v1536_v4, %v1538_v30  ;;  %v1343_v25 = vsel %vm1231_vm6, %v1309_v61, %v3551_v11  ;;  %v1246_v24 = vsel %vm1231_vm6, %v1210_v51, %v3551_v11 }
  0xf8   : > { %2681 = vmatmul.msk.bf16.gmra.mxu1 %vm1367_vm7, %v1521_v0  ;;  %2689 = vmatmul.msk.bf16.vlgmr.msrb.gmra.mxu3 %vm1367_vm7, %v1537_v13 }
  0xfa   : > { %v1267_v46 = vpop.permute.xlu0 %1266 }
  0xfb   : > { %v1307_v63 = vsel %vm1191_vm14, 0, %v1267_v46 }
  0xfc   : > { %v1342_v26 = vsel %vm1231_vm6, %v1307_v63, %v3551_v11 }
  0xfd   : > { %2661 = vmatmul.msk.bf16.gmra.mxu0 %vm1367_vm7, %v1342_v26  ;;  %v1160_v52 = vpop.permute.xlu1 %1159  ;;  %v2116_v4 = vpop.permute.xlu2 %2115 }
  0xfe   : > { %v1208_v18 = vsel %vm1191_vm14, 0, %v1160_v52 }
  0xff   : > { %v1245_v17 = vsel %vm1231_vm6, %v1208_v18, %v3551_v11 }
 0x100   : > { %2705 = vmatmul.msk.bf16.gmra.mxu2 %vm1367_vm7, %v2223_v57  ;;  %v1524_v29 = vrot.slane %v1245_v17, 2  ;;  %v2157_v57 = vsel %vm1191_vm14, %v2996_v44, %v2116_v4 }
 0x102   : > { %v1158_v39 = vpop.permute.xlu0 %1157 }
 0x103   : > { %v1206_v42 = vsel %vm1191_vm14, 0, %v1158_v39 }
 0x104   : > { %v1244_v50 = vsel %vm1231_vm6, %v1206_v42, %v3551_v11 }
 0x105   : > { %v1522_v37 = vrot.slane %v1244_v50, 2  ;;  %v2108_v47 = vpop.permute.xlu1 %2107  ;;  %v1275_v39 = vpop.permute.xlu2 %1274 }
 0x106   : > { %v2148_v20 = vsel %vm1191_vm14, 0, %v2108_v47  ;;  %v3959_v50 = vpop.f32.mrf.mxu3 }
 0x107   : > { %v1523_v21 = vsel %vm1510_vm2, %v1520_v9, %v1522_v37  ;;  %v1525_v1 = vsel %vm1510_vm2, %v1522_v37, %v1524_v29  ;;  %v2181_v23 = vsel %vm1231_vm6, %v2148_v20, %v3551_v11  ;;  %v1526_v9 = vrot.slane %v1246_v24, 2 }
 0x108   : > { %2682 = vmatmul.msk.bf16.gmra.mxu1 %vm1367_vm7, %v1523_v21  ;;  %2690 = vmatmul.msk.bf16.gmra.mxu3 %vm1367_vm7, %v1539_v36  ;;  %v2226_v10 = vrot.slane %v2181_v23, 6 }
 0x109   : > { %v1527_v5 = vsel %vm1510_vm2, %v1524_v29, %v1526_v9 }
 0x10a   : > { %v2106_v2 = vpop.permute.xlu0 %2105 }
 0x10b   : > { %v2146_v34 = vsel %vm1191_vm14, 0, %v2106_v2 }
 0x10c   : > { %v2180_v6 = vsel %vm1231_vm6, %v2146_v34, %v3551_v11 }
 0x10d   : > { %v2224_v35 = vrot.slane %v2180_v6, 6  ;;  %2662 = vmatmul.msk.bf16.gmra.mxu0 %vm1367_vm7, %v1343_v25  ;;  %v2110_v22 = vpop.permute.xlu1 %2109  ;;  %v1166_v41 = vpop.permute.xlu2 %1165 }
 0x10e   : > { %v3983_v60 = vpop.f32.mrf.mxu3  ;;  %v1214_v56 = vsel %vm1191_vm14, 0, %v1166_v41 }
 0x10f   : > { %v2225_v45 = vsel %vm966_vm8, %v2222_v54, %v2224_v35  ;;  %v2227_v58 = vsel %vm966_vm8, %v2224_v35, %v2226_v10 }
 0x110   : > { %2706 = vmatmul.msk.bf16.gmra.mxu2 %vm1367_vm7, %v2225_v45  ;;  %v1315_v45 = vsel %vm1191_vm14, 0, %v1275_v39 }
 0x112   : > { %v1178_v32 = vpop.permute.xlu0 %1177 }
 0x113   : > { %v1230_v59 = vsel %vm1191_vm14, %v3387_v3, %v1178_v32  ;;  %v2150_v3 = vsel %vm1191_vm14, 0, %v2110_v22 }
 0x114   : > { %v1254_v62 = vsel %vm1231_vm6, %v1230_v59, %v3551_v11  ;;  %v2182_v13 = vsel %vm1231_vm6, %v2150_v3, %v3551_v11 }
 0x115   : > { %v1542_v19 = vrot.slane %v1254_v62, 2  ;;  %v1164_v63 = vpop.permute.xlu1 %1163  ;;  %v2228_v26 = vrot.slane %v2182_v13, 6 }
 0x116   : > { %v1212_v7 = vsel %vm1191_vm14, 0, %v1164_v63  ;;  %v4002_v3 = vpop.f32.mrf.mxu3 }
 0x117   : > { %v1543_v0 = vsel %vm1510_vm2, %v1540_v33, %v1542_v19  ;;  %v2229_v48 = vsel %vm966_vm8, %v2226_v10, %v2228_v26  ;;  %v1247_v30 = vsel %vm1231_vm6, %v1212_v7, %v3551_v11  ;;  %v2122_v7 = vpop.permute.xlu2 %2121 }
 0x118   : > { %2683 = vmatmul.msk.bf16.gmra.mxu1 %vm1367_vm7, %v1525_v1  ;;  %2691 = vmatmul.msk.bf16.gmra.mxu3 %vm1367_vm7, %v1541_v15  ;;  %v1528_v36 = vrot.slane %v1247_v30, 2  ;;  %v1346_v1 = vsel %vm1231_vm6, %v1315_v45, %v3551_v11 }
 0x11a   : > { %v1273_v55 = vpop.permute.xlu0 %1272  ;;  %v1529_v25 = vsel %vm1510_vm2, %v1526_v9, %v1528_v36 }
 0x11b   : > { %v1313_v46 = vsel %vm1191_vm14, 0, %v1273_v55 }
 0x11c   : > { %v1345_v54 = vsel %vm1231_vm6, %v1313_v46, %v3551_v11 }
 0x11d   : > { %2663 = vmatmul.msk.bf16.gmra.mxu0 %vm1367_vm7, %v1344_v31  ;;  %v2120_v35 = vpop.permute.xlu1 %2119 }
 0x11e   : > { %v2163_v15 = vsel %vm1191_vm14, %v3208_v53, %v2120_v35  ;;  %v1248_v53 = vsel %vm1231_vm6, %v1214_v56, %v3551_v11 }
 0x11f   : > { %v2187_v31 = vsel %vm1231_vm6, %v2163_v15, %v3551_v11  ;;  %v1530_v24 = vrot.slane %v1248_v53, 2 }
 0x120   : > { %2707 = vmatmul.msk.bf16.gmra.mxu2 %vm1367_vm7, %v2227_v58  ;;  %v2238_v58 = vrot.slane %v2187_v31, 6 }
 0x121   : > { %v1531_v4 = vsel %vm1510_vm2, %v1528_v36, %v1530_v24 }
 0x122   : > { %v2118_v28 = vpop.permute.xlu0 %2117 }
 0x123   : > { %v2160_v16 = vsel %vm1191_vm14, %v3012_v49, %v2118_v28  ;;  %v3963_v49 = vsel %vm1231_vm6, %v2157_v57, %v3551_v11 }
 0x124   : > { %v2186_v42 = vsel %vm1231_vm6, %v2160_v16, %v3551_v11  ;;  %v2234_v61 = vrot.slane %v3963_v49, 6 }
 0x125   : > { %v2236_v27 = vrot.slane %v2186_v42, 6  ;;  %v2114_v51 = vpop.permute.xlu1 %2113  ;;  %v2166_v42 = vsel %vm1191_vm14, %v3263_v38, %v2122_v7 }
 0x126   : > { %v1413_v44 = vpop.f32.mrf.mxu0  ;;  %v2154_v19 = vsel %vm1191_vm14, 0, %v2114_v51 }
 0x127   : > { %v2237_v18 = vsel %vm966_vm8, %v2234_v61, %v2236_v27 }
 0x128   : > { %2684 = vmatmul.msk.bf16.gmra.mxu1 %vm1367_vm7, %v1527_v5  ;;  %2692 = vmatmul.msk.bf16.gmra.mxu3 %vm1367_vm7, %v1543_v0  ;;  %v2239_v5 = vsel %vm966_vm8, %v2236_v27, %v2238_v58  ;;  %v2184_v0 = vsel %vm1231_vm6, %v2154_v19, %v3551_v11 }
 0x12a   : > { %v2112_v21 = vpop.permute.xlu0 %2111 }
 0x12b   : > { %v2313_v37 = vpop.f32.mrf.mxu2  ;;  %v2152_v2 = vsel %vm1191_vm14, 0, %v2112_v21  ;;  %v4018_v21 = vpop.f32.mrf.mxu3 }
 0x12c   : > { %v2183_v40 = vsel %vm1231_vm6, %v2152_v2, %v3551_v11 }
 0x12d   : > { %2664 = vmatmul.msk.bf16.gmra.mxu0 %vm1367_vm7, %v1345_v54  ;;  %v2230_v47 = vrot.slane %v2183_v40, 6  ;;  %v1279_v35 = vpop.permute.xlu1 %1278 }
 0x12e   : > { %v1415_v33 = vpop.f32.mrf.mxu0 }
 0x12f   : > { %v2231_v14 = vsel %vm966_vm8, %v2228_v26, %v2230_v47  ;;  %v2232_v26 = vrot.slane %v2184_v0, 6 }
 0x130   : > { %2708 = vmatmul.msk.bf16.gmra.mxu2 %vm1367_vm7, %v2229_v48 }
 0x132   : > { %v1277_v59 = vpop.permute.xlu0 %1276 }
 0x133   : > { %v2315_v29 = vpop.f32.mrf.mxu2  ;;  %v1317_v13 = vsel %vm1191_vm14, 0, %v1277_v59 }
 0x134   : > { %v1613_v52 = vpop.f32.mrf.mxu1  ;;  %v1347_v57 = vsel %vm1231_vm6, %v1317_v13, %v3551_v11 }
 0x135   : > { %v1614_v34 = vadd.f32 %v1613_v52, %v1413_v44  ;;  %v2188_v52 = vsel %vm1231_vm6, %v2166_v42, %v3551_v11 }
 0x137   : > { %v2393_v6 = vadd.f32 %v2313_v37, %v1614_v34  ;;  %v2233_v37 = vsel %vm966_vm8, %v2230_v47, %v2232_v26 }
 0x138   : > { %2685 = vmatmul.msk.bf16.gmra.mxu1 %vm1367_vm7, %v1529_v25  ;;  %2712 = vmatmul.msk.bf16.vlgmr.msra.gmra.mxu3 %vm1367_vm7, %v2237_v18  ;;  %v2240_v25 = vrot.slane %v2188_v52, 6 }
 0x139   : > { %v2425_v17 = vmax.f32 %v2393_v6, 0.0 }
 0x13a   : > { %v1168_v46 = vpop.permute.xlu0 %1167 }
 0x13b   : > { %v2457_v32 = vpack.c.bf16 %v2425_v17, %v2425_v17  ;;  %v1216_v48 = vsel %vm1191_vm14, 0, %v1168_v46  ;;  %v2241_v17 = vsel %vm966_vm8, %v2238_v58, %v2240_v25 }
 0x13c   : > { %v1615_v20 = vpop.f32.mrf.mxu1  ;;  %v1249_v44 = vsel %vm1231_vm6, %v1216_v48, %v3551_v11 }
 0x13d   : > { %2490 = vst.msk [vmem:[%s3981_s3] sm:$0xf] %vm2489_vm15, %v2457_v32  ;;  %v1616_v23 = vadd.f32 %v1615_v20, %v1415_v33  ;;  %2665 = vmatmul.msk.bf16.gmra.mxu0 %vm1367_vm7, %v1346_v1  ;;  %v1532_v34 = vrot.slane %v1249_v44, 2 }
 0x13f   : > { %v2394_v10 = vadd.f32 %v2315_v29, %v1616_v23  ;;  %v1533_v45 = vsel %vm1510_vm2, %v1530_v24, %v1532_v34  ;;  %v1319_v29 = vsel %vm1191_vm14, 0, %v1279_v35  ;;  %v1535_v24 = vsel %vm1510_vm2, %v1532_v34, %v1534_v43 }
 0x140   : > { %2709 = vmatmul.msk.bf16.gmra.mxu2 %vm1367_vm7, %v2231_v14  ;;  %v1348_v1 = vsel %vm1231_vm6, %v1319_v29, %v3551_v11 }
 0x141   : > { %v2426_v55 = vmax.f32 %v2394_v10, 0.0  ;;  %v2235_v10 = vsel %vm966_vm8, %v2232_v26, %v2234_v61 }
 0x143   : > { %v2458_v22 = vpack.c.bf16 %v2426_v55, %v2426_v55  ;;  %v2318_v62 = vpop.f32.mrf.mxu2  ;;  %v2189_v55 = vsel %vm1231_vm6, %v3436_v8, %v3551_v11 }
 0x144   : > { %v2242_v49 = vrot.slane %v2189_v55, 6 }
 0x145   : > { %2491 = vst.msk [vmem:[%s3981_s3 + $0x4] sm:$0xf] %vm2489_vm15, %v2458_v22  ;;  %v1618_v9 = vpop.f32.mrf.mxu1 }
 0x146   : > { %v2243_v19 = vsel %vm966_vm8, %v2240_v25, %v2242_v49 }
 0x148   : > { %2686 = vmatmul.msk.bf16.gmra.mxu1 %vm1367_vm7, %v1531_v4  ;;  %2713 = vmatmul.msk.bf16.gmra.mxu3 %vm1367_vm7, %v2239_v5 }
 0x149   : > { %v1418_v28 = vpop.f32.mrf.mxu0 }
 0x14a   : > { %v1619_v63 = vadd.f32 %v1618_v9, %v1418_v28 }
 0x14b   : > { %v2320_v54 = vpop.f32.mrf.mxu2 }
 0x14c   : > { %v2395_v16 = vadd.f32 %v2318_v62, %v1619_v63  ;;  %v1281_v62 = vpop.permute.xlu2 %1280 }
 0x14d   : > { %2666 = vmatmul.msk.bf16.gmra.mxu0 %vm1367_vm7, %v1347_v57  ;;  %v1620_v39 = vpop.f32.mrf.mxu1  ;;  %v1321_v8 = vsel %vm1191_vm14, 0, %v1281_v62 }
 0x14e   : > { %v2427_v30 = vmax.f32 %v2395_v16, 0.0  ;;  %v1349_v12 = vsel %vm1231_vm6, %v1321_v8, %v3551_v11 }
 0x150   : > { %v2459_v36 = vpack.c.bf16 %v2427_v30, %v2427_v30  ;;  %2710 = vmatmul.msk.bf16.gmra.mxu2 %vm1367_vm7, %v2233_v37 }
 0x151   : > { %v1420_v27 = vpop.f32.mrf.mxu0 }
 0x152   : > { %2492 = vst.msk [vmem:[%s3981_s3 + $0x8] sm:$0xf] %vm2489_vm15, %v2459_v36  ;;  %v1621_v2 = vadd.f32 %v1620_v39, %v1420_v27 }
 0x153   : > { %v2323_v38 = vpop.f32.mrf.mxu2 }
 0x154   : > { %v2396_v6 = vadd.f32 %v2320_v54, %v1621_v2 }
 0x155   : > { %v1623_v18 = vpop.f32.mrf.mxu1 }
 0x156   : > { %v2428_v40 = vmax.f32 %v2396_v6, 0.0 }
 0x158   : > { %v2460_v41 = vpack.c.bf16 %v2428_v40, %v2428_v40  ;;  %v4029_v47 = vpop.f32.mrf.mxu3  ;;  %2687 = vmatmul.msk.bf16.gmra.mxu1 %vm1367_vm7, %v1533_v45  ;;  %2714 = vmatmul.msk.bf16.gmra.mxu3 %vm1367_vm7, %v2241_v17 }
 0x15a   : > { %2493 = vst.msk [vmem:[%s3981_s3 + $0xc] sm:$0xf] %vm2489_vm15, %v2460_v41  ;;  %v1423_v32 = vpop.f32.mrf.mxu0 }
 0x15b   : > { %v1624_v33 = vadd.f32 %v1623_v18, %v1423_v32  ;;  %v2325_v20 = vpop.f32.mrf.mxu2 }
 0x15d   : > { %v2397_v15 = vadd.f32 %v2323_v38, %v1624_v33  ;;  %2667 = vmatmul.msk.bf16.gmra.mxu0 %vm1367_vm7, %v1348_v1  ;;  %v1625_v23 = vpop.f32.mrf.mxu1 }
 0x15f   : > { %v2429_v56 = vmax.f32 %v2397_v15, 0.0 }
 0x160   : > { %v4042_v14 = vpop.f32.mrf.mxu3  ;;  %2711 = vmatmul.msk.bf16.gmra.mxu2 %vm1367_vm7, %v2235_v10 }
 0x161   : > { %v2461_v31 = vpack.c.bf16 %v2429_v56, %v2429_v56 }
 0x162   : > { %v1425_v59 = vpop.f32.mrf.mxu0 }
 0x163   : > { %2494 = vst.msk [vmem:[%s3981_s3 + $0x10] sm:$0xf] %vm2489_vm15, %v2461_v31  ;;  %v1626_v53 = vadd.f32 %v1625_v23, %v1425_v59  ;;  %v2328_v51 = vpop.f32.mrf.mxu2 }
 0x165   : > { %v2398_v58 = vadd.f32 %v2325_v20, %v1626_v53  ;;  %v1628_v22 = vpop.f32.mrf.mxu1 }
 0x167   : > { %v2430_v61 = vmax.f32 %v2398_v58, 0.0 }
 0x168   : > { %2688 = vmatmul.msk.bf16.gmra.mxu1 %vm1367_vm7, %v1535_v24  ;;  %2715 = vmatmul.msk.bf16.gmra.mxu3 %vm1367_vm7, %v2243_v19  ;;  %v4057_v4 = vpop.f32.mrf.mxu3 }
 0x169   : > { %v2462_v9 = vpack.c.bf16 %v2430_v61, %v2430_v61 }
 0x16a   : > { %v1428_v5 = vpop.f32.mrf.mxu0 }
 0x16b   : > { %2495 = vst.msk [vmem:[%s3981_s3 + $0x14] sm:$0xf] %vm2489_vm15, %v2462_v9  ;;  %v1629_v0 = vadd.f32 %v1628_v22, %v1428_v5  ;;  %v2330_v13 = vpop.f32.mrf.mxu2 }
 0x16d   : > { %v2399_v43 = vadd.f32 %v2328_v51, %v1629_v0  ;;  %2668 = vmatmul.msk.bf16.gmra.mxu0 %vm1367_vm7, %v1349_v12  ;;  %v1630_v28 = vpop.f32.mrf.mxu1 }
 0x16f   : > { %v2431_v46 = vmax.f32 %v2399_v43, 0.0 }
 0x170   : > { %v4066_v54 = vpop.f32.mrf.mxu3 }
 0x171   : > { %v2463_v63 = vpack.c.bf16 %v2431_v46, %v2431_v46 }
 0x172   : > { %v1430_v26 = vpop.f32.mrf.mxu0 }
 0x173   : > { %2496 = vst.msk [vmem:[%s3981_s3 + $0x18] sm:$0xf] %vm2489_vm15, %v2463_v63  ;;  %v1631_v7 = vadd.f32 %v1630_v28, %v1430_v26  ;;  %v2333_v16 = vpop.f32.mrf.mxu2 }
 0x175   : > { %v2400_v57 = vadd.f32 %v2330_v13, %v1631_v7  ;;  %v1633_v48 = vpop.f32.mrf.mxu1 }
 0x177   : > { %v2432_v39 = vmax.f32 %v2400_v57, 0.0 }
 0x179   : > { %v2464_v30 = vpack.c.bf16 %v2432_v39, %v2432_v39 }
 0x17a   : > { %v1433_v11 = vpop.f32.mrf.mxu0 }
 0x17b   : > { %2497 = vst.msk [vmem:[%s3981_s3 + $0x1c] sm:$0xf] %vm2489_vm15, %v2464_v30  ;;  %v1634_v42 = vadd.f32 %v1633_v48, %v1433_v11  ;;  %v4070_v37 = vpop.f32.mrf.mxu3  ;;  %v2335_v44 = vpop.f32.mrf.mxu2 }
 0x17d   : > { %v2401_v36 = vadd.f32 %v2333_v16, %v1634_v42  ;;  %v1635_v27 = vpop.f32.mrf.mxu1 }
 0x17f   : > { %v2433_v52 = vmax.f32 %v2401_v36, 0.0 }
 0x181   : > { %v2465_v2 = vpack.c.bf16 %v2433_v52, %v2433_v52 }
 0x182   : > { %v1435_v34 = vpop.f32.mrf.mxu0 }
 0x183   : > { %2498 = vst.msk [vmem:[%s3981_s3 + $0x20] sm:$0xf] %vm2489_vm15, %v2465_v2  ;;  %v1636_v38 = vadd.f32 %v1635_v27, %v1435_v34  ;;  %v4074_v6 = vpop.f32.mrf.mxu3  ;;  %v2338_v25 = vpop.f32.mrf.mxu2 }
 0x185   : > { %v2402_v18 = vadd.f32 %v2335_v44, %v1636_v38  ;;  %v1638_v35 = vpop.f32.mrf.mxu1  ;;  %v1674_v38 = vadd.f32 %v4070_v37, %v3959_v50 }
 0x187   : > { %v2434_v40 = vmax.f32 %v2402_v18, 0.0 }
 0x189   : > { %v2466_v45 = vpack.c.bf16 %v2434_v40, %v2434_v40 }
 0x18a   : > { %v1438_v17 = vpop.f32.mrf.mxu0 }
 0x18b   : > { %2499 = vst.msk [vmem:[%s3981_s3 + $0x24] sm:$0xf] %vm2489_vm15, %v2466_v45  ;;  %v1639_v41 = vadd.f32 %v1638_v35, %v1438_v17  ;;  %v4078_v29 = vpop.f32.mrf.mxu3  ;;  %v2340_v32 = vpop.f32.mrf.mxu2 }
 0x18d   : > { %v2403_v33 = vadd.f32 %v2338_v25, %v1639_v41  ;;  %v1640_v20 = vpop.f32.mrf.mxu1 }
 0x18f   : > { %v2435_v1 = vmax.f32 %v2403_v33, 0.0 }
 0x191   : > { %v2467_v15 = vpack.c.bf16 %v2435_v1, %v2435_v1 }
 0x192   : > { %v1440_v23 = vpop.f32.mrf.mxu0 }
 0x193   : > { %2500 = vst.msk [vmem:[%s3981_s3 + $0x28] sm:$0xf] %vm2489_vm15, %v2467_v15  ;;  %v1641_v56 = vadd.f32 %v1640_v20, %v1440_v23  ;;  %v4082_v10 = vpop.f32.mrf.mxu3  ;;  %v2343_v31 = vpop.f32.mrf.mxu2  ;;  %v1676_v15 = vadd.f32 %v4074_v6, %v3983_v60  ;;  %v1679_v60 = vadd.f32 %v4078_v29, %v4002_v3 }
 0x194   : > { %v1681_v3 = vadd.f32 %v4082_v10, %v4018_v21 }
 0x195   : > { %v2404_v59 = vadd.f32 %v2340_v32, %v1641_v56  ;;  %v1643_v55 = vpop.f32.mrf.mxu1 }
 0x197   : > { %v2436_v53 = vmax.f32 %v2404_v59, 0.0 }
 0x199   : > { %v2468_v51 = vpack.c.bf16 %v2436_v53, %v2436_v53 }
 0x19a   : > { %v1443_v58 = vpop.f32.mrf.mxu0 }
 0x19b   : > { %2501 = vst.msk [vmem:[%s3981_s3 + $0x2c] sm:$0xf] %vm2489_vm15, %v2468_v51  ;;  %v1644_v22 = vadd.f32 %v1643_v55, %v1443_v58  ;;  %v4086_v49 = vpop.f32.mrf.mxu3  ;;  %v2345_v62 = vpop.f32.mrf.mxu2 }
 0x19c   : > { %v1684_v21 = vadd.f32 %v4086_v49, %v4029_v47 }
 0x19d   : > { %v2405_v61 = vadd.f32 %v2343_v31, %v1644_v22  ;;  %v1645_v24 = vpop.f32.mrf.mxu1 }
 0x19f   : > { %v2437_v19 = vmax.f32 %v2405_v61, 0.0 }
 0x1a1   : > { %v2469_v8 = vpack.c.bf16 %v2437_v19, %v2437_v19 }
 0x1a2   : > { %v1445_v9 = vpop.f32.mrf.mxu0 }
 0x1a3   : > { %2502 = vst.msk [vmem:[%s3981_s3 + $0x30] sm:$0xf] %vm2489_vm15, %v2469_v8  ;;  %v1646_v5 = vadd.f32 %v1645_v24, %v1445_v9  ;;  %v4090_v0 = vpop.f32.mrf.mxu3  ;;  %v2348_v13 = vpop.f32.mrf.mxu2 }
 0x1a4   : > { %v1686_v47 = vadd.f32 %v4090_v0, %v4042_v14 }
 0x1a5   : > { %v2406_v12 = vadd.f32 %v2345_v62, %v1646_v5  ;;  %v1648_v43 = vpop.f32.mrf.mxu1 }
 0x1a7   : > { %v2438_v28 = vmax.f32 %v2406_v12, 0.0 }
 0x1a9   : > { %v2470_v46 = vpack.c.bf16 %v2438_v28, %v2438_v28 }
 0x1aa   : > { %v1448_v63 = vpop.f32.mrf.mxu0 }
 0x1ab   : > { %2503 = vst.msk [vmem:[%s3981_s3 + $0x34] sm:$0xf] %vm2489_vm15, %v2470_v46  ;;  %v1649_v26 = vadd.f32 %v1648_v43, %v1448_v63  ;;  %v4094_v7 = vpop.f32.mrf.mxu3  ;;  %v2350_v16 = vpop.f32.mrf.mxu2 }
 0x1ad   : > { %v2407_v57 = vadd.f32 %v2348_v13, %v1649_v26  ;;  %v1650_v48 = vpop.f32.mrf.mxu1 }
 0x1af   : > { %v2439_v39 = vmax.f32 %v2407_v57, 0.0 }
 0x1b1   : > { %v2471_v30 = vpack.c.bf16 %v2439_v39, %v2439_v39 }
 0x1b2   : > { %v1450_v11 = vpop.f32.mrf.mxu0 }
 0x1b3   : > { %2504 = vst.msk [vmem:[%s3981_s3 + $0x38] sm:$0xf] %vm2489_vm15, %v2471_v30  ;;  %v1651_v42 = vadd.f32 %v1650_v48, %v1450_v11  ;;  %v4098_v44 = vpop.f32.mrf.mxu3  ;;  %v2353_v36 = vpop.f32.mrf.mxu2 }
 0x1b5   : > { %v2408_v27 = vadd.f32 %v2350_v16, %v1651_v42  ;;  %v1653_v52 = vpop.f32.mrf.mxu1 }
 0x1b7   : > { %v2440_v2 = vmax.f32 %v2408_v27, 0.0 }
 0x1b9   : > { %v2472_v34 = vpack.c.bf16 %v2440_v2, %v2440_v2 }
 0x1ba   : > { %v1453_v25 = vpop.f32.mrf.mxu0 }
 0x1bb   : > { %2505 = vst.msk [vmem:[%s3981_s3 + $0x3c] sm:$0xf] %vm2489_vm15, %v2472_v34  ;;  %v1654_v18 = vadd.f32 %v1653_v52, %v1453_v25  ;;  %v2355_v35 = vpop.f32.mrf.mxu2  ;;  %v2373_v40 = vpop.f32.mrf.mxu3 }
 0x1bc   : > { %v2417_v45 = vadd.f32 %v2373_v40, %v1674_v38 }
 0x1bd   : > { %v2409_v17 = vadd.f32 %v2353_v36, %v1654_v18  ;;  %v1655_v41 = vpop.f32.mrf.mxu1 }
 0x1be   : > { %v2449_v32 = vmax.f32 %v2417_v45, 0.0 }
 0x1bf   : > { %v2441_v33 = vmax.f32 %v2409_v17, 0.0 }
 0x1c0   : > { %v2481_v20 = vpack.c.bf16 %v2449_v32, %v2449_v32 }
 0x1c1   : > { %v2473_v1 = vpack.c.bf16 %v2441_v33, %v2441_v33 }
 0x1c2   : > { %2514 = vst.msk [vmem:[%s3981_s3 + $0x60] sm:$0xf] %vm2489_vm15, %v2481_v20  ;;  %v1455_v50 = vpop.f32.mrf.mxu0 }
 0x1c3   : > { %2506 = vst.msk [vmem:[%s3981_s3 + $0x40] sm:$0xf] %vm2489_vm15, %v2473_v1  ;;  %v1656_v37 = vadd.f32 %v1655_v41, %v1455_v50  ;;  %v2358_v23 = vpop.f32.mrf.mxu2  ;;  %v2375_v56 = vpop.f32.mrf.mxu3  ;;  %v1689_v50 = vadd.f32 %v4094_v7, %v4057_v4  ;;  %v1691_v4 = vadd.f32 %v4098_v44, %v4066_v54 }
 0x1c4   : > { %v2418_v31 = vadd.f32 %v2375_v56, %v1676_v15 }
 0x1c5   : > { %v2410_v59 = vadd.f32 %v2355_v35, %v1656_v37  ;;  %v1658_v55 = vpop.f32.mrf.mxu1 }
 0x1c6   : > { %v2450_v53 = vmax.f32 %v2418_v31, 0.0 }
 0x1c7   : > { %v2442_v51 = vmax.f32 %v2410_v59, 0.0 }
 0x1c8   : > { %v2482_v58 = vpack.c.bf16 %v2450_v53, %v2450_v53 }
 0x1c9   : > { %v2474_v22 = vpack.c.bf16 %v2442_v51, %v2442_v51 }
 0x1ca   : > { %2515 = vst.msk [vmem:[%s3981_s3 + $0x64] sm:$0xf] %vm2489_vm15, %v2482_v58  ;;  %v1458_v6 = vpop.f32.mrf.mxu0 }
 0x1cb   : > { %2507 = vst.msk [vmem:[%s3981_s3 + $0x44] sm:$0xf] %vm2489_vm15, %v2474_v22  ;;  %v1659_v62 = vadd.f32 %v1658_v55, %v1458_v6  ;;  %v2378_v61 = vpop.f32.mrf.mxu3  ;;  %v2360_v24 = vpop.f32.mrf.mxu2 }
 0x1cc   : > { %v2419_v19 = vadd.f32 %v2378_v61, %v1679_v60 }
 0x1cd   : > { %v2411_v8 = vadd.f32 %v2358_v23, %v1659_v62  ;;  %v1660_v9 = vpop.f32.mrf.mxu1 }
 0x1ce   : > { %v2451_v5 = vmax.f32 %v2419_v19, 0.0 }
 0x1cf   : > { %v2443_v13 = vmax.f32 %v2411_v8, 0.0 }
 0x1d0   : > { %v2483_v12 = vpack.c.bf16 %v2451_v5, %v2451_v5 }
 0x1d1   : > { %v2475_v43 = vpack.c.bf16 %v2443_v13, %v2443_v13 }
 0x1d2   : > { %2516 = vst.msk [vmem:[%s3981_s3 + $0x68] sm:$0xf] %vm2489_vm15, %v2483_v12  ;;  %v1460_v29 = vpop.f32.mrf.mxu0 }
 0x1d3   : > { %2508 = vst.msk [vmem:[%s3981_s3 + $0x48] sm:$0xf] %vm2489_vm15, %v2475_v43  ;;  %v1661_v28 = vadd.f32 %v1660_v9, %v1460_v29  ;;  %v2380_v46 = vpop.f32.mrf.mxu3  ;;  %v2363_v57 = vpop.f32.mrf.mxu2 }
 0x1d4   : > { %v2420_v63 = vadd.f32 %v2380_v46, %v1681_v3 }
 0x1d5   : > { %v2412_v26 = vadd.f32 %v2360_v24, %v1661_v28  ;;  %v1663_v16 = vpop.f32.mrf.mxu1 }
 0x1d6   : > { %v2452_v48 = vmax.f32 %v2420_v63, 0.0 }
 0x1d7   : > { %v2444_v39 = vmax.f32 %v2412_v26, 0.0 }
 0x1d8   : > { %v2484_v30 = vpack.c.bf16 %v2452_v48, %v2452_v48 }
 0x1d9   : > { %v2476_v11 = vpack.c.bf16 %v2444_v39, %v2444_v39 }
 0x1da   : > { %2517 = vst.msk [vmem:[%s3981_s3 + $0x6c] sm:$0xf] %vm2489_vm15, %v2484_v30  ;;  %v1463_v10 = vpop.f32.mrf.mxu0 }
 0x1db   : > { %2509 = vst.msk [vmem:[%s3981_s3 + $0x4c] sm:$0xf] %vm2489_vm15, %v2476_v11  ;;  %v1664_v42 = vadd.f32 %v1663_v16, %v1463_v10  ;;  %v2383_v36 = vpop.f32.mrf.mxu3  ;;  %v2365_v25 = vpop.f32.mrf.mxu2 }
 0x1dc   : > { %v2421_v27 = vadd.f32 %v2383_v36, %v1684_v21 }
 0x1dd   : > { %v2413_v52 = vadd.f32 %v2363_v57, %v1664_v42  ;;  %v1665_v34 = vpop.f32.mrf.mxu1 }
 0x1de   : > { %v2453_v2 = vmax.f32 %v2421_v27, 0.0 }
 0x1df   : > { %v2445_v38 = vmax.f32 %v2413_v52, 0.0 }
 0x1e0   : > { %v2485_v18 = vpack.c.bf16 %v2453_v2, %v2453_v2 }
 0x1e1   : > { %v2477_v35 = vpack.c.bf16 %v2445_v38, %v2445_v38 }
 0x1e2   : > { %2518 = vst.msk [vmem:[%s3981_s3 + $0x70] sm:$0xf] %vm2489_vm15, %v2485_v18  ;;  %v1465_v49 = vpop.f32.mrf.mxu0 }
 0x1e3   : > { %2510 = vst.msk [vmem:[%s3981_s3 + $0x50] sm:$0xf] %vm2489_vm15, %v2477_v35  ;;  %v1666_v40 = vadd.f32 %v1665_v34, %v1465_v49  ;;  %v2385_v45 = vpop.f32.mrf.mxu3  ;;  %v2368_v14 = vpop.f32.mrf.mxu2 }
 0x1e4   : > { %v2422_v17 = vadd.f32 %v2385_v45, %v1686_v47 }
 0x1e5   : > { %v2414_v41 = vadd.f32 %v2365_v25, %v1666_v40  ;;  %v1668_v1 = vpop.f32.mrf.mxu1 }
 0x1e6   : > { %v2454_v32 = vmax.f32 %v2422_v17, 0.0 }
 0x1e7   : > { %v2446_v33 = vmax.f32 %v2414_v41, 0.0 }
 0x1e8   : > { %v2486_v20 = vpack.c.bf16 %v2454_v32, %v2454_v32 }
 0x1e9   : > { %v2478_v15 = vpack.c.bf16 %v2446_v33, %v2446_v33 }
 0x1ea   : > { %2519 = vst.msk [vmem:[%s3981_s3 + $0x74] sm:$0xf] %vm2489_vm15, %v2486_v20  ;;  %v1468_v0 = vpop.f32.mrf.mxu0 }
 0x1eb   : > { %2511 = vst.msk [vmem:[%s3981_s3 + $0x54] sm:$0xf] %vm2489_vm15, %v2478_v15  ;;  %v1669_v37 = vadd.f32 %v1668_v1, %v1468_v0  ;;  %v2388_v23 = vpop.f32.mrf.mxu3  ;;  %v2370_v6 = vpop.f32.mrf.mxu2 }
 0x1ec   : > { %v2423_v56 = vadd.f32 %v2388_v23, %v1689_v50 }
 0x1ed   : > { %v2415_v31 = vadd.f32 %v2368_v14, %v1669_v37  ;;  %v1670_v7 = vpop.f32.mrf.mxu1 }
 0x1ee   : > { %v2455_v59 = vmax.f32 %v2423_v56, 0.0 }
 0x1ef   : > { %v2447_v55 = vmax.f32 %v2415_v31, 0.0 }
 0x1f0   : > { %v2487_v53 = vpack.c.bf16 %v2455_v59, %v2455_v59 }
 0x1f1   : > { %v2479_v51 = vpack.c.bf16 %v2447_v55, %v2447_v55 }
 0x1f2   : > { %2520 = vst.msk [vmem:[%s3981_s3 + $0x78] sm:$0xf] %vm2489_vm15, %v2487_v53  ;;  %v1470_v58 = vpop.f32.mrf.mxu0 }
 0x1f3   : > { %2512 = vst.msk [vmem:[%s3981_s3 + $0x58] sm:$0xf] %vm2489_vm15, %v2479_v51  ;;  %v1671_v22 = vadd.f32 %v1670_v7, %v1470_v58  ;;  %v2390_v60 = vpop.f32.mrf.mxu3 }
 0x1f4   : > { %v2424_v62 = vadd.f32 %v2390_v60, %v1691_v4 }
 0x1f5   : > { %v2416_v61 = vadd.f32 %v2370_v6, %v1671_v22 }
 0x1f6   : > { %v2456_v24 = vmax.f32 %v2424_v62, 0.0 }
 0x1f7   : > { %v2448_v19 = vmax.f32 %v2416_v61, 0.0 }
 0x1f8   : > { %v2488_v8 = vpack.c.bf16 %v2456_v24, %v2456_v24 }
 0x1f9   : > { %v2480_v9 = vpack.c.bf16 %v2448_v19, %v2448_v19 }
 0x1fa   : > { %2521 = vst.msk [vmem:[%s3981_s3 + $0x7c] sm:$0xf] %vm2489_vm15, %v2488_v8 }
 0x1fb   : > { %2513 = vst.msk [vmem:[%s3981_s3 + $0x5c] sm:$0xf] %vm2489_vm15, %v2480_v9 }
 0x1fc PF: > { %s12_s9 = sadd.s32 1, %s2764_s9  }
 0x1fd   : > { %p9_p4 = scmp.ge.s32.totalorder %s12_s9, 4  }
 0x1ff   :  { %11 = sbr.rel (!%p9_p4) target bundleno = 1 (0x1), region = 60 }

// kernel: tpu_custom_call.1
= control target key start
LH: loop header
LB: loop body
LE: loop exit
PB: predicated region body
PF: predicated region fallthrough
CT: control target
= control target key end

     0   :  { %s2785_s9 = smov 0   ;;  %s4153_s0 = inlined_call_operand.vmem [shape: bf16[2,16,16,8], index: 0, kind: input, shape index: {}]   ;;  %s4154_s1 = inlined_call_operand.vmem [shape: bf16[3,24,8], index: 1, kind: input, shape index: {}]   ;;  %s4155_s2 = inlined_call_operand.vmem [shape: bf16[2,16,16,8], index: 2, kind: output, shape index: {}]  }
   0x1 LB: > { %s2577_s10 = sadd.s32 4294967295, %s2764_s9   ;;  %p2581_p0 = scmp.ge.s32.totalorder %s2764_s9, 1  ;;  %s2764_s9 = sphi %s2785_s9, %s12_s9  }
   0x2   : > { %p112_p1 = scmp.lt.s32.totalorder %s2764_s9, 3 }
   0x4   : > { %p113_p2 = pnand %p2581_p0, %p112_p1 }
   0x5   : > { %s2767_s11 = smov (!%p113_p2), 16   ;;  %s2768_s12 = smov (!%p113_p2), 8  }
   0x6   : > { %116 = sbr.rel (%p113_p2) target bundleno = 508 (0x1fc), region = 28  ;;  %p134_p3 = scmp.lt.s32.totalorder (!%p113_p2), %s2577_s10, 1 }
   0xb   : > { %v275_v0 = vlaneseq  ;;  %v2766_v1 = vmov 0   ;;  %vm2769_vm0 = vmmov 0   ;;  %s4281_s10 = smov (!%p134_p3, %s2577_s10), 1  ;;  %vm1510_vm2 = vcmask 1045504  }
   0xc   : > { %1189 = vrot.lane.b32.xlu1 %v2766_v1, %s2767_s11  ;;  %1145 = vrot.lane.b32.xlu2 %v2766_v1, %s2768_s12  ;;  %vm847_vm1 = vmpackc.low %vm2769_vm0, %vm2769_vm0  ;;  %v2803_v4 = vunpack.c.l.b16 %v2766_v1  ;;  %v2806_v5 = vunpack.c.h.b16 %v2766_v1  ;;  %s2718_s13 = sshll.u32 %s4281_s10, 7  ;;  %vm966_vm8 = vcmask 1041408  }
   0xd   : > { %v2797_v2 = vshrl.u32 %v275_v0, 7  ;;  %v881_v3 = vsel %vm847_vm1, 65537, %v2766_v1  ;;  %s2822_s16 = scalar_lea.vmem %s4153_s0, %s2718_s13  ;;  %s3981_s3 = scalar_lea.vmem %s4155_s2, %s2718_s13 }
   0xe   : > { %v2825_v18 = vld [vmem:[%s2822_s16 + $0x60] sm:$0xff]  ;;  %v2827_v19 = vunpack.c.l.b16 %v881_v3  ;;  %v2983_v36 = vld [vmem:[%s2822_s16 + $0x8] sm:$0xff] }
   0xf   : > { %v301_v6 = vadd.s32 368, %v2797_v2  ;;  %v303_v7 = vadd.s32 384, %v2797_v2  ;;  %v302_v8 = vadd.s32 376, %v2797_v2  ;;  %v304_v9 = vadd.s32 392, %v2797_v2  ;;  %v2955_v25 = vld [vmem:[%s2822_s16] sm:$0xff] }
  0x10   : > { %v277_v10 = vadd.s32 176, %v2797_v2  ;;  %v279_v11 = vadd.s32 192, %v2797_v2  ;;  %v305_v12 = vadd.s32 400, %v2797_v2  ;;  %v281_v13 = vadd.s32 208, %v2797_v2 }
  0x11   : > { %v485_v14 = vand.u32 15, %v301_v6  ;;  %v499_v15 = vand.u32 15, %v303_v7  ;;  %v492_v16 = vand.u32 15, %v302_v8  ;;  %v506_v17 = vand.u32 15, %v304_v9 }
  0x12   : > { %v317_v20 = vand.u32 15, %v277_v10  ;;  %v331_v21 = vand.u32 15, %v279_v11  ;;  %v513_v22 = vand.u32 15, %v305_v12  ;;  %v345_v29 = vand.u32 15, %v281_v13 }
  0x13   : > { %vm1717_vm3 = vcmp.lt.s32.totalorder %v485_v14, 4  ;;  %vm2829_vm4 = vcmp.lt.s32.totalorder %v499_v15, 4  ;;  %vm2833_vm5 = vcmp.ge.s32.totalorder %v492_v16, 12  ;;  %vm2837_vm6 = vcmp.ge.s32.totalorder %v506_v17, 12  ;;  %v2731_v14 = vld [vmem:[%s2822_s16 + $0x58] sm:$0xff] }
  0x14   : > { %1282 = vrot.lane.b32.xlu2 %v2825_v18, %s2768_s12  ;;  %vm1819_vm7 = vmpackc.low %vm1717_vm3, %vm1717_vm3  ;;  %vm2843_vm9 = vcmp.lt.s32.totalorder %v317_v20, 4  ;;  %vm2847_vm10 = vcmp.lt.s32.totalorder %v331_v21, 4  ;;  %vm2851_vm11 = vcmp.lt.s32.totalorder %v513_v22, 4  ;;  %v280_v31 = vadd.s32 200, %v2797_v2 }
  0x15   : > { %vm1821_vm12 = vmpackc.low %vm2829_vm4, %vm2829_vm4  ;;  %v1853_v30 = vsel %vm1819_vm7, 65537, %v2766_v1  ;;  %v282_v32 = vadd.s32 216, %v2797_v2  ;;  %v2862_v33 = vadd.s32 416, %v2797_v2  ;;  %vm2868_vm14 = vcmp.lt.s32.totalorder %v345_v29, 4 }
  0x16   : > { %v1855_v34 = vsel %vm1821_vm12, 65537, %v2766_v1  ;;  %v1887_v35 = vunpack.c.l.b16 %v1853_v30  ;;  %vm870_vm13 = vmpackc.low %vm2833_vm5, %vm2833_vm5  ;;  %v2873_v37 = vadd.s32 408, %v2797_v2  ;;  %v338_v40 = vand.u32 15, %v280_v31 }
  0x17   : > { %v1889_v38 = vunpack.c.l.b16 %v1855_v34  ;;  %vm872_vm15 = vmpackc.low %vm2837_vm6, %vm2837_vm6  ;;  %v904_v39 = vsel %vm870_vm13, 65537, %v2766_v1  ;;  %v352_v41 = vand.u32 15, %v282_v32  ;;  %v527_v45 = vand.u32 15, %v2862_v33  ;;  %v2977_v32 = vld [vmem:[%s2822_s16 + $0x68] sm:$0xff] }
  0x18   : > { %v2880_v42 = vpack.c.b16 %v2827_v19, %v1887_v35  ;;  %v906_v43 = vsel %vm872_vm15, 65537, %v2766_v1  ;;  %v938_v44 = vunpack.c.l.b16 %v904_v39  ;;  %vm1795_vm0 = vmpackc.low %vm2843_vm9, %vm2843_vm9  ;;  %vm2892_vm3 = vcmp.ge.s32.totalorder %v338_v40, 12 }
  0x19   : > { %v1910_v46 = vpack.c.b16 %v2827_v19, %v1889_v38  ;;  %v940_v47 = vunpack.c.l.b16 %v906_v43  ;;  %vm1797_vm1 = vmpackc.low %vm2847_vm10, %vm2847_vm10  ;;  %v1829_v48 = vsel %vm1795_vm0, 65537, %v2766_v1  ;;  %vm2933_vm7 = vcmp.ge.s32.totalorder %v352_v41, 12 }
  0x1a   : > { %v1937_v50 = vrot.slane %v2880_v42, 2  ;;  %v2898_v51 = vpack.c.b16 %v938_v44, %v2827_v19  ;;  %v1831_v52 = vsel %vm1797_vm1, 65537, %v2766_v1  ;;  %v1863_v53 = vunpack.c.l.b16 %v1829_v48  ;;  %vm1823_vm4 = vmpackc.low %vm2851_vm11, %vm2851_vm11 }
  0x1b   : > { %v1939_v54 = vrot.slane %v1910_v46, 2  ;;  %v2905_v55 = vpack.c.b16 %v940_v47, %v2827_v19  ;;  %v1865_v56 = vunpack.c.l.b16 %v1831_v52  ;;  %v1857_v57 = vsel %vm1823_vm4, 65537, %v2766_v1  ;;  %vm1799_vm5 = vmpackc.low %vm2868_vm14, %vm2868_vm14 }
  0x1c   : > { %v988_v58 = vrot.slane %v2898_v51, 6  ;;  %v1897_v59 = vpack.c.b16 %v2827_v19, %v1863_v53  ;;  %v1891_v60 = vunpack.c.l.b16 %v1857_v57  ;;  %v1833_v61 = vsel %vm1799_vm5, 65537, %v2766_v1  ;;  %vm848_vm6 = vmpackc.low %vm2892_vm3, %vm2892_vm3 }
  0x1d   : > { %v1940_v62 = vsel %vm1510_vm2, %v1937_v50, %v1939_v54  ;;  %v990_v63 = vrot.slane %v2905_v55, 6  ;;  %v1898_v0 = vpack.c.b16 %v2827_v19, %v1865_v56  ;;  %v1867_v3 = vunpack.c.l.b16 %v1833_v61  ;;  %vm850_vm11 = vmpackc.low %vm2933_vm7, %vm2933_vm7 }
  0x1e   : > { %v2031_v6 = vunpack.c.l.b16 %v1940_v62  ;;  %v2032_v7 = vunpack.c.h.b16 %v1940_v62  ;;  %v1914_v8 = vrot.slane %v1897_v59, 2  ;;  %v2920_v9 = vpack.c.b16 %v2827_v19, %v1891_v60 }
  0x1f   : > { %v991_v10 = vsel %vm966_vm8, %v988_v58, %v990_v63  ;;  %v1915_v11 = vrot.slane %v1898_v0, 2  ;;  %v2931_v12 = vpack.c.b16 %v2827_v19, %v1867_v3  ;;  %v882_v22 = vsel %vm848_vm6, 65537, %v2766_v1 }
  0x20   : > { %vm2035_vm9 = vcmp.ne.s32.totalorder %v2031_v6, %v2803_v4  ;;  %vm2036_vm10 = vcmp.ne.s32.totalorder %v2032_v7, %v2806_v5  ;;  %v1077_v15 = vunpack.c.l.b16 %v991_v10  ;;  %v1078_v16 = vunpack.c.h.b16 %v991_v10 }
  0x21   : > { %vm2037_vm12 = vmpackc.low %vm2036_vm10, %vm2035_vm9  ;;  %v1916_v17 = vsel %vm1510_vm2, %v1914_v8, %v1915_v11  ;;  %v1941_v20 = vrot.slane %v2920_v9, 2  ;;  %v1917_v21 = vrot.slane %v2931_v12, 2  ;;  %v884_v29 = vsel %vm850_vm11, 65537, %v2766_v1 }
  0x22   : > { %v2948_v23 = vsel %vm2037_vm12, %v2825_v18, 0  ;;  %vm1081_vm13 = vcmp.ne.s32.totalorder %v1077_v15, %v2803_v4  ;;  %vm1082_vm14 = vcmp.ne.s32.totalorder %v1078_v16, %v2806_v5  ;;  %v1947_v24 = vunpack.c.l.b16 %v1916_v17 }
  0x23   : > { %2123 = vrot.lane.b32.xlu1 %v2948_v23, %s2767_s11  ;;  %vm1083_vm15 = vmpackc.low %vm1082_vm14, %vm1081_vm13  ;;  %v1948_v26 = vunpack.c.h.b16 %v1916_v17  ;;  %v1942_v27 = vsel %vm1510_vm2, %v1939_v54, %v1941_v20  ;;  %v1918_v28 = vsel %vm1510_vm2, %v1915_v11, %v1917_v21  ;;  %v916_v40 = vunpack.c.l.b16 %v882_v22 }
  0x24   : > { %v2969_v30 = vsel %vm1083_vm15, %v2731_v14, 0  ;;  %vm2972_vm0 = vcmp.ne.s32.totalorder %v1947_v24, %v2803_v4  ;;  %v2038_v34 = vunpack.c.l.b16 %v1942_v27  ;;  %v2039_v35 = vunpack.c.h.b16 %v1942_v27 }
  0x25   : > { %1179 = vrot.lane.b32.xlu2 %v2969_v30, %s2767_s11  ;;  %vm1952_vm1 = vcmp.ne.s32.totalorder %v1948_v26, %v2806_v5  ;;  %v1954_v38 = vunpack.c.l.b16 %v1918_v28  ;;  %v1955_v39 = vunpack.c.h.b16 %v1918_v28  ;;  %v918_v41 = vunpack.c.l.b16 %v884_v29 }
  0x26   : > { %vm1953_vm3 = vmpackc.low %vm1952_vm1, %vm2972_vm0  ;;  %vm2042_vm4 = vcmp.ne.s32.totalorder %v2038_v34, %v2803_v4  ;;  %vm2043_vm5 = vcmp.ne.s32.totalorder %v2039_v35, %v2806_v5  ;;  %vm2991_vm6 = vcmp.lt.s32.totalorder %v527_v45, 4  ;;  %v949_v46 = vpack.c.b16 %v916_v40, %v2827_v19 }
  0x27   : > { %v2996_v44 = vsel %vm1953_vm3, %v2955_v25, 0  ;;  %vm2044_vm7 = vmpackc.low %vm2043_vm5, %vm2042_vm4  ;;  %vm1958_vm9 = vcmp.ne.s32.totalorder %v1954_v38, %v2803_v4  ;;  %vm1959_vm10 = vcmp.ne.s32.totalorder %v1955_v39, %v2806_v5  ;;  %v3007_v33 = vpack.c.b16 %v918_v41, %v2827_v19 }
  0x28   : > { %2091 = vrot.lane.b32.xlu0 %v2996_v44, %s2768_s12  ;;  %v3004_v47 = vsel %vm2044_vm7, %v2977_v32, 0  ;;  %vm1960_vm11 = vmpackc.low %vm1959_vm10, %vm1958_vm9  ;;  %v520_v45 = vand.u32 15, %v2873_v37  ;;  %v309_v48 = vadd.s32 432, %v2797_v2  ;;  %v967_v52 = vrot.slane %v949_v46, 6  ;;  %v3069_v46 = vld [vmem:[%s2822_s16 + $0x70] sm:$0xff] }
  0x29   : > { %v3012_v49 = vsel %vm1960_vm11, %v2983_v36, 0  ;;  %vm1825_vm12 = vmpackc.low %vm2991_vm6, %vm2991_vm6  ;;  %v308_v53 = vadd.s32 424, %v2797_v2  ;;  %v283_v54 = vadd.s32 224, %v2797_v2  ;;  %v968_v56 = vrot.slane %v3007_v33, 6 }
  0x2a   : > { %v1859_v57 = vsel %vm1825_vm12, 65537, %v2766_v1  ;;  %vm772_vm13 = vcmp.ge.s32.totalorder %v520_v45, 12  ;;  %v541_v37 = vand.u32 15, %v309_v48  ;;  %v310_v62 = vadd.s32 440, %v2797_v2 }
  0x2b   : > { %2125 = vrot.lane.b32.xlu1 %v3004_v47, %s2767_s11  ;;  %v1893_v59 = vunpack.c.l.b16 %v1859_v57  ;;  %vm874_vm14 = vmpackc.low %vm772_vm13, %vm772_vm13  ;;  %v534_v60 = vand.u32 15, %v308_v53  ;;  %v359_v61 = vand.u32 15, %v283_v54  ;;  %v969_v0 = vsel %vm966_vm8, %v967_v52, %v968_v56 }
  0x2c   : > { %v908_v3 = vsel %vm874_vm14, 65537, %v2766_v1  ;;  %vm1725_vm15 = vcmp.lt.s32.totalorder %v541_v37, 4  ;;  %v285_v6 = vadd.s32 240, %v2797_v2  ;;  %v1000_v7 = vunpack.c.l.b16 %v969_v0 }
  0x2d   : > { %1290 = vrot.lane.b32.xlu2 %v2825_v18, %s2767_s11  ;;  %v1001_v8 = vunpack.c.h.b16 %v969_v0  ;;  %v1912_v10 = vpack.c.b16 %v2827_v19, %v1893_v59  ;;  %v942_v11 = vunpack.c.l.b16 %v908_v3  ;;  %vm1827_vm0 = vmpackc.low %vm1725_vm15, %vm1725_vm15  ;;  %vm774_vm1 = vcmp.ge.s32.totalorder %v534_v60, 12 }
  0x2e   : > { %v1861_v13 = vsel %vm1827_vm0, 65537, %v2766_v1  ;;  %vm3033_vm3 = vcmp.lt.s32.totalorder %v359_v61, 4  ;;  %v548_v15 = vand.u32 15, %v310_v62  ;;  %vm1004_vm4 = vcmp.ne.s32.totalorder %v1000_v7, %v2803_v4  ;;  %vm876_vm6 = vmpackc.low %vm774_vm1, %vm774_vm1 }
  0x2f   : > { %vm1005_vm5 = vcmp.ne.s32.totalorder %v1001_v8, %v2806_v5  ;;  %v1943_v16 = vrot.slane %v1912_v10, 2  ;;  %v962_v17 = vpack.c.b16 %v942_v11, %v2827_v19  ;;  %v1895_v22 = vunpack.c.l.b16 %v1861_v13  ;;  %vm1801_vm10 = vmpackc.low %vm3033_vm3, %vm3033_vm3  ;;  %v3120_v11 = vld [vmem:[%s2822_s16 + $0x78] sm:$0xff] }
  0x30   : > { %2093 = vrot.lane.b32.xlu0 %v3012_v49, %s2768_s12  ;;  %vm1006_vm7 = vmpackc.low %vm1005_vm5, %vm1004_vm4  ;;  %v910_v24 = vsel %vm876_vm6, 65537, %v2766_v1  ;;  %vm3043_vm9 = vcmp.ge.s32.totalorder %v548_v15, 12  ;;  %v373_v27 = vand.u32 15, %v285_v6  ;;  %v1835_v40 = vsel %vm1801_vm10, 65537, %v2766_v1 }
  0x31   : > { %v3048_v28 = vsel %vm1006_vm7, %v2955_v25, 0  ;;  %v1944_v29 = vsel %vm1510_vm2, %v1941_v20, %v1943_v16  ;;  %v992_v31 = vrot.slane %v962_v17, 6  ;;  %v944_v34 = vunpack.c.l.b16 %v910_v24  ;;  %vm878_vm11 = vmpackc.low %vm3043_vm9, %vm3043_vm9  ;;  %v3296_v17 = vld [vmem:[%s2822_s16 + $0x20] sm:$0xff] }
  0x32   : > { %v2045_v35 = vunpack.c.l.b16 %v1944_v29  ;;  %v2046_v38 = vunpack.c.h.b16 %v1944_v29  ;;  %v1913_v39 = vpack.c.b16 %v2827_v19, %v1895_v22  ;;  %v1869_v41 = vunpack.c.l.b16 %v1835_v40 }
  0x33   : > { %1258 = vrot.lane.b32.xlu1 %v2955_v25, %s2768_s12  ;;  %v993_v9 = vsel %vm966_vm8, %v990_v63, %v992_v31  ;;  %v963_v20 = vpack.c.b16 %v944_v34, %v2827_v19  ;;  %v912_v43 = vsel %vm878_vm11, 65537, %v2766_v1  ;;  %vm3098_vm1 = vcmp.lt.s32.totalorder %v373_v27, 4  ;;  %v3169_v34 = vld [vmem:[%s2822_s16 + $0x10] sm:$0xff] }
  0x34   : > { %vm3072_vm12 = vcmp.ne.s32.totalorder %v2045_v35, %v2803_v4  ;;  %vm3077_vm13 = vcmp.ne.s32.totalorder %v2046_v38, %v2806_v5  ;;  %v1084_v55 = vunpack.c.l.b16 %v993_v9  ;;  %v1085_v52 = vunpack.c.h.b16 %v993_v9  ;;  %vm1803_vm3 = vmpackc.low %vm3098_vm1, %vm3098_vm1 }
  0x35   : > { %1284 = vrot.lane.b32.xlu2 %v2977_v32, %s2768_s12  ;;  %vm2051_vm14 = vmpackc.low %vm3077_vm13, %vm3072_vm12  ;;  %v1945_v63 = vrot.slane %v1913_v39, 2  ;;  %v994_v53 = vrot.slane %v963_v20, 6  ;;  %v1900_v54 = vpack.c.b16 %v2827_v19, %v1869_v41  ;;  %v946_v57 = vunpack.c.l.b16 %v912_v43 }
  0x36   : > { %vm3089_vm15 = vcmp.ne.s32.totalorder %v1084_v55, %v2803_v4  ;;  %vm3094_vm0 = vcmp.ne.s32.totalorder %v1085_v52, %v2806_v5  ;;  %v3110_v6 = vsel %vm2051_vm14, %v3069_v46, 0  ;;  %v284_v9 = vadd.s32 232, %v2797_v2 }
  0x37   : > { %v1946_v61 = vsel %vm1510_vm2, %v1943_v16, %v1945_v63  ;;  %v995_v62 = vsel %vm966_vm8, %v992_v31, %v994_v53  ;;  %v1919_v0 = vrot.slane %v1900_v54, 2  ;;  %v3105_v3 = vpack.c.b16 %v946_v57, %v2827_v19  ;;  %vm1090_vm4 = vmpackc.low %vm3094_vm0, %vm3089_vm15 }
  0x38   : > { %1147 = vrot.lane.b32.xlu0 %v3048_v28, %s2768_s12  ;;  %v2052_v7 = vunpack.c.l.b16 %v1946_v61  ;;  %v2053_v8 = vunpack.c.h.b16 %v1946_v61  ;;  %v1091_v10 = vunpack.c.l.b16 %v995_v62  ;;  %v1092_v13 = vunpack.c.h.b16 %v995_v62 }
  0x39   : > { %v1920_v14 = vsel %vm1510_vm2, %v1917_v21, %v1919_v0  ;;  %v996_v15 = vrot.slane %v3105_v3, 6  ;;  %v1837_v16 = vsel %vm1803_vm3, 65537, %v2766_v1  ;;  %v3162_v31 = vsel %vm1090_vm4, %v2825_v18, 0 }
  0x3a   : > { %vm3128_vm5 = vcmp.ne.s32.totalorder %v2052_v7, %v2803_v4  ;;  %vm3133_vm6 = vcmp.ne.s32.totalorder %v2053_v8, %v2806_v5  ;;  %vm3138_vm7 = vcmp.ne.s32.totalorder %v1091_v10, %v2803_v4  ;;  %v1961_v21 = vunpack.c.l.b16 %v1920_v14  ;;  %v3224_v10 = vld [vmem:[%s2822_s16 + $0x18] sm:$0xff] }
  0x3b   : > { %2127 = vrot.lane.b32.xlu1 %v3110_v6, %s2767_s11  ;;  %vm2058_vm9 = vmpackc.low %vm3133_vm6, %vm3128_vm5  ;;  %vm3149_vm10 = vcmp.ne.s32.totalorder %v1092_v13, %v2806_v5  ;;  %v1962_v26 = vunpack.c.h.b16 %v1920_v14  ;;  %v997_v27 = vsel %vm966_vm8, %v994_v53, %v996_v15  ;;  %v1871_v29 = vunpack.c.l.b16 %v1837_v16 }
  0x3c   : > { %vm1097_vm11 = vmpackc.low %vm3149_vm10, %vm3138_vm7  ;;  %vm3172_vm12 = vcmp.ne.s32.totalorder %v1961_v21, %v2803_v4  ;;  %v1098_v38 = vunpack.c.l.b16 %v997_v27  ;;  %v1099_v39 = vunpack.c.h.b16 %v997_v27  ;;  %v3179_v18 = vsel %vm2058_vm9, %v3120_v11, 0 }
  0x3d   : > { %1260 = vrot.lane.b32.xlu2 %v2983_v36, %s2768_s12  ;;  %vm1966_vm13 = vcmp.ne.s32.totalorder %v1962_v26, %v2806_v5  ;;  %v3183_v40 = vpack.c.b16 %v2827_v19, %v1871_v29  ;;  %v287_v43 = vadd.s32 256, %v2797_v2  ;;  %v286_v45 = vadd.s32 248, %v2797_v2 }
  0x3e   : > { %vm1967_vm14 = vmpackc.low %vm1966_vm13, %vm3172_vm12  ;;  %vm3189_vm15 = vcmp.ne.s32.totalorder %v1098_v38, %v2803_v4  ;;  %vm3194_vm0 = vcmp.ne.s32.totalorder %v1099_v39, %v2806_v5  ;;  %v3201_v48 = vsel %vm1097_vm11, %v2977_v32, 0  ;;  %v366_v52 = vand.u32 15, %v284_v9 }
  0x3f   : > { %v1921_v55 = vrot.slane %v3183_v40, 2  ;;  %v312_v63 = vadd.s32 456, %v2797_v2  ;;  %v3208_v53 = vsel %vm1967_vm14, %v3169_v34, 0  ;;  %v387_v54 = vand.u32 15, %v287_v43  ;;  %vm1104_vm1 = vmpackc.low %vm3194_vm0, %vm3189_vm15 }
  0x40   : > { %1181 = vrot.lane.b32.xlu0 %v3162_v31, %s2767_s11  ;;  %v380_v57 = vand.u32 15, %v286_v45  ;;  %v288_v37 = vadd.s32 264, %v2797_v2  ;;  %vm750_vm3 = vcmp.ge.s32.totalorder %v366_v52, 12  ;;  %v290_v61 = vadd.s32 280, %v2797_v2 }
  0x41   : > { %v1922_v59 = vsel %vm1510_vm2, %v1919_v0, %v1921_v55  ;;  %v562_v60 = vand.u32 15, %v312_v63  ;;  %vm852_vm4 = vmpackc.low %vm750_vm3, %vm750_vm3  ;;  %vm1703_vm5 = vcmp.lt.s32.totalorder %v387_v54, 4  ;;  %v3260_v35 = vsel %vm1104_vm1, %v3069_v46, 0 }
  0x42   : > { %v1968_v62 = vunpack.c.l.b16 %v1922_v59  ;;  %v1969_v7 = vunpack.c.h.b16 %v1922_v59  ;;  %vm3217_vm6 = vcmp.ge.s32.totalorder %v380_v57, 12  ;;  %v886_v13 = vsel %vm852_vm4, 65537, %v2766_v1  ;;  %vm1805_vm7 = vmpackc.low %vm1703_vm5, %vm1703_vm5 }
  0x43   : > { %1183 = vrot.lane.b32.xlu1 %v3201_v48, %s2767_s11  ;;  %vm3227_vm9 = vcmp.ge.s32.totalorder %v562_v60, 12  ;;  %v394_v14 = vand.u32 15, %v288_v37  ;;  %v408_v16 = vand.u32 15, %v290_v61  ;;  %v920_v22 = vunpack.c.l.b16 %v886_v13  ;;  %vm854_vm12 = vmpackc.low %vm3217_vm6, %vm3217_vm6 }
  0x44   : > { %vm3232_vm10 = vcmp.ne.s32.totalorder %v1968_v62, %v2803_v4  ;;  %vm1973_vm11 = vcmp.ne.s32.totalorder %v1969_v7, %v2806_v5  ;;  %v1839_v12 = vsel %vm1805_vm7, 65537, %v2766_v1  ;;  %v888_v24 = vsel %vm854_vm12, 65537, %v2766_v1  ;;  %vm880_vm4 = vmpackc.low %vm3227_vm9, %vm3227_vm9 }
  0x45   : > { %2129 = vrot.lane.b32.xlu2 %v3179_v18, %s2767_s11  ;;  %vm1974_vm13 = vmpackc.low %vm1973_vm11, %vm3232_vm10  ;;  %v1873_v21 = vunpack.c.l.b16 %v1839_v12  ;;  %vm754_vm14 = vcmp.ge.s32.totalorder %v394_v14, 12  ;;  %vm3246_vm3 = vcmp.ge.s32.totalorder %v408_v16, 12  ;;  %v951_v27 = vpack.c.b16 %v920_v22, %v2827_v19 }
  0x46   : > { %v922_v29 = vunpack.c.l.b16 %v888_v24  ;;  %v3263_v38 = vsel %vm1974_vm13, %v3224_v10, 0  ;;  %v914_v40 = vsel %vm880_vm4, 65537, %v2766_v1  ;;  %vm856_vm5 = vmpackc.low %vm754_vm14, %vm754_vm14  ;;  %v289_v63 = vadd.s32 272, %v2797_v2 }
  0x47   : > { %v3266_v39 = vpack.c.b16 %v2827_v19, %v1873_v21  ;;  %v970_v9 = vrot.slane %v951_v27, 6  ;;  %v948_v43 = vunpack.c.l.b16 %v914_v40  ;;  %v890_v20 = vsel %vm856_vm5, 65537, %v2766_v1  ;;  %vm858_vm15 = vmpackc.low %vm3246_vm3, %vm3246_vm3 }
  0x48   : > { %2095 = vrot.lane.b32.xlu0 %v3208_v53, %s2768_s12  ;;  %v952_v41 = vpack.c.b16 %v922_v29, %v2827_v19  ;;  %v924_v52 = vunpack.c.l.b16 %v890_v20  ;;  %v291_v54 = vadd.s32 288, %v2797_v2  ;;  %v892_v60 = vsel %vm858_vm15, 65537, %v2766_v1 }
  0x49   : > { %v1923_v45 = vrot.slane %v3266_v39, 2  ;;  %v971_v57 = vsel %vm966_vm8, %v968_v56, %v970_v9  ;;  %v965_v59 = vpack.c.b16 %v948_v43, %v2827_v19  ;;  %v401_v12 = vand.u32 15, %v289_v63 }
  0x4a   : > { %v972_v37 = vrot.slane %v952_v41, 6  ;;  %v1007_v61 = vunpack.c.l.b16 %v971_v57  ;;  %v1008_v62 = vunpack.c.h.b16 %v971_v57  ;;  %v953_v8 = vpack.c.b16 %v924_v52, %v2827_v19 }
  0x4b   : > { %2097 = vrot.lane.b32.xlu1 %v3263_v38, %s2768_s12  ;;  %v1924_v7 = vsel %vm1510_vm2, %v1921_v55, %v1923_v45  ;;  %v998_v0 = vrot.slane %v965_v59, 6  ;;  %v926_v27 = vunpack.c.l.b16 %v892_v60  ;;  %v415_v40 = vand.u32 15, %v291_v54  ;;  %v2652_v60 = vld [vmem:[%s4154_s1 + $0x14] sm:$0xf] }
  0x4c   : > { %v1975_v33 = vunpack.c.l.b16 %v1924_v7  ;;  %v1976_v13 = vunpack.c.h.b16 %v1924_v7  ;;  %v973_v56 = vsel %vm966_vm8, %v970_v9, %v972_v37  ;;  %vm1011_vm0 = vcmp.ne.s32.totalorder %v1007_v61, %v2803_v4 }
  0x4d   : > { %1185 = vrot.lane.b32.xlu2 %v3260_v35, %s2767_s11  ;;  %vm1012_vm1 = vcmp.ne.s32.totalorder %v1008_v62, %v2806_v5  ;;  %v1014_v14 = vunpack.c.l.b16 %v973_v56  ;;  %v1015_v16 = vunpack.c.h.b16 %v973_v56  ;;  %v999_v22 = vsel %vm966_vm8, %v996_v15, %v998_v0 }
  0x4e   : > { %vm1013_vm6 = vmpackc.low %vm1012_vm1, %vm1011_vm0  ;;  %vm3299_vm7 = vcmp.ne.s32.totalorder %v1975_v33, %v2803_v4  ;;  %vm1980_vm9 = vcmp.ne.s32.totalorder %v1976_v13, %v2806_v5  ;;  %v974_v24 = vrot.slane %v953_v8, 6  ;;  %v1105_v26 = vunpack.c.l.b16 %v999_v22 }
  0x4f   : > { %v3308_v21 = vsel %vm1013_vm6, %v2983_v36, 0  ;;  %vm1981_vm10 = vmpackc.low %vm1980_vm9, %vm3299_vm7  ;;  %vm1018_vm11 = vcmp.ne.s32.totalorder %v1014_v14, %v2803_v4  ;;  %vm1019_vm12 = vcmp.ne.s32.totalorder %v1015_v16, %v2806_v5  ;;  %v1106_v3 = vunpack.c.h.b16 %v999_v22 }
  0x50   : > { %1149 = vrot.lane.b32.xlu0 %v3308_v21, %s2768_s12  ;;  %vm1020_vm13 = vmpackc.low %vm1019_vm12, %vm1018_vm11  ;;  %v3320_v29 = vsel %vm1981_vm10, %v3296_v17, 0  ;;  %v975_v9 = vsel %vm966_vm8, %v972_v37, %v974_v24  ;;  %vm1705_vm14 = vcmp.lt.s32.totalorder %v401_v12, 4  ;;  %vm3326_vm3 = vcmp.ne.s32.totalorder %v1105_v26, %v2803_v4 }
  0x51   : > { %v3317_v15 = vsel %vm1020_vm13, %v3169_v34, 0  ;;  %vm3331_vm4 = vcmp.ne.s32.totalorder %v1106_v3, %v2806_v5  ;;  %v3336_v20 = vpack.c.b16 %v926_v27, %v2827_v19  ;;  %vm1707_vm5 = vcmp.lt.s32.totalorder %v415_v40, 4  ;;  %vm1807_vm15 = vmpackc.low %vm1705_vm14, %vm1705_vm14 }
  0x52   : > { %v1021_v52 = vunpack.c.l.b16 %v975_v9  ;;  %v1022_v63 = vunpack.c.h.b16 %v975_v9  ;;  %vm1809_vm0 = vmpackc.low %vm1707_vm5, %vm1707_vm5  ;;  %v1841_v54 = vsel %vm1807_vm15, 65537, %v2766_v1  ;;  %v1363_v62 = vunpack.c.l.b16 %v2652_v60  ;;  %v2737_v9 = vld [vmem:[%s4154_s1 + $0xc] sm:$0xff] }
  0x53   : > { %1151 = vrot.lane.b32.xlu1 %v3317_v15, %s2768_s12  ;;  %vm1111_vm1 = vmpackc.low %vm3331_vm4, %vm3326_vm3  ;;  %v1843_v57 = vsel %vm1809_vm0, 65537, %v2766_v1  ;;  %v1875_v37 = vunpack.c.l.b16 %v1841_v54  ;;  %v976_v59 = vrot.slane %v3336_v20, 6  ;;  %vm1400_vm9 = vcmask 1043456  }
  0x54   : > { %v1877_v61 = vunpack.c.l.b16 %v1843_v57  ;;  %v3353_v7 = vsel %vm1111_vm1, %v3120_v11, 0  ;;  %vm3356_vm6 = vcmp.ne.s32.totalorder %v1021_v52, %v2803_v4  ;;  %vm3361_vm7 = vcmp.ne.s32.totalorder %v1022_v63, %v2806_v5 }
  0x55   : > { %2099 = vrot.lane.b32.xlu2 %v3320_v29, %s2768_s12  ;;  %v1365_v13 = vpack.c.b16 %v1363_v62, %v1363_v62  ;;  %v977_v56 = vsel %vm966_vm8, %v974_v24, %v976_v59  ;;  %vm1027_vm10 = vmpackc.low %vm3361_vm7, %vm3356_vm6  ;;  %v294_v16 = vadd.s32 312, %v2797_v2  ;;  %v296_v55 = vadd.s32 328, %v2797_v2 }
  0x56   : > { %v3378_v0 = vpack.c.b16 %v2827_v19, %v1877_v61  ;;  %v292_v22 = vadd.s32 296, %v2797_v2  ;;  %v1028_v12 = vunpack.c.l.b16 %v977_v56  ;;  %v1029_v24 = vunpack.c.h.b16 %v977_v56 }
  0x57   : > { %v1402_v14 = vsel %vm1400_vm9, %v1365_v13, 0  ;;  %v3387_v3 = vsel %vm1027_vm10, %v3224_v10, 0  ;;  %v436_v27 = vand.u32 15, %v294_v16  ;;  %v450_v41 = vand.u32 15, %v296_v55 }
  0x58   : > { %1292 = vrot.lane.b32.xlu0 %v2977_v32, %s2767_s11  ;;  %v1903_v32 = vpack.c.b16 %v2827_v19, %v1875_v37  ;;  %2739 = vmatpush.bf16.msra.mxu3 %v1402_v14  ;;  %v1927_v40 = vrot.slane %v3378_v0, 2  ;;  %v422_v43 = vand.u32 15, %v292_v22  ;;  %vm3396_vm11 = vcmp.ne.s32.totalorder %v1028_v12, %v2803_v4  ;;  %v3726_v0 = vld [vmem:[%s2822_s16 + $0x48] sm:$0xff] }
  0x59   : > { %1410 = vmatpush.bf16.msra.mxu0 %v1402_v14  ;;  %vm3401_vm12 = vcmp.ne.s32.totalorder %v1029_v24, %v2806_v5  ;;  %vm3408_vm13 = vcmp.ge.s32.totalorder %v436_v27, 12  ;;  %vm1191_vm14 = vcmask 64512   ;;  %vm3417_vm3 = vcmp.ge.s32.totalorder %v450_v41, 12  ;;  %v3488_v41 = vld [vmem:[%s2822_s16 + $0x30] sm:$0xff] }
  0x5a   : > { %v1925_v26 = vrot.slane %v1903_v32, 2  ;;  %v293_v39 = vadd.s32 304, %v2797_v2  ;;  %vm1034_vm4 = vmpackc.low %vm3401_vm12, %vm3396_vm11  ;;  %vm3428_vm5 = vcmp.ge.s32.totalorder %v422_v43, 12  ;;  %v295_v62 = vadd.s32 320, %v2797_v2 }
  0x5b   : > { %1294 = vrot.lane.b32.xlu1 %v3069_v46, %s2767_s11  ;;  %vm862_vm15 = vmpackc.low %vm3408_vm13, %vm3408_vm13  ;;  %v1116_v13 = vsel %vm1034_vm4, %v3296_v17, 0  ;;  %v298_v56 = vadd.s32 344, %v2797_v2 }
  0x5c   : > { %v1926_v63 = vsel %vm1510_vm2, %v1923_v45, %v1925_v26  ;;  %2740 = vmatpush.bf16.msra.mxu3 %v2737_v9  ;;  %v1928_v57 = vsel %vm1510_vm2, %v1925_v26, %v1927_v40  ;;  %vm864_vm0 = vmpackc.low %vm3417_vm3, %vm3417_vm3  ;;  %v443_v16 = vand.u32 15, %v295_v62  ;;  %v896_v55 = vsel %vm862_vm15, 65537, %v2766_v1  ;;  %v3475_v26 = vld [vmem:[%s2822_s16 + $0x28] sm:$0xff] }
  0x5d   : > { %1187 = vrot.lane.b32.xlu2 %v3353_v7, %s2767_s11  ;;  %1411 = vmatpush.bf16.msra.mxu0 %v2737_v9  ;;  %v1982_v60 = vunpack.c.l.b16 %v1926_v63  ;;  %v1989_v33 = vunpack.c.l.b16 %v1928_v57  ;;  %v1990_v32 = vunpack.c.h.b16 %v1928_v57  ;;  %vm860_vm1 = vmpackc.low %vm3428_vm5, %vm3428_vm5  ;;  %v898_v22 = vsel %vm864_vm0, 65537, %v2766_v1 }
  0x5e   : > { %v894_v27 = vsel %vm860_vm1, 65537, %v2766_v1  ;;  %v930_v43 = vunpack.c.l.b16 %v896_v55  ;;  %v932_v52 = vunpack.c.l.b16 %v898_v22  ;;  %vm3490_vm3 = vcmp.lt.s32.totalorder %v443_v16, 4 }
  0x5f   : > { %vm3451_vm6 = vcmp.ne.s32.totalorder %v1982_v60, %v2803_v4  ;;  %vm3465_vm10 = vcmp.ne.s32.totalorder %v1989_v33, %v2803_v4  ;;  %vm3470_vm11 = vcmp.ne.s32.totalorder %v1990_v32, %v2806_v5  ;;  %vm1813_vm15 = vmpackc.low %vm3490_vm3, %vm3490_vm3  ;;  %v297_v57 = vadd.s32 336, %v2797_v2 }
  0x60   : > { %1286 = vrot.lane.b32.xlu0 %v3069_v46, %s2768_s12  ;;  %vm1995_vm4 = vmpackc.low %vm3470_vm11, %vm3465_vm10  ;;  %v3511_v60 = vpack.c.b16 %v932_v52, %v2827_v19  ;;  %v1847_v62 = vsel %vm1813_vm15, 65537, %v2766_v1  ;;  %v300_v22 = vadd.s32 360, %v2797_v2  ;;  %v464_v24 = vand.u32 15, %v298_v56  ;;  %v2695_v52 = vld [vmem:[%s4154_s1 + $0x20] sm:$0xf] }
  0x61   : > { %v2065_v37 = vsel %vm1995_vm4, %v3488_v41, 0  ;;  %v1881_v55 = vunpack.c.l.b16 %v1847_v62 }
  0x62   : > { %vm3553_vm10 = vcmp.ge.s32.totalorder %v464_v24, 12 }
  0x63   : > { %1153 = vrot.lane.b32.xlu1 %v3387_v3, %s2768_s12 }
  0x65   : > { %1169 = vrot.lane.b32.xlu2 %v2969_v30, %s2768_s12  ;;  %v1983_v30 = vunpack.c.h.b16 %v1926_v63  ;;  %v928_v63 = vunpack.c.l.b16 %v894_v27 }
  0x66   : > { %v3426_v45 = vpop.permute.xlu2 %1145 }
  0x67   : > { %v3436_v8 = vsel %vm1191_vm14, %v3320_v29, %v3426_v45  ;;  %v429_v29 = vand.u32 15, %v293_v39  ;;  %vm3456_vm7 = vcmp.ne.s32.totalorder %v1983_v30, %v2806_v5  ;;  %v956_v39 = vpack.c.b16 %v930_v43, %v2827_v19 }
  0x68   : > { %1262 = vrot.lane.b32.xlu0 %v3169_v34, %s2768_s12  ;;  %vm1988_vm12 = vmpackc.low %vm3456_vm7, %vm3451_vm6  ;;  %v457_v30 = vand.u32 15, %v297_v57  ;;  %vm1231_vm6 = vcmask 130048   ;;  %v3538_v43 = vpack.c.b16 %v2827_v19, %v1881_v55  ;;  %v478_v57 = vand.u32 15, %v300_v22 }
  0x69   : > { %vm3483_vm13 = vcmp.lt.s32.totalorder %v429_v29, 4  ;;  %v2064_v54 = vsel %vm1988_vm12, %v3475_v26, 0  ;;  %v980_v32 = vrot.slane %v956_v39, 6  ;;  %v982_v29 = vrot.slane %v3511_v60, 6  ;;  %vm866_vm12 = vmpackc.low %vm3553_vm10, %vm3553_vm10 }
  0x6a   : > { %vm1811_vm5 = vmpackc.low %vm3483_vm13, %vm3483_vm13  ;;  %vm3519_vm0 = vcmp.lt.s32.totalorder %v457_v30, 4  ;;  %vm1367_vm7 = vcmask 195584   ;;  %vm3568_vm11 = vcmp.ge.s32.totalorder %v478_v57, 12 }
  0x6b   : > { %1296 = vrot.lane.b32.xlu1 %v3120_v11, %s2767_s11  ;;  %v1845_v61 = vsel %vm1811_vm5, 65537, %v2766_v1  ;;  %vm1815_vm1 = vmpackc.low %vm3519_vm0, %vm3519_vm0  ;;  %v983_v12 = vsel %vm966_vm8, %v980_v32, %v982_v29 }
  0x6c   : > { %v1879_v16 = vunpack.c.l.b16 %v1845_v61  ;;  %vm868_vm15 = vmpackc.low %vm3568_vm11, %vm3568_vm11 }
  0x6d   : > { %1155 = vrot.lane.b32.xlu2 %v1116_v13, %s2768_s12  ;;  %v1931_v13 = vrot.slane %v3538_v43, 2  ;;  %v900_v43 = vsel %vm866_vm12, 65537, %v2766_v1  ;;  %v902_v57 = vsel %vm868_vm15, 65537, %v2766_v1 }
  0x6e   : > { %v1283_v33 = vpop.permute.xlu2 %1282  ;;  %v1905_v9 = vpack.c.b16 %v2827_v19, %v1879_v16  ;;  %v2728_v16 = vld [vmem:[%s2822_s16 + $0x40] sm:$0xff] }
  0x6f   : > { %v1324_v46 = vsel %vm1191_vm14, %v2955_v25, %v1283_v33 }
  0x70   : > { %1288 = vrot.lane.b32.xlu0 %v3120_v11, %s2768_s12  ;;  %v955_v11 = vpack.c.b16 %v928_v63, %v2827_v19  ;;  %v1849_v63 = vsel %vm1815_vm1, 65537, %v2766_v1 }
  0x71   : > { %v1883_v20 = vunpack.c.l.b16 %v1849_v63 }
  0x72   : > { %v978_v14 = vrot.slane %v955_v11, 6 }
  0x73   : > { %2101 = vrot.lane.b32.xlu1 %v2064_v54, %s2768_s12  ;;  %v2249_v54 = vunpack.c.l.b16 %v2695_v52  ;;  %v3614_v52 = vld [vmem:[%s2822_s16 + $0x38] sm:$0xff] }
  0x74   : > { %v981_v27 = vsel %vm966_vm8, %v978_v14, %v980_v32  ;;  %v979_v39 = vsel %vm966_vm8, %v976_v59, %v978_v14  ;;  %v1929_v32 = vrot.slane %v1905_v9, 2  ;;  %v3605_v9 = vld [vmem:[%s4154_s1 + $0x18] sm:$0xff] }
  0x75   : > { %2103 = vrot.lane.b32.xlu2 %v2065_v37, %s2768_s12  ;;  %v1050_v37 = vunpack.c.h.b16 %v983_v12  ;;  %v1042_v30 = vunpack.c.l.b16 %v981_v27  ;;  %v1043_v61 = vunpack.c.h.b16 %v981_v27  ;;  %v2251_v62 = vpack.c.b16 %v2249_v54, %v2249_v54 }
  0x76   : > { %v1035_v14 = vunpack.c.l.b16 %v979_v39  ;;  %v1036_v55 = vunpack.c.h.b16 %v979_v39  ;;  %v1932_v24 = vsel %vm1510_vm2, %v1929_v32, %v1931_v13  ;;  %v3600_v27 = vpack.c.b16 %v2827_v19, %v1883_v20 }
  0x77   : > { %v3566_v59 = vsel %vm1400_vm9, %v2251_v62, 0  ;;  %vm3577_vm13 = vcmp.ne.s32.totalorder %v1042_v30, %v2803_v4  ;;  %vm3582_vm3 = vcmp.ne.s32.totalorder %v1043_v61, %v2806_v5  ;;  %vm3594_vm5 = vcmp.ne.s32.totalorder %v1050_v37, %v2806_v5 }
  0x78   : > { %1264 = vrot.lane.b32.xlu0 %v3224_v10, %s2768_s12  ;;  %2310 = vmatpush.bf16.msra.mxu2 %v3566_v59  ;;  %vm1048_vm0 = vmpackc.low %vm3582_vm3, %vm3577_vm13  ;;  %vm3621_vm1 = vcmp.ne.s32.totalorder %v1035_v14, %v2803_v4  ;;  %v2003_v63 = vunpack.c.l.b16 %v1932_v24  ;;  %v2004_v54 = vunpack.c.h.b16 %v1932_v24  ;;  %vm3635_vm11 = vcmp.ne.s32.totalorder %v1036_v55, %v2806_v5 }
  0x79   : > { %v1930_v30 = vsel %vm1510_vm2, %v1927_v40, %v1929_v32  ;;  %v1933_v61 = vrot.slane %v3600_v27, 2  ;;  %v934_v62 = vunpack.c.l.b16 %v900_v43  ;;  %vm1041_vm12 = vmpackc.low %vm3635_vm11, %vm3621_vm1 }
  0x7a   : > { %vm3652_vm13 = vcmp.ne.s32.totalorder %v2003_v63, %v2803_v4  ;;  %vm3657_vm3 = vcmp.ne.s32.totalorder %v2004_v54, %v2806_v5  ;;  %v1997_v20 = vunpack.c.h.b16 %v1930_v30  ;;  %v1117_v55 = vsel %vm1041_vm12, %v3475_v26, 0 }
  0x7b   : > { %1173 = vrot.lane.b32.xlu1 %v3201_v48, %s2768_s12  ;;  %v1049_v48 = vunpack.c.l.b16 %v983_v12  ;;  %v1934_v56 = vsel %vm1510_vm2, %v1931_v13, %v1933_v61  ;;  %v958_v14 = vpack.c.b16 %v934_v62, %v2827_v19 }
  0x7c   : > { %2311 = vmatpush.bf16.msra.mxu2 %v3605_v9  ;;  %v2010_v24 = vunpack.c.l.b16 %v1934_v56  ;;  %v2011_v43 = vunpack.c.h.b16 %v1934_v56 }
  0x7d   : > { %1175 = vrot.lane.b32.xlu2 %v3260_v35, %s2768_s12  ;;  %vm3589_vm4 = vcmp.ne.s32.totalorder %v1049_v48, %v2803_v4  ;;  %v299_v48 = vadd.s32 352, %v2797_v2  ;;  %v1118_v2 = vsel %vm1048_vm0, %v3488_v41, 0  ;;  %vm3689_vm0 = vcmp.ne.s32.totalorder %v1997_v20, %v2806_v5 }
  0x7e   : > { %v3551_v11 = vpop.permute.xlu1 %1189  ;;  %vm1055_vm10 = vmpackc.low %vm3594_vm5, %vm3589_vm4  ;;  %v984_v54 = vrot.slane %v958_v14, 6  ;;  %vm3714_vm11 = vcmp.ne.s32.totalorder %v2011_v43, %v2806_v5 }
  0x7f   : > { %v3557_v33 = vpop.permute.xlu2 %1179  ;;  %v1350_v35 = vsel %vm1231_vm6, %v1324_v46, %v3551_v11  ;;  %v1119_v25 = vsel %vm1055_vm10, %v3614_v52, 0  ;;  %v471_v32 = vand.u32 15, %v299_v48  ;;  %vm2009_vm4 = vmpackc.low %vm3657_vm3, %vm3652_vm13  ;;  %vm3709_vm10 = vcmp.ne.s32.totalorder %v2010_v24, %v2803_v4 }
  0x80   : > { %1171 = vrot.lane.b32.xlu0 %v3162_v31, %s2768_s12  ;;  %2669 = vmatmul.msk.bf16.vlgmr.msra.gmra.mxu3 %vm1367_vm7, %v1350_v35  ;;  %v936_v35 = vunpack.c.l.b16 %v902_v57  ;;  %v2067_v39 = vsel %vm2009_vm4, %v2728_v16, 0  ;;  %vm2016_vm12 = vmpackc.low %vm3714_vm11, %vm3709_vm10 }
  0x81   : > { %vm3679_vm5 = vcmp.lt.s32.totalorder %v471_v32, 4 }
  0x82   : > { %v3677_v22 = vpack.c.b16 %v936_v35, %v2827_v19  ;;  %vm1817_vm1 = vmpackc.low %vm3679_vm5, %vm3679_vm5  ;;  %v985_v35 = vsel %vm966_vm8, %v982_v29, %v984_v54 }
  0x83   : > { %1268 = vrot.lane.b32.xlu1 %v3475_v26, %s2768_s12  ;;  %v1851_v40 = vsel %vm1817_vm1, 65537, %v2766_v1  ;;  %v1056_v29 = vunpack.c.l.b16 %v985_v35  ;;  %v1057_v32 = vunpack.c.h.b16 %v985_v35  ;;  %v2068_v1 = vsel %vm2016_vm12, %v3726_v0, 0  ;;  %v2730_v35 = vld [vmem:[%s2822_s16 + $0x50] sm:$0xff] }
  0x84   : > { %v986_v62 = vrot.slane %v3677_v22, 6  ;;  %v1885_v20 = vunpack.c.l.b16 %v1851_v40 }
  0x85   : > { %1270 = vrot.lane.b32.xlu2 %v3488_v41, %s2768_s12  ;;  %v1257_v41 = vld [vmem:[%s4154_s1 + $0x8] sm:$0xf]  ;;  %vm1060_vm13 = vcmp.ne.s32.totalorder %v1056_v29, %v2803_v4  ;;  %vm1061_vm3 = vcmp.ne.s32.totalorder %v1057_v32, %v2806_v5 }
  0x86   : > { %v1549_v31 = vunpack.c.l.b16 %v1257_v41  ;;  %v987_v60 = vsel %vm966_vm8, %v984_v54, %v986_v62 }
  0x87   : > { %v3632_v37 = vpop.permute.xlu2 %1290  ;;  %v1064_v56 = vunpack.c.h.b16 %v987_v60 }
  0x88   : > { %1266 = vrot.lane.b32.xlu0 %v3296_v17, %s2768_s12  ;;  %v1996_v17 = vunpack.c.l.b16 %v1930_v30  ;;  %v1551_v12 = vpack.c.b16 %v1549_v31, %v1549_v31  ;;  %v1908_v31 = vpack.c.b16 %v2827_v19, %v1885_v20  ;;  %v989_v20 = vsel %vm966_vm8, %v986_v62, %v988_v58 }
  0x89   : > { %vm1068_vm5 = vcmp.ne.s32.totalorder %v1064_v56, %v2806_v5  ;;  %v1070_v56 = vunpack.c.l.b16 %v989_v20 }
  0x8a   : > { %vm3684_vm15 = vcmp.ne.s32.totalorder %v1996_v17, %v2803_v4  ;;  %v1602_v57 = vsel %vm1400_vm9, %v1551_v12, 0  ;;  %v1935_v12 = vrot.slane %v1908_v31, 2 }
  0x8b   : > { %1159 = vrot.lane.b32.xlu1 %v1118_v2, %s2768_s12  ;;  %1610 = vmatpush.bf16.msra.mxu1 %v1602_v57  ;;  %vm2002_vm9 = vmpackc.low %vm3689_vm0, %vm3684_vm15 }
  0x8c   : > { %2741 = vmatpush.bf16.msrb.mxu3 %v1602_v57  ;;  %v2066_v17 = vsel %vm2002_vm9, %v3614_v52, 0  ;;  %vm1062_vm15 = vmpackc.low %vm1061_vm3, %vm1060_vm13  ;;  %v1936_v42 = vsel %vm1510_vm2, %v1933_v61, %v1935_v12  ;;  %vm1074_vm3 = vcmp.ne.s32.totalorder %v1070_v56, %v2803_v4 }
  0x8d   : > { %1161 = vrot.lane.b32.xlu2 %v1119_v25, %s2768_s12  ;;  %v2736_v25 = vld [vmem:[%s4154_s1] sm:$0xff]  ;;  %v1120_v24 = vsel %vm1062_vm15, %v2728_v16, 0  ;;  %vm2489_vm15 = vcmask 60416  }
  0x8f   : > { %v1285_v46 = vpop.permute.xlu2 %1284  ;;  %1611 = vmatpush.bf16.msra.mxu1 %v2736_v25 }
  0x90   : > { %1157 = vrot.lane.b32.xlu0 %v1117_v55, %s2768_s12  ;;  %v1327_v48 = vsel %vm1191_vm14, %v2983_v36, %v1285_v46  ;;  %2742 = vmatpush.bf16.msrb.mxu3 %v2736_v25  ;;  %v1938_v46 = vsel %vm1510_vm2, %v1935_v12, %v1937_v50  ;;  %v2018_v36 = vunpack.c.h.b16 %v1936_v42 }
  0x91   : > { %v1351_v30 = vsel %vm1231_vm6, %v1327_v48, %v3551_v11  ;;  %v2024_v57 = vunpack.c.l.b16 %v1938_v46  ;;  %v2025_v48 = vunpack.c.h.b16 %v1938_v46 }
  0x92   : > { %2670 = vmatmul.msk.bf16.gmra.mxu3 %vm1367_vm7, %v1351_v30  ;;  %vm2022_vm12 = vcmp.ne.s32.totalorder %v2018_v36, %v2806_v5 }
  0x93   : > { %2107 = vrot.lane.b32.xlu1 %v2067_v39, %s2768_s12  ;;  %vm2028_vm1 = vcmp.ne.s32.totalorder %v2024_v57, %v2803_v4  ;;  %vm2029_vm9 = vcmp.ne.s32.totalorder %v2025_v48, %v2806_v5 }
  0x94   : > { %2743 = vmatpush.bf16.msra.mxu3 %v3566_v59  ;;  %vm2030_vm10 = vmpackc.low %vm2029_vm9, %vm2028_vm1 }
  0x95   : > { %2115 = vrot.lane.b32.xlu2 %v2948_v23, %s2768_s12  ;;  %v2124_v41 = vpop.permute.xlu1 %2123  ;;  %v1063_v23 = vunpack.c.l.b16 %v987_v60 }
  0x97   : > { %vm1067_vm4 = vcmp.ne.s32.totalorder %v1063_v23, %v2803_v4  ;;  %v1261_v61 = vpop.permute.xlu2 %1260 }
  0x98   : > { %2105 = vrot.lane.b32.xlu0 %v2066_v17, %s2768_s12  ;;  %2744 = vmatpush.bf16.msra.mxu3 %v3605_v9  ;;  %vm1069_vm0 = vmpackc.low %vm1068_vm5, %vm1067_vm4 }
  0x99   : > { %v1121_v9 = vsel %vm1069_vm0, %v3726_v0, 0 }
  0x9a   : > { %v2092_v14 = vpop.permute.xlu0 %2091 }
  0x9b   : > { %2109 = vrot.lane.b32.xlu1 %v2068_v1, %s2768_s12  ;;  %v2132_v55 = vsel %vm1191_vm14, 0, %v2092_v14  ;;  %v1071_v14 = vunpack.c.h.b16 %v989_v20 }
  0x9c   : > { %v2170_v19 = vsel %vm1231_vm6, %v2132_v55, %v2124_v41 }
  0x9d   : > { %1274 = vrot.lane.b32.xlu2 %v2728_v16, %s2768_s12  ;;  %v2126_v59 = vpop.permute.xlu1 %2125  ;;  %v2211_v26 = vrot.slane %v2170_v19, 6  ;;  %vm1075_vm4 = vcmp.ne.s32.totalorder %v1071_v14, %v2806_v5 }
  0x9e   : > { %vm1076_vm5 = vmpackc.low %vm1075_vm4, %vm1074_vm3 }
  0xa0   : > { %1177 = vrot.lane.b32.xlu0 %v3353_v7, %s2768_s12 }
  0xa2   : > { %v2094_v43 = vpop.permute.xlu0 %2093 }
  0xa3   : > { %v2134_v13 = vsel %vm1191_vm14, 0, %v2094_v43  ;;  %1163 = vrot.lane.b32.xlu1 %v1120_v24, %s2768_s12  ;;  %v1122_v43 = vsel %vm1076_vm5, %v2730_v35, 0 }
  0xa4   : > { %v2172_v63 = vsel %vm1231_vm6, %v2134_v13, %v2126_v59 }
  0xa5   : > { %v2212_v54 = vrot.slane %v2172_v63, 6  ;;  %1165 = vrot.lane.b32.xlu2 %v1121_v9, %s2768_s12  ;;  %v1259_v7 = vpop.permute.xlu1 %1258 }
  0xa6   : > { %v1299_v16 = vsel %vm1191_vm14, 0, %v1259_v7 }
  0xa7   : > { %v2213_v39 = vsel %vm966_vm8, %v2211_v26, %v2212_v54  ;;  %v1335_v30 = vsel %vm1231_vm6, %v1299_v16, %v3632_v37  ;;  %v2017_v37 = vunpack.c.l.b16 %v1936_v42 }
  0xa8   : > { %2700 = vmatmul.msk.bf16.vlgmr.msra.gmra.mxu2 %vm1367_vm7, %v2213_v39  ;;  %1272 = vrot.lane.b32.xlu0 %v3614_v52, %s2768_s12  ;;  %v1194_v52 = vsel %vm1191_vm14, 0, %v3426_v45 }
  0xa9   : > { %2657 = vmatmul.msk.bf16.vlgmr.msra.gmra.mxu0 %vm1367_vm7, %v1335_v30  ;;  %vm3782_vm11 = vcmp.ne.s32.totalorder %v2017_v37, %v2803_v4 }
  0xaa   : > { %v1148_v50 = vpop.permute.xlu0 %1147  ;;  %vm2023_vm13 = vmpackc.low %vm2022_vm12, %vm3782_vm11 }
  0xab   : > { %2119 = vrot.lane.b32.xlu1 %v3110_v6, %s2768_s12  ;;  %v2757_v6 = vld [vmem:[%s2822_s16 + $0x58] sm:$0xff]  ;;  %v1196_v40 = vsel %vm1191_vm14, 0, %v1148_v50 }
  0xac   : > { %v2070_v25 = vsel %vm2030_vm10, %v2757_v6, 0 }
  0xad   : > { %2121 = vrot.lane.b32.xlu2 %v3179_v18, %s2768_s12  ;;  %v2128_v27 = vpop.permute.xlu1 %2127  ;;  %v1233_v18 = vsel %vm1231_vm6, %v1194_v52, %v3557_v33  ;;  %v2130_v33 = vpop.permute.xlu2 %2129 }
  0xae   : > { %v1511_v41 = vrot.slane %v1233_v18, 2 }
  0xb0   : > { %2117 = vrot.lane.b32.xlu0 %v3004_v47, %s2768_s12  ;;  %v2069_v47 = vsel %vm2023_vm13, %v2730_v35, 0 }
  0xb2   : > { %v1182_v45 = vpop.permute.xlu0 %1181 }
  0xb3   : > { %v1235_v17 = vsel %vm1231_vm6, %v1196_v40, %v1182_v45  ;;  %2113 = vrot.lane.b32.xlu1 %v2070_v25, %s2768_s12 }
  0xb4   : > { %v1512_v60 = vrot.slane %v1235_v17, 2 }
  0xb5   : > { %1280 = vrot.lane.b32.xlu2 %v2757_v6, %s2768_s12  ;;  %v1184_v29 = vpop.permute.xlu1 %1183  ;;  %v1186_v51 = vpop.permute.xlu2 %1185 }
  0xb6   : > { %v1513_v32 = vsel %vm1510_vm2, %v1511_v41, %v1512_v60 }
  0xb7   : > { %2677 = vmatmul.msk.bf16.vlgmr.msra.gmra.mxu1 %vm1367_vm7, %v1513_v32 }
  0xb8   : > { %2111 = vrot.lane.b32.xlu0 %v2069_v47, %s2768_s12 }
  0xba   : > { %v2096_v1 = vpop.permute.xlu0 %2095 }
  0xbb   : > { %v2136_v23 = vsel %vm1191_vm14, 0, %v2096_v1  ;;  %1278 = vrot.lane.b32.xlu1 %v2730_v35, %s2768_s12 }
  0xbc   : > { %v2174_v31 = vsel %vm1231_vm6, %v2136_v23, %v2128_v27 }
  0xbd   : > { %v2214_v59 = vrot.slane %v2174_v31, 6  ;;  %v2098_v55 = vpop.permute.xlu1 %2097  ;;  %v2100_v26 = vpop.permute.xlu2 %2099 }
  0xbe   : > { %v2138_v24 = vsel %vm1191_vm14, 0, %v2098_v55  ;;  %v2140_v36 = vsel %vm1191_vm14, 0, %v2100_v26 }
  0xbf   : > { %v2215_v12 = vsel %vm966_vm8, %v2212_v54, %v2214_v59  ;;  %v2176_v5 = vsel %vm1231_vm6, %v2138_v24, %v2130_v33  ;;  %v2177_v52 = vsel %vm1231_vm6, %v2140_v36, %v3551_v11 }
  0xc0   : > { %1276 = vrot.lane.b32.xlu0 %v3726_v0, %s2768_s12  ;;  %2701 = vmatmul.msk.bf16.gmra.mxu2 %vm1367_vm7, %v2215_v12  ;;  %v1301_v0 = vsel %vm1191_vm14, 0, %v1261_v61  ;;  %v2216_v46 = vrot.slane %v2176_v5, 6  ;;  %v2218_v6 = vrot.slane %v2177_v52, 6 }
  0xc2   : > { %v1150_v58 = vpop.permute.xlu0 %1149  ;;  %v2217_v16 = vsel %vm966_vm8, %v2214_v59, %v2216_v46  ;;  %v2219_v35 = vsel %vm966_vm8, %v2216_v46, %v2218_v6 }
  0xc3   : > { %v1198_v22 = vsel %vm1191_vm14, 0, %v1150_v58 }
  0xc4   : > { %v1237_v62 = vsel %vm1231_vm6, %v1198_v22, %v1184_v29 }
  0xc5   : > { %v1514_v19 = vrot.slane %v1237_v62, 2  ;;  %v1152_v9 = vpop.permute.xlu1 %1151  ;;  %v1188_v37 = vpop.permute.xlu2 %1187 }
  0xc6   : > { %v1200_v54 = vsel %vm1191_vm14, 0, %v1152_v9 }
  0xc7   : > { %v1515_v4 = vsel %vm1510_vm2, %v1512_v60, %v1514_v19  ;;  %v1239_v57 = vsel %vm1231_vm6, %v1200_v54, %v1186_v51 }
  0xc8   : > { %1167 = vrot.lane.b32.xlu0 %v1122_v43, %s2768_s12  ;;  %2678 = vmatmul.msk.bf16.gmra.mxu1 %vm1367_vm7, %v1515_v4  ;;  %v1516_v39 = vrot.slane %v1239_v57, 2 }
  0xca   : > { %v1293_v13 = vpop.permute.xlu0 %1292  ;;  %v1517_v27 = vsel %vm1510_vm2, %v1514_v19, %v1516_v39 }
  0xcb   : > { %v1337_v63 = vsel %vm1231_vm6, %v1301_v0, %v1293_v13 }
  0xcc   : > { %2658 = vmatmul.msk.bf16.gmra.mxu0 %vm1367_vm7, %v1337_v63 }
  0xcd   : > { %v1295_v7 = vpop.permute.xlu1 %1294  ;;  %v1170_v40 = vpop.permute.xlu2 %1169 }
  0xce   : > { %v1218_v59 = vsel %vm1191_vm14, 0, %v1170_v40 }
  0xcf   : > { %v3866_v12 = vsel %vm1231_vm6, %v1218_v59, %v3551_v11 }
  0xd0   : > { %2702 = vmatmul.msk.bf16.gmra.mxu2 %vm1367_vm7, %v2217_v16  ;;  %v1534_v43 = vrot.slane %v3866_v12, 2 }
  0xd2   : > { %v1287_v48 = vpop.permute.xlu0 %1286 }
  0xd3   : > { %v1330_v30 = vsel %vm1191_vm14, %v3169_v34, %v1287_v48 }
  0xd4   : > { %v1352_v42 = vsel %vm1231_vm6, %v1330_v30, %v3551_v11 }
  0xd5   : > { %2671 = vmatmul.msk.bf16.gmra.mxu3 %vm1367_vm7, %v1352_v42  ;;  %v1154_v50 = vpop.permute.xlu1 %1153  ;;  %v1156_v23 = vpop.permute.xlu2 %1155 }
  0xd6   : > { %v1202_v25 = vsel %vm1191_vm14, 0, %v1154_v50  ;;  %v1204_v55 = vsel %vm1191_vm14, 0, %v1156_v23 }
  0xd7   : > { %v1241_v45 = vsel %vm1231_vm6, %v1202_v25, %v1188_v37  ;;  %v1243_v51 = vsel %vm1231_vm6, %v1204_v55, %v3551_v11 }
  0xd8   : > { %2679 = vmatmul.msk.bf16.gmra.mxu1 %vm1367_vm7, %v1517_v27  ;;  %v1518_v41 = vrot.slane %v1241_v45, 2  ;;  %v1520_v9 = vrot.slane %v1243_v51, 2 }
  0xda   : > { %v1263_v61 = vpop.permute.xlu0 %1262  ;;  %v1519_v33 = vsel %vm1510_vm2, %v1516_v39, %v1518_v41  ;;  %v1521_v0 = vsel %vm1510_vm2, %v1518_v41, %v1520_v9 }
  0xdb   : > { %v1303_v2 = vsel %vm1191_vm14, 0, %v1263_v61 }
  0xdc   : > { %v1339_v34 = vsel %vm1231_vm6, %v1303_v2, %v1295_v7 }
  0xdd   : > { %2659 = vmatmul.msk.bf16.gmra.mxu0 %vm1367_vm7, %v1339_v34  ;;  %v1297_v18 = vpop.permute.xlu1 %1296  ;;  %v2104_v62 = vpop.permute.xlu2 %2103 }
  0xde   : > { %v2144_v5 = vsel %vm1191_vm14, 0, %v2104_v62 }
  0xe0   : > { %2703 = vmatmul.msk.bf16.gmra.mxu2 %vm1367_vm7, %v2219_v35 }
  0xe2   : > { %v1289_v17 = vpop.permute.xlu0 %1288 }
  0xe3   : > { %v1333_v60 = vsel %vm1191_vm14, %v3224_v10, %v1289_v17 }
  0xe4   : > { %v1353_v47 = vsel %vm1231_vm6, %v1333_v60, %v3551_v11 }
  0xe5   : > { %2672 = vmatmul.msk.bf16.gmra.mxu3 %vm1367_vm7, %v1353_v47  ;;  %v2102_v29 = vpop.permute.xlu1 %2101  ;;  %v1176_v27 = vpop.permute.xlu2 %1175 }
  0xe6   : > { %v2142_v32 = vsel %vm1191_vm14, 0, %v2102_v29  ;;  %v1227_v40 = vsel %vm1191_vm14, %v3317_v15, %v1176_v27 }
  0xe7   : > { %v2178_v20 = vsel %vm1231_vm6, %v2142_v32, %v3551_v11  ;;  %v1253_v41 = vsel %vm1231_vm6, %v1227_v40, %v3551_v11 }
  0xe8   : > { %2680 = vmatmul.msk.bf16.gmra.mxu1 %vm1367_vm7, %v1519_v33  ;;  %v2220_v1 = vrot.slane %v2178_v20, 6  ;;  %v1540_v33 = vrot.slane %v1253_v41, 2 }
  0xea   : > { %v1265_v56 = vpop.permute.xlu0 %1264  ;;  %v2221_v31 = vsel %vm966_vm8, %v2218_v6, %v2220_v1 }
  0xeb   : > { %v1305_v10 = vsel %vm1191_vm14, 0, %v1265_v56 }
  0xec   : > { %v1341_v14 = vsel %vm1231_vm6, %v1305_v10, %v1297_v18 }
  0xed   : > { %2660 = vmatmul.msk.bf16.gmra.mxu0 %vm1367_vm7, %v1341_v14  ;;  %v1174_v24 = vpop.permute.xlu1 %1173  ;;  %v1271_v60 = vpop.permute.xlu2 %1270 }
  0xee   : > { %v1224_v7 = vsel %vm1191_vm14, %v3308_v21, %v1174_v24  ;;  %v1311_v56 = vsel %vm1191_vm14, 0, %v1271_v60 }
  0xef   : > { %v1252_v48 = vsel %vm1231_vm6, %v1224_v7, %v3551_v11 }
  0xf0   : > { %2704 = vmatmul.msk.bf16.gmra.mxu2 %vm1367_vm7, %v2221_v31  ;;  %v1538_v30 = vrot.slane %v1252_v48, 2  ;;  %v1344_v31 = vsel %vm1231_vm6, %v1311_v56, %v3551_v11 }
  0xf2   : > { %v1172_v58 = vpop.permute.xlu0 %1171  ;;  %v1541_v15 = vsel %vm1510_vm2, %v1538_v30, %v1540_v33 }
  0xf3   : > { %v1221_v22 = vsel %vm1191_vm14, %v3048_v28, %v1172_v58  ;;  %v2179_v28 = vsel %vm1231_vm6, %v2144_v5, %v3551_v11 }
  0xf4   : > { %v1251_v19 = vsel %vm1231_vm6, %v1221_v22, %v3551_v11  ;;  %v2222_v54 = vrot.slane %v2179_v28, 6 }
  0xf5   : > { %v1536_v4 = vrot.slane %v1251_v19, 2  ;;  %v1269_v16 = vpop.permute.xlu1 %1268  ;;  %v1162_v14 = vpop.permute.xlu2 %1161 }
  0xf6   : > { %v2223_v57 = vsel %vm966_vm8, %v2220_v1, %v2222_v54  ;;  %v1309_v61 = vsel %vm1191_vm14, 0, %v1269_v16  ;;  %v1210_v51 = vsel %vm1191_vm14, 0, %v1162_v14 }
  0xf7   : > { %v1537_v13 = vsel %vm1510_vm2, %v1534_v43, %v1536_v4  ;;  %v1539_v36 = vsel %vm1510_vm2, %v1536_v4, %v1538_v30  ;;  %v1343_v25 = vsel %vm1231_vm6, %v1309_v61, %v3551_v11  ;;  %v1246_v24 = vsel %vm1231_vm6, %v1210_v51, %v3551_v11 }
  0xf8   : > { %2681 = vmatmul.msk.bf16.gmra.mxu1 %vm1367_vm7, %v1521_v0  ;;  %2689 = vmatmul.msk.bf16.vlgmr.msrb.gmra.mxu3 %vm1367_vm7, %v1537_v13 }
  0xfa   : > { %v1267_v46 = vpop.permute.xlu0 %1266 }
  0xfb   : > { %v1307_v63 = vsel %vm1191_vm14, 0, %v1267_v46 }
  0xfc   : > { %v1342_v26 = vsel %vm1231_vm6, %v1307_v63, %v3551_v11 }
  0xfd   : > { %2661 = vmatmul.msk.bf16.gmra.mxu0 %vm1367_vm7, %v1342_v26  ;;  %v1160_v52 = vpop.permute.xlu1 %1159  ;;  %v2116_v4 = vpop.permute.xlu2 %2115 }
  0xfe   : > { %v1208_v18 = vsel %vm1191_vm14, 0, %v1160_v52 }
  0xff   : > { %v1245_v17 = vsel %vm1231_vm6, %v1208_v18, %v3551_v11 }
 0x100   : > { %2705 = vmatmul.msk.bf16.gmra.mxu2 %vm1367_vm7, %v2223_v57  ;;  %v1524_v29 = vrot.slane %v1245_v17, 2  ;;  %v2157_v57 = vsel %vm1191_vm14, %v2996_v44, %v2116_v4 }
 0x102   : > { %v1158_v39 = vpop.permute.xlu0 %1157 }
 0x103   : > { %v1206_v42 = vsel %vm1191_vm14, 0, %v1158_v39 }
 0x104   : > { %v1244_v50 = vsel %vm1231_vm6, %v1206_v42, %v3551_v11 }
 0x105   : > { %v1522_v37 = vrot.slane %v1244_v50, 2  ;;  %v2108_v47 = vpop.permute.xlu1 %2107  ;;  %v1275_v39 = vpop.permute.xlu2 %1274 }
 0x106   : > { %v2148_v20 = vsel %vm1191_vm14, 0, %v2108_v47  ;;  %v3959_v50 = vpop.f32.mrf.mxu3 }
 0x107   : > { %v1523_v21 = vsel %vm1510_vm2, %v1520_v9, %v1522_v37  ;;  %v1525_v1 = vsel %vm1510_vm2, %v1522_v37, %v1524_v29  ;;  %v2181_v23 = vsel %vm1231_vm6, %v2148_v20, %v3551_v11  ;;  %v1526_v9 = vrot.slane %v1246_v24, 2 }
 0x108   : > { %2682 = vmatmul.msk.bf16.gmra.mxu1 %vm1367_vm7, %v1523_v21  ;;  %2690 = vmatmul.msk.bf16.gmra.mxu3 %vm1367_vm7, %v1539_v36  ;;  %v2226_v10 = vrot.slane %v2181_v23, 6 }
 0x109   : > { %v1527_v5 = vsel %vm1510_vm2, %v1524_v29, %v1526_v9 }
 0x10a   : > { %v2106_v2 = vpop.permute.xlu0 %2105 }
 0x10b   : > { %v2146_v34 = vsel %vm1191_vm14, 0, %v2106_v2 }
 0x10c   : > { %v2180_v6 = vsel %vm1231_vm6, %v2146_v34, %v3551_v11 }
 0x10d   : > { %v2224_v35 = vrot.slane %v2180_v6, 6  ;;  %2662 = vmatmul.msk.bf16.gmra.mxu0 %vm1367_vm7, %v1343_v25  ;;  %v2110_v22 = vpop.permute.xlu1 %2109  ;;  %v1166_v41 = vpop.permute.xlu2 %1165 }
 0x10e   : > { %v3983_v60 = vpop.f32.mrf.mxu3  ;;  %v1214_v56 = vsel %vm1191_vm14, 0, %v1166_v41 }
 0x10f   : > { %v2225_v45 = vsel %vm966_vm8, %v2222_v54, %v2224_v35  ;;  %v2227_v58 = vsel %vm966_vm8, %v2224_v35, %v2226_v10 }
 0x110   : > { %2706 = vmatmul.msk.bf16.gmra.mxu2 %vm1367_vm7, %v2225_v45  ;;  %v1315_v45 = vsel %vm1191_vm14, 0, %v1275_v39 }
 0x112   : > { %v1178_v32 = vpop.permute.xlu0 %1177 }
 0x113   : > { %v1230_v59 = vsel %vm1191_vm14, %v3387_v3, %v1178_v32  ;;  %v2150_v3 = vsel %vm1191_vm14, 0, %v2110_v22 }
 0x114   : > { %v1254_v62 = vsel %vm1231_vm6, %v1230_v59, %v3551_v11  ;;  %v2182_v13 = vsel %vm1231_vm6, %v2150_v3, %v3551_v11 }
 0x115   : > { %v1542_v19 = vrot.slane %v1254_v62, 2  ;;  %v1164_v63 = vpop.permute.xlu1 %1163  ;;  %v2228_v26 = vrot.slane %v2182_v13, 6 }
 0x116   : > { %v1212_v7 = vsel %vm1191_vm14, 0, %v1164_v63  ;;  %v4002_v3 = vpop.f32.mrf.mxu3 }
 0x117   : > { %v1543_v0 = vsel %vm1510_vm2, %v1540_v33, %v1542_v19  ;;  %v2229_v48 = vsel %vm966_vm8, %v2226_v10, %v2228_v26  ;;  %v1247_v30 = vsel %vm1231_vm6, %v1212_v7, %v3551_v11  ;;  %v2122_v7 = vpop.permute.xlu2 %2121 }
 0x118   : > { %2683 = vmatmul.msk.bf16.gmra.mxu1 %vm1367_vm7, %v1525_v1  ;;  %2691 = vmatmul.msk.bf16.gmra.mxu3 %vm1367_vm7, %v1541_v15  ;;  %v1528_v36 = vrot.slane %v1247_v30, 2  ;;  %v1346_v1 = vsel %vm1231_vm6, %v1315_v45, %v3551_v11 }
 0x11a   : > { %v1273_v55 = vpop.permute.xlu0 %1272  ;;  %v1529_v25 = vsel %vm1510_vm2, %v1526_v9, %v1528_v36 }
 0x11b   : > { %v1313_v46 = vsel %vm1191_vm14, 0, %v1273_v55 }
 0x11c   : > { %v1345_v54 = vsel %vm1231_vm6, %v1313_v46, %v3551_v11 }
 0x11d   : > { %2663 = vmatmul.msk.bf16.gmra.mxu0 %vm1367_vm7, %v1344_v31  ;;  %v2120_v35 = vpop.permute.xlu1 %2119 }
 0x11e   : > { %v2163_v15 = vsel %vm1191_vm14, %v3208_v53, %v2120_v35  ;;  %v1248_v53 = vsel %vm1231_vm6, %v1214_v56, %v3551_v11 }
 0x11f   : > { %v2187_v31 = vsel %vm1231_vm6, %v2163_v15, %v3551_v11  ;;  %v1530_v24 = vrot.slane %v1248_v53, 2 }
 0x120   : > { %2707 = vmatmul.msk.bf16.gmra.mxu2 %vm1367_vm7, %v2227_v58  ;;  %v2238_v58 = vrot.slane %v2187_v31, 6 }
 0x121   : > { %v1531_v4 = vsel %vm1510_vm2, %v1528_v36, %v1530_v24 }
 0x122   : > { %v2118_v28 = vpop.permute.xlu0 %2117 }
 0x123   : > { %v2160_v16 = vsel %vm1191_vm14, %v3012_v49, %v2118_v28  ;;  %v3963_v49 = vsel %vm1231_vm6, %v2157_v57, %v3551_v11 }
 0x124   : > { %v2186_v42 = vsel %vm1231_vm6, %v2160_v16, %v3551_v11  ;;  %v2234_v61 = vrot.slane %v3963_v49, 6 }
 0x125   : > { %v2236_v27 = vrot.slane %v2186_v42, 6  ;;  %v2114_v51 = vpop.permute.xlu1 %2113  ;;  %v2166_v42 = vsel %vm1191_vm14, %v3263_v38, %v2122_v7 }
 0x126   : > { %v1413_v44 = vpop.f32.mrf.mxu0  ;;  %v2154_v19 = vsel %vm1191_vm14, 0, %v2114_v51 }
 0x127   : > { %v2237_v18 = vsel %vm966_vm8, %v2234_v61, %v2236_v27 }
 0x128   : > { %2684 = vmatmul.msk.bf16.gmra.mxu1 %vm1367_vm7, %v1527_v5  ;;  %2692 = vmatmul.msk.bf16.gmra.mxu3 %vm1367_vm7, %v1543_v0  ;;  %v2239_v5 = vsel %vm966_vm8, %v2236_v27, %v2238_v58  ;;  %v2184_v0 = vsel %vm1231_vm6, %v2154_v19, %v3551_v11 }
 0x12a   : > { %v2112_v21 = vpop.permute.xlu0 %2111 }
 0x12b   : > { %v2313_v37 = vpop.f32.mrf.mxu2  ;;  %v2152_v2 = vsel %vm1191_vm14, 0, %v2112_v21  ;;  %v4018_v21 = vpop.f32.mrf.mxu3 }
 0x12c   : > { %v2183_v40 = vsel %vm1231_vm6, %v2152_v2, %v3551_v11 }
 0x12d   : > { %2664 = vmatmul.msk.bf16.gmra.mxu0 %vm1367_vm7, %v1345_v54  ;;  %v2230_v47 = vrot.slane %v2183_v40, 6  ;;  %v1279_v35 = vpop.permute.xlu1 %1278 }
 0x12e   : > { %v1415_v33 = vpop.f32.mrf.mxu0 }
 0x12f   : > { %v2231_v14 = vsel %vm966_vm8, %v2228_v26, %v2230_v47  ;;  %v2232_v26 = vrot.slane %v2184_v0, 6 }
 0x130   : > { %2708 = vmatmul.msk.bf16.gmra.mxu2 %vm1367_vm7, %v2229_v48 }
 0x132   : > { %v1277_v59 = vpop.permute.xlu0 %1276 }
 0x133   : > { %v2315_v29 = vpop.f32.mrf.mxu2  ;;  %v1317_v13 = vsel %vm1191_vm14, 0, %v1277_v59 }
 0x134   : > { %v1613_v52 = vpop.f32.mrf.mxu1  ;;  %v1347_v57 = vsel %vm1231_vm6, %v1317_v13, %v3551_v11 }
 0x135   : > { %v1614_v34 = vadd.f32 %v1613_v52, %v1413_v44  ;;  %v2188_v52 = vsel %vm1231_vm6, %v2166_v42, %v3551_v11 }
 0x137   : > { %v2393_v6 = vadd.f32 %v2313_v37, %v1614_v34  ;;  %v2233_v37 = vsel %vm966_vm8, %v2230_v47, %v2232_v26 }
 0x138   : > { %2685 = vmatmul.msk.bf16.gmra.mxu1 %vm1367_vm7, %v1529_v25  ;;  %2712 = vmatmul.msk.bf16.vlgmr.msra.gmra.mxu3 %vm1367_vm7, %v2237_v18  ;;  %v2240_v25 = vrot.slane %v2188_v52, 6 }
 0x139   : > { %v2425_v17 = vmax.f32 %v2393_v6, 0.0 }
 0x13a   : > { %v1168_v46 = vpop.permute.xlu0 %1167 }
 0x13b   : > { %v2457_v32 = vpack.c.bf16 %v2425_v17, %v2425_v17  ;;  %v1216_v48 = vsel %vm1191_vm14, 0, %v1168_v46  ;;  %v2241_v17 = vsel %vm966_vm8, %v2238_v58, %v2240_v25 }
 0x13c   : > { %v1615_v20 = vpop.f32.mrf.mxu1  ;;  %v1249_v44 = vsel %vm1231_vm6, %v1216_v48, %v3551_v11 }
 0x13d   : > { %2490 = vst.msk [vmem:[%s3981_s3] sm:$0xf] %vm2489_vm15, %v2457_v32  ;;  %v1616_v23 = vadd.f32 %v1615_v20, %v1415_v33  ;;  %2665 = vmatmul.msk.bf16.gmra.mxu0 %vm1367_vm7, %v1346_v1  ;;  %v1532_v34 = vrot.slane %v1249_v44, 2 }
 0x13f   : > { %v2394_v10 = vadd.f32 %v2315_v29, %v1616_v23  ;;  %v1533_v45 = vsel %vm1510_vm2, %v1530_v24, %v1532_v34  ;;  %v1319_v29 = vsel %vm1191_vm14, 0, %v1279_v35  ;;  %v1535_v24 = vsel %vm1510_vm2, %v1532_v34, %v1534_v43 }
 0x140   : > { %2709 = vmatmul.msk.bf16.gmra.mxu2 %vm1367_vm7, %v2231_v14  ;;  %v1348_v1 = vsel %vm1231_vm6, %v1319_v29, %v3551_v11 }
 0x141   : > { %v2426_v55 = vmax.f32 %v2394_v10, 0.0  ;;  %v2235_v10 = vsel %vm966_vm8, %v2232_v26, %v2234_v61 }
 0x143   : > { %v2458_v22 = vpack.c.bf16 %v2426_v55, %v2426_v55  ;;  %v2318_v62 = vpop.f32.mrf.mxu2  ;;  %v2189_v55 = vsel %vm1231_vm6, %v3436_v8, %v3551_v11 }
 0x144   : > { %v2242_v49 = vrot.slane %v2189_v55, 6 }
 0x145   : > { %2491 = vst.msk [vmem:[%s3981_s3 + $0x4] sm:$0xf] %vm2489_vm15, %v2458_v22  ;;  %v1618_v9 = vpop.f32.mrf.mxu1 }
 0x146   : > { %v2243_v19 = vsel %vm966_vm8, %v2240_v25, %v2242_v49 }
 0x148   : > { %2686 = vmatmul.msk.bf16.gmra.mxu1 %vm1367_vm7, %v1531_v4  ;;  %2713 = vmatmul.msk.bf16.gmra.mxu3 %vm1367_vm7, %v2239_v5 }
 0x149   : > { %v1418_v28 = vpop.f32.mrf.mxu0 }
 0x14a   : > { %v1619_v63 = vadd.f32 %v1618_v9, %v1418_v28 }
 0x14b   : > { %v2320_v54 = vpop.f32.mrf.mxu2 }
 0x14c   : > { %v2395_v16 = vadd.f32 %v2318_v62, %v1619_v63  ;;  %v1281_v62 = vpop.permute.xlu2 %1280 }
 0x14d   : > { %2666 = vmatmul.msk.bf16.gmra.mxu0 %vm1367_vm7, %v1347_v57  ;;  %v1620_v39 = vpop.f32.mrf.mxu1  ;;  %v1321_v8 = vsel %vm1191_vm14, 0, %v1281_v62 }
 0x14e   : > { %v2427_v30 = vmax.f32 %v2395_v16, 0.0  ;;  %v1349_v12 = vsel %vm1231_vm6, %v1321_v8, %v3551_v11 }
 0x150   : > { %v2459_v36 = vpack.c.bf16 %v2427_v30, %v2427_v30  ;;  %2710 = vmatmul.msk.bf16.gmra.mxu2 %vm1367_vm7, %v2233_v37 }
 0x151   : > { %v1420_v27 = vpop.f32.mrf.mxu0 }
 0x152   : > { %2492 = vst.msk [vmem:[%s3981_s3 + $0x8] sm:$0xf] %vm2489_vm15, %v2459_v36  ;;  %v1621_v2 = vadd.f32 %v1620_v39, %v1420_v27 }
 0x153   : > { %v2323_v38 = vpop.f32.mrf.mxu2 }
 0x154   : > { %v2396_v6 = vadd.f32 %v2320_v54, %v1621_v2 }
 0x155   : > { %v1623_v18 = vpop.f32.mrf.mxu1 }
 0x156   : > { %v2428_v40 = vmax.f32 %v2396_v6, 0.0 }
 0x158   : > { %v2460_v41 = vpack.c.bf16 %v2428_v40, %v2428_v40  ;;  %v4029_v47 = vpop.f32.mrf.mxu3  ;;  %2687 = vmatmul.msk.bf16.gmra.mxu1 %vm1367_vm7, %v1533_v45  ;;  %2714 = vmatmul.msk.bf16.gmra.mxu3 %vm1367_vm7, %v2241_v17 }
 0x15a   : > { %2493 = vst.msk [vmem:[%s3981_s3 + $0xc] sm:$0xf] %vm2489_vm15, %v2460_v41  ;;  %v1423_v32 = vpop.f32.mrf.mxu0 }
 0x15b   : > { %v1624_v33 = vadd.f32 %v1623_v18, %v1423_v32  ;;  %v2325_v20 = vpop.f32.mrf.mxu2 }
 0x15d   : > { %v2397_v15 = vadd.f32 %v2323_v38, %v1624_v33  ;;  %2667 = vmatmul.msk.bf16.gmra.mxu0 %vm1367_vm7, %v1348_v1  ;;  %v1625_v23 = vpop.f32.mrf.mxu1 }
 0x15f   : > { %v2429_v56 = vmax.f32 %v2397_v15, 0.0 }
 0x160   : > { %v4042_v14 = vpop.f32.mrf.mxu3  ;;  %2711 = vmatmul.msk.bf16.gmra.mxu2 %vm1367_vm7, %v2235_v10 }
 0x161   : > { %v2461_v31 = vpack.c.bf16 %v2429_v56, %v2429_v56 }
 0x162   : > { %v1425_v59 = vpop.f32.mrf.mxu0 }
 0x163   : > { %2494 = vst.msk [vmem:[%s3981_s3 + $0x10] sm:$0xf] %vm2489_vm15, %v2461_v31  ;;  %v1626_v53 = vadd.f32 %v1625_v23, %v1425_v59  ;;  %v2328_v51 = vpop.f32.mrf.mxu2 }
 0x165   : > { %v2398_v58 = vadd.f32 %v2325_v20, %v1626_v53  ;;  %v1628_v22 = vpop.f32.mrf.mxu1 }
 0x167   : > { %v2430_v61 = vmax.f32 %v2398_v58, 0.0 }
 0x168   : > { %2688 = vmatmul.msk.bf16.gmra.mxu1 %vm1367_vm7, %v1535_v24  ;;  %2715 = vmatmul.msk.bf16.gmra.mxu3 %vm1367_vm7, %v2243_v19  ;;  %v4057_v4 = vpop.f32.mrf.mxu3 }
 0x169   : > { %v2462_v9 = vpack.c.bf16 %v2430_v61, %v2430_v61 }
 0x16a   : > { %v1428_v5 = vpop.f32.mrf.mxu0 }
 0x16b   : > { %2495 = vst.msk [vmem:[%s3981_s3 + $0x14] sm:$0xf] %vm2489_vm15, %v2462_v9  ;;  %v1629_v0 = vadd.f32 %v1628_v22, %v1428_v5  ;;  %v2330_v13 = vpop.f32.mrf.mxu2 }
 0x16d   : > { %v2399_v43 = vadd.f32 %v2328_v51, %v1629_v0  ;;  %2668 = vmatmul.msk.bf16.gmra.mxu0 %vm1367_vm7, %v1349_v12  ;;  %v1630_v28 = vpop.f32.mrf.mxu1 }
 0x16f   : > { %v2431_v46 = vmax.f32 %v2399_v43, 0.0 }
 0x170   : > { %v4066_v54 = vpop.f32.mrf.mxu3 }
 0x171   : > { %v2463_v63 = vpack.c.bf16 %v2431_v46, %v2431_v46 }
 0x172   : > { %v1430_v26 = vpop.f32.mrf.mxu0 }
 0x173   : > { %2496 = vst.msk [vmem:[%s3981_s3 + $0x18] sm:$0xf] %vm2489_vm15, %v2463_v63  ;;  %v1631_v7 = vadd.f32 %v1630_v28, %v1430_v26  ;;  %v2333_v16 = vpop.f32.mrf.mxu2 }
 0x175   : > { %v2400_v57 = vadd.f32 %v2330_v13, %v1631_v7  ;;  %v1633_v48 = vpop.f32.mrf.mxu1 }
 0x177   : > { %v2432_v39 = vmax.f32 %v2400_v57, 0.0 }
 0x179   : > { %v2464_v30 = vpack.c.bf16 %v2432_v39, %v2432_v39 }
 0x17a   : > { %v1433_v11 = vpop.f32.mrf.mxu0 }
 0x17b   : > { %2497 = vst.msk [vmem:[%s3981_s3 + $0x1c] sm:$0xf] %vm2489_vm15, %v2464_v30  ;;  %v1634_v42 = vadd.f32 %v1633_v48, %v1433_v11  ;;  %v4070_v37 = vpop.f32.mrf.mxu3  ;;  %v2335_v44 = vpop.f32.mrf.mxu2 }
 0x17d   : > { %v2401_v36 = vadd.f32 %v2333_v16, %v1634_v42  ;;  %v1635_v27 = vpop.f32.mrf.mxu1 }
 0x17f   : > { %v2433_v52 = vmax.f32 %v2401_v36, 0.0 }
 0x181   : > { %v2465_v2 = vpack.c.bf16 %v2433_v52, %v2433_v52 }
 0x182   : > { %v1435_v34 = vpop.f32.mrf.mxu0 }
 0x183   : > { %2498 = vst.msk [vmem:[%s3981_s3 + $0x20] sm:$0xf] %vm2489_vm15, %v2465_v2  ;;  %v1636_v38 = vadd.f32 %v1635_v27, %v1435_v34  ;;  %v4074_v6 = vpop.f32.mrf.mxu3  ;;  %v2338_v25 = vpop.f32.mrf.mxu2 }
 0x185   : > { %v2402_v18 = vadd.f32 %v2335_v44, %v1636_v38  ;;  %v1638_v35 = vpop.f32.mrf.mxu1  ;;  %v1674_v38 = vadd.f32 %v4070_v37, %v3959_v50 }
 0x187   : > { %v2434_v40 = vmax.f32 %v2402_v18, 0.0 }
 0x189   : > { %v2466_v45 = vpack.c.bf16 %v2434_v40, %v2434_v40 }
 0x18a   : > { %v1438_v17 = vpop.f32.mrf.mxu0 }
 0x18b   : > { %2499 = vst.msk [vmem:[%s3981_s3 + $0x24] sm:$0xf] %vm2489_vm15, %v2466_v45  ;;  %v1639_v41 = vadd.f32 %v1638_v35, %v1438_v17  ;;  %v4078_v29 = vpop.f32.mrf.mxu3  ;;  %v2340_v32 = vpop.f32.mrf.mxu2 }
 0x18d   : > { %v2403_v33 = vadd.f32 %v2338_v25, %v1639_v41  ;;  %v1640_v20 = vpop.f32.mrf.mxu1 }
 0x18f   : > { %v2435_v1 = vmax.f32 %v2403_v33, 0.0 }
 0x191   : > { %v2467_v15 = vpack.c.bf16 %v2435_v1, %v2435_v1 }
 0x192   : > { %v1440_v23 = vpop.f32.mrf.mxu0 }
 0x193   : > { %2500 = vst.msk [vmem:[%s3981_s3 + $0x28] sm:$0xf] %vm2489_vm15, %v2467_v15  ;;  %v1641_v56 = vadd.f32 %v1640_v20, %v1440_v23  ;;  %v4082_v10 = vpop.f32.mrf.mxu3  ;;  %v2343_v31 = vpop.f32.mrf.mxu2  ;;  %v1676_v15 = vadd.f32 %v4074_v6, %v3983_v60  ;;  %v1679_v60 = vadd.f32 %v4078_v29, %v4002_v3 }
 0x194   : > { %v1681_v3 = vadd.f32 %v4082_v10, %v4018_v21 }
 0x195   : > { %v2404_v59 = vadd.f32 %v2340_v32, %v1641_v56  ;;  %v1643_v55 = vpop.f32.mrf.mxu1 }
 0x197   : > { %v2436_v53 = vmax.f32 %v2404_v59, 0.0 }
 0x199   : > { %v2468_v51 = vpack.c.bf16 %v2436_v53, %v2436_v53 }
 0x19a   : > { %v1443_v58 = vpop.f32.mrf.mxu0 }
 0x19b   : > { %2501 = vst.msk [vmem:[%s3981_s3 + $0x2c] sm:$0xf] %vm2489_vm15, %v2468_v51  ;;  %v1644_v22 = vadd.f32 %v1643_v55, %v1443_v58  ;;  %v4086_v49 = vpop.f32.mrf.mxu3  ;;  %v2345_v62 = vpop.f32.mrf.mxu2 }
 0x19c   : > { %v1684_v21 = vadd.f32 %v4086_v49, %v4029_v47 }
 0x19d   : > { %v2405_v61 = vadd.f32 %v2343_v31, %v1644_v22  ;;  %v1645_v24 = vpop.f32.mrf.mxu1 }
 0x19f   : > { %v2437_v19 = vmax.f32 %v2405_v61, 0.0 }
 0x1a1   : > { %v2469_v8 = vpack.c.bf16 %v2437_v19, %v2437_v19 }
 0x1a2   : > { %v1445_v9 = vpop.f32.mrf.mxu0 }
 0x1a3   : > { %2502 = vst.msk [vmem:[%s3981_s3 + $0x30] sm:$0xf] %vm2489_vm15, %v2469_v8  ;;  %v1646_v5 = vadd.f32 %v1645_v24, %v1445_v9  ;;  %v4090_v0 = vpop.f32.mrf.mxu3  ;;  %v2348_v13 = vpop.f32.mrf.mxu2 }
 0x1a4   : > { %v1686_v47 = vadd.f32 %v4090_v0, %v4042_v14 }
 0x1a5   : > { %v2406_v12 = vadd.f32 %v2345_v62, %v1646_v5  ;;  %v1648_v43 = vpop.f32.mrf.mxu1 }
 0x1a7   : > { %v2438_v28 = vmax.f32 %v2406_v12, 0.0 }
 0x1a9   : > { %v2470_v46 = vpack.c.bf16 %v2438_v28, %v2438_v28 }
 0x1aa   : > { %v1448_v63 = vpop.f32.mrf.mxu0 }
 0x1ab   : > { %2503 = vst.msk [vmem:[%s3981_s3 + $0x34] sm:$0xf] %vm2489_vm15, %v2470_v46  ;;  %v1649_v26 = vadd.f32 %v1648_v43, %v1448_v63  ;;  %v4094_v7 = vpop.f32.mrf.mxu3  ;;  %v2350_v16 = vpop.f32.mrf.mxu2 }
 0x1ad   : > { %v2407_v57 = vadd.f32 %v2348_v13, %v1649_v26  ;;  %v1650_v48 = vpop.f32.mrf.mxu1 }
 0x1af   : > { %v2439_v39 = vmax.f32 %v2407_v57, 0.0 }
 0x1b1   : > { %v2471_v30 = vpack.c.bf16 %v2439_v39, %v2439_v39 }
 0x1b2   : > { %v1450_v11 = vpop.f32.mrf.mxu0 }
 0x1b3   : > { %2504 = vst.msk [vmem:[%s3981_s3 + $0x38] sm:$0xf] %vm2489_vm15, %v2471_v30  ;;  %v1651_v42 = vadd.f32 %v1650_v48, %v1450_v11  ;;  %v4098_v44 = vpop.f32.mrf.mxu3  ;;  %v2353_v36 = vpop.f32.mrf.mxu2 }
 0x1b5   : > { %v2408_v27 = vadd.f32 %v2350_v16, %v1651_v42  ;;  %v1653_v52 = vpop.f32.mrf.mxu1 }
 0x1b7   : > { %v2440_v2 = vmax.f32 %v2408_v27, 0.0 }
 0x1b9   : > { %v2472_v34 = vpack.c.bf16 %v2440_v2, %v2440_v2 }
 0x1ba   : > { %v1453_v25 = vpop.f32.mrf.mxu0 }
 0x1bb   : > { %2505 = vst.msk [vmem:[%s3981_s3 + $0x3c] sm:$0xf] %vm2489_vm15, %v2472_v34  ;;  %v1654_v18 = vadd.f32 %v1653_v52, %v1453_v25  ;;  %v2355_v35 = vpop.f32.mrf.mxu2  ;;  %v2373_v40 = vpop.f32.mrf.mxu3 }
 0x1bc   : > { %v2417_v45 = vadd.f32 %v2373_v40, %v1674_v38 }
 0x1bd   : > { %v2409_v17 = vadd.f32 %v2353_v36, %v1654_v18  ;;  %v1655_v41 = vpop.f32.mrf.mxu1 }
 0x1be   : > { %v2449_v32 = vmax.f32 %v2417_v45, 0.0 }
 0x1bf   : > { %v2441_v33 = vmax.f32 %v2409_v17, 0.0 }
 0x1c0   : > { %v2481_v20 = vpack.c.bf16 %v2449_v32, %v2449_v32 }
 0x1c1   : > { %v2473_v1 = vpack.c.bf16 %v2441_v33, %v2441_v33 }
 0x1c2   : > { %2514 = vst.msk [vmem:[%s3981_s3 + $0x60] sm:$0xf] %vm2489_vm15, %v2481_v20  ;;  %v1455_v50 = vpop.f32.mrf.mxu0 }
 0x1c3   : > { %2506 = vst.msk [vmem:[%s3981_s3 + $0x40] sm:$0xf] %vm2489_vm15, %v2473_v1  ;;  %v1656_v37 = vadd.f32 %v1655_v41, %v1455_v50  ;;  %v2358_v23 = vpop.f32.mrf.mxu2  ;;  %v2375_v56 = vpop.f32.mrf.mxu3  ;;  %v1689_v50 = vadd.f32 %v4094_v7, %v4057_v4  ;;  %v1691_v4 = vadd.f32 %v4098_v44, %v4066_v54 }
 0x1c4   : > { %v2418_v31 = vadd.f32 %v2375_v56, %v1676_v15 }
 0x1c5   : > { %v2410_v59 = vadd.f32 %v2355_v35, %v1656_v37  ;;  %v1658_v55 = vpop.f32.mrf.mxu1 }
 0x1c6   : > { %v2450_v53 = vmax.f32 %v2418_v31, 0.0 }
 0x1c7   : > { %v2442_v51 = vmax.f32 %v2410_v59, 0.0 }
 0x1c8   : > { %v2482_v58 = vpack.c.bf16 %v2450_v53, %v2450_v53 }
 0x1c9   : > { %v2474_v22 = vpack.c.bf16 %v2442_v51, %v2442_v51 }
 0x1ca   : > { %2515 = vst.msk [vmem:[%s3981_s3 + $0x64] sm:$0xf] %vm2489_vm15, %v2482_v58  ;;  %v1458_v6 = vpop.f32.mrf.mxu0 }
 0x1cb   : > { %2507 = vst.msk [vmem:[%s3981_s3 + $0x44] sm:$0xf] %vm2489_vm15, %v2474_v22  ;;  %v1659_v62 = vadd.f32 %v1658_v55, %v1458_v6  ;;  %v2378_v61 = vpop.f32.mrf.mxu3  ;;  %v2360_v24 = vpop.f32.mrf.mxu2 }
 0x1cc   : > { %v2419_v19 = vadd.f32 %v2378_v61, %v1679_v60 }
 0x1cd   : > { %v2411_v8 = vadd.f32 %v2358_v23, %v1659_v62  ;;  %v1660_v9 = vpop.f32.mrf.mxu1 }
 0x1ce   : > { %v2451_v5 = vmax.f32 %v2419_v19, 0.0 }
 0x1cf   : > { %v2443_v13 = vmax.f32 %v2411_v8, 0.0 }
 0x1d0   : > { %v2483_v12 = vpack.c.bf16 %v2451_v5, %v2451_v5 }
 0x1d1   : > { %v2475_v43 = vpack.c.bf16 %v2443_v13, %v2443_v13 }
 0x1d2   : > { %2516 = vst.msk [vmem:[%s3981_s3 + $0x68] sm:$0xf] %vm2489_vm15, %v2483_v12  ;;  %v1460_v29 = vpop.f32.mrf.mxu0 }
 0x1d3   : > { %2508 = vst.msk [vmem:[%s3981_s3 + $0x48] sm:$0xf] %vm2489_vm15, %v2475_v43  ;;  %v1661_v28 = vadd.f32 %v1660_v9, %v1460_v29  ;;  %v2380_v46 = vpop.f32.mrf.mxu3  ;;  %v2363_v57 = vpop.f32.mrf.mxu2 }
 0x1d4   : > { %v2420_v63 = vadd.f32 %v2380_v46, %v1681_v3 }
 0x1d5   : > { %v2412_v26 = vadd.f32 %v2360_v24, %v1661_v28  ;;  %v1663_v16 = vpop.f32.mrf.mxu1 }
 0x1d6   : > { %v2452_v48 = vmax.f32 %v2420_v63, 0.0 }
 0x1d7   : > { %v2444_v39 = vmax.f32 %v2412_v26, 0.0 }
 0x1d8   : > { %v2484_v30 = vpack.c.bf16 %v2452_v48, %v2452_v48 }
 0x1d9   : > { %v2476_v11 = vpack.c.bf16 %v2444_v39, %v2444_v39 }
 0x1da   : > { %2517 = vst.msk [vmem:[%s3981_s3 + $0x6c] sm:$0xf] %vm2489_vm15, %v2484_v30  ;;  %v1463_v10 = vpop.f32.mrf.mxu0 }
 0x1db   : > { %2509 = vst.msk [vmem:[%s3981_s3 + $0x4c] sm:$0xf] %vm2489_vm15, %v2476_v11  ;;  %v1664_v42 = vadd.f32 %v1663_v16, %v1463_v10  ;;  %v2383_v36 = vpop.f32.mrf.mxu3  ;;  %v2365_v25 = vpop.f32.mrf.mxu2 }
 0x1dc   : > { %v2421_v27 = vadd.f32 %v2383_v36, %v1684_v21 }
 0x1dd   : > { %v2413_v52 = vadd.f32 %v2363_v57, %v1664_v42  ;;  %v1665_v34 = vpop.f32.mrf.mxu1 }
 0x1de   : > { %v2453_v2 = vmax.f32 %v2421_v27, 0.0 }
 0x1df   : > { %v2445_v38 = vmax.f32 %v2413_v52, 0.0 }
 0x1e0   : > { %v2485_v18 = vpack.c.bf16 %v2453_v2, %v2453_v2 }
 0x1e1   : > { %v2477_v35 = vpack.c.bf16 %v2445_v38, %v2445_v38 }
 0x1e2   : > { %2518 = vst.msk [vmem:[%s3981_s3 + $0x70] sm:$0xf] %vm2489_vm15, %v2485_v18  ;;  %v1465_v49 = vpop.f32.mrf.mxu0 }
 0x1e3   : > { %2510 = vst.msk [vmem:[%s3981_s3 + $0x50] sm:$0xf] %vm2489_vm15, %v2477_v35  ;;  %v1666_v40 = vadd.f32 %v1665_v34, %v1465_v49  ;;  %v2385_v45 = vpop.f32.mrf.mxu3  ;;  %v2368_v14 = vpop.f32.mrf.mxu2 }
 0x1e4   : > { %v2422_v17 = vadd.f32 %v2385_v45, %v1686_v47 }
 0x1e5   : > { %v2414_v41 = vadd.f32 %v2365_v25, %v1666_v40  ;;  %v1668_v1 = vpop.f32.mrf.mxu1 }
 0x1e6   : > { %v2454_v32 = vmax.f32 %v2422_v17, 0.0 }
 0x1e7   : > { %v2446_v33 = vmax.f32 %v2414_v41, 0.0 }
 0x1e8   : > { %v2486_v20 = vpack.c.bf16 %v2454_v32, %v2454_v32 }
 0x1e9   : > { %v2478_v15 = vpack.c.bf16 %v2446_v33, %v2446_v33 }
 0x1ea   : > { %2519 = vst.msk [vmem:[%s3981_s3 + $0x74] sm:$0xf] %vm2489_vm15, %v2486_v20  ;;  %v1468_v0 = vpop.f32.mrf.mxu0 }
 0x1eb   : > { %2511 = vst.msk [vmem:[%s3981_s3 + $0x54] sm:$0xf] %vm2489_vm15, %v2478_v15  ;;  %v1669_v37 = vadd.f32 %v1668_v1, %v1468_v0  ;;  %v2388_v23 = vpop.f32.mrf.mxu3  ;;  %v2370_v6 = vpop.f32.mrf.mxu2 }
 0x1ec   : > { %v2423_v56 = vadd.f32 %v2388_v23, %v1689_v50 }
 0x1ed   : > { %v2415_v31 = vadd.f32 %v2368_v14, %v1669_v37  ;;  %v1670_v7 = vpop.f32.mrf.mxu1 }
 0x1ee   : > { %v2455_v59 = vmax.f32 %v2423_v56, 0.0 }
 0x1ef   : > { %v2447_v55 = vmax.f32 %v2415_v31, 0.0 }
 0x1f0   : > { %v2487_v53 = vpack.c.bf16 %v2455_v59, %v2455_v59 }
 0x1f1   : > { %v2479_v51 = vpack.c.bf16 %v2447_v55, %v2447_v55 }
 0x1f2   : > { %2520 = vst.msk [vmem:[%s3981_s3 + $0x78] sm:$0xf] %vm2489_vm15, %v2487_v53  ;;  %v1470_v58 = vpop.f32.mrf.mxu0 }
 0x1f3   : > { %2512 = vst.msk [vmem:[%s3981_s3 + $0x58] sm:$0xf] %vm2489_vm15, %v2479_v51  ;;  %v1671_v22 = vadd.f32 %v1670_v7, %v1470_v58  ;;  %v2390_v60 = vpop.f32.mrf.mxu3 }
 0x1f4   : > { %v2424_v62 = vadd.f32 %v2390_v60, %v1691_v4 }
 0x1f5   : > { %v2416_v61 = vadd.f32 %v2370_v6, %v1671_v22 }
 0x1f6   : > { %v2456_v24 = vmax.f32 %v2424_v62, 0.0 }
 0x1f7   : > { %v2448_v19 = vmax.f32 %v2416_v61, 0.0 }
 0x1f8   : > { %v2488_v8 = vpack.c.bf16 %v2456_v24, %v2456_v24 }
 0x1f9   : > { %v2480_v9 = vpack.c.bf16 %v2448_v19, %v2448_v19 }
 0x1fa   : > { %2521 = vst.msk [vmem:[%s3981_s3 + $0x7c] sm:$0xf] %vm2489_vm15, %v2488_v8 }
 0x1fb   : > { %2513 = vst.msk [vmem:[%s3981_s3 + $0x5c] sm:$0xf] %vm2489_vm15, %v2480_v9 }
 0x1fc PF: > { %s12_s9 = sadd.s32 1, %s2764_s9  }
 0x1fd   : > { %p9_p4 = scmp.ge.s32.totalorder %s12_s9, 4  }
 0x1ff   :  { %11 = sbr.rel (!%p9_p4) target bundleno = 1 (0x1), region = 60 }

</bundles_post_ra>
